<compile_context>
chip_gen: v7x
topology: tpu7x:2x2x1
jax: 0.10.0
libtpu: 0.0.40
codegen_flags: <defaults>
</compile_context>

<pallas_src>
import functools
import math

import jax
import jax.numpy as jnp
from jax.experimental import pallas as pl
from jax.experimental.pallas import tpu as pltpu


# ----------------------------- Pallas kernel ------------------------------ #

def _layer_norm(x, gamma, beta, eps=1e-5):
    mu = jnp.mean(x, axis=-1, keepdims=True)
    d = x - mu
    var = jnp.mean(d * d, axis=-1, keepdims=True)
    return d * jax.lax.rsqrt(var + eps) * gamma + beta


def _gelu_exact(x):
    # nn.GELU() default (exact, erf-based)
    return 0.5 * x * (1.0 + jax.lax.erf(x * (1.0 / math.sqrt(2.0))))


def aifi_encoder_kernel(
    src_ref, qkvb_ref, wqkv_ref, wo_ref, w1_ref, b1_ref, w2_ref, vec_ref,
    o_ref,
    *, num_heads, head_dim, batch_per_block, seq_len, mm_dtype,
):
    H, Dh, Bb, S = num_heads, head_dim, batch_per_block, seq_len
    C = H * Dh
    rows = Bb * S
    f32 = jnp.float32

    src = src_ref[...].astype(f32)                               # (rows, C)

    # Packed bias / LayerNorm vectors (order fixed by the wrapper).
    vecs = vec_ref[...].astype(f32)                              # (8, C)
    bo, b2 = vecs[0:1], vecs[1:2]
    g1, beta1 = vecs[2:3], vecs[3:4]
    g2, beta2 = vecs[4:5], vecs[5:6]

    # ---- fused QKV projection (pos + biases pre-folded into qkvb rows) ---- #
    qkv = jnp.dot(src.astype(mm_dtype), wqkv_ref[...],
                  preferred_element_type=f32) + qkvb_ref[...].astype(f32)
    # qkv: (rows, 3C), columns grouped per head as [q_h | k_h | v_h].

    # ---- head split (one sublane reshape + H + 3 lane slices + 1 stack) --- #
    qkv3 = qkv.reshape(Bb, S, 3 * C)                             # free split
    per_head = jnp.stack(
        [qkv3[:, :, h * 3 * Dh:(h + 1) * 3 * Dh] for h in range(H)], axis=1)
    per_head = per_head.reshape(Bb * H, S, 3 * Dh)               # free merge
    qh = per_head[..., 0 * Dh:1 * Dh]                            # (Z, S, Dh)
    kh = per_head[..., 1 * Dh:2 * Dh]
    vh = per_head[..., 2 * Dh:3 * Dh]

    # ---- batched attention over all (batch, head) pairs ------------------- #
    scores = jnp.einsum("zqd,zkd->zqk", qh.astype(mm_dtype), kh.astype(mm_dtype),
                        preferred_element_type=f32)              # (Z, S, S)
    scores = scores - jnp.max(scores, axis=-1, keepdims=True)
    p = jnp.exp(scores)
    p = p * pl.reciprocal(jnp.sum(p, axis=-1, keepdims=True), approx=True)
    ctx = jnp.einsum("zqk,zkd->zqd", p.astype(mm_dtype), vh.astype(mm_dtype),
                     preferred_element_type=f32)                 # (Z, S, Dh)

    # ---- per-(batch, head) output projection, head merge via leading sum -- #
    proj = jnp.einsum("zqd,zdc->zqc", ctx.astype(mm_dtype), wo_ref[...],
                      preferred_element_type=f32)                # (Z, S, C)
    attn = proj.reshape(Bb, H, S, C).sum(axis=1).reshape(rows, C) + bo

    # residual + LayerNorm1
    x = _layer_norm(src + attn, g1, beta1)

    # MLP: fc2(GELU(fc1(x)))
    h1 = jnp.dot(x.astype(mm_dtype), w1_ref[...],
                 preferred_element_type=f32) + b1_ref[...].astype(f32)
    h1 = _gelu_exact(h1)
    h2 = jnp.dot(h1.astype(mm_dtype), w2_ref[...],
                 preferred_element_type=f32) + b2

    # residual + LayerNorm2
    o_ref[...] = _layer_norm(x + h2, g2, beta2).astype(o_ref.dtype)


# --------------------------- wrapper / glue JAX ---------------------------- #

def build_2d_sincos_position_embedding(w, h, embed_dim, temperature=10000.0):
    """Exact port of AIFI.build_2d_sincos_position_embedding."""
    grid_w = jnp.arange(w, dtype=jnp.float32)
    grid_h = jnp.arange(h, dtype=jnp.float32)
    gw, gh = jnp.meshgrid(grid_w, grid_h, indexing="ij")        # (w, h)
    pos_dim = embed_dim // 4
    omega = jnp.arange(pos_dim, dtype=jnp.float32) / pos_dim
    omega = 1.0 / (temperature ** omega)
    out_w = gw.reshape(-1)[:, None] * omega[None]               # (w*h, pos_dim)
    out_h = gh.reshape(-1)[:, None] * omega[None]
    return jnp.concatenate(
        [jnp.sin(out_w), jnp.cos(out_w), jnp.sin(out_h), jnp.cos(out_h)], axis=1)


def make_params(key, c1, cm, scale=0.05):
    ks = jax.random.split(key, 16)
    rnd = lambda k, shape: jax.random.normal(k, shape, jnp.float32) * scale
    return {
        "wq": rnd(ks[0], (c1, c1)), "wk": rnd(ks[1], (c1, c1)),
        "wv": rnd(ks[2], (c1, c1)),
        "bq": rnd(ks[3], (1, c1)), "bk": rnd(ks[4], (1, c1)),
        "bv": rnd(ks[5], (1, c1)),
        "wo": rnd(ks[6], (c1, c1)), "bo": rnd(ks[7], (1, c1)),
        "w1": rnd(ks[8], (c1, cm)), "b1": rnd(ks[9], (1, cm)),
        "w2": rnd(ks[10], (cm, c1)), "b2": rnd(ks[11], (1, c1)),
        "g1": 1.0 + rnd(ks[12], (1, c1)), "beta1": rnd(ks[13], (1, c1)),
        "g2": 1.0 + rnd(ks[14], (1, c1)), "beta2": rnd(ks[15], (1, c1)),
    }


def aifi_forward(x_nchw, params, num_heads, row_blocks=1,
                 matmul_dtype=jnp.float32):
    """row_blocks>1 only makes sense on dual-TC chips with large B*S; it is
    clamped to 1 otherwise (grid steps are a sequential loop on 1-TC chips)."""
    B, C, Hh, Ww = x_nchw.shape
    S = Hh * Ww
    Dh = C // num_heads
    cm = params["w1"].shape[1]

    if row_blocks < 1 or B % row_blocks != 0 or (B // row_blocks) * S < 256:
        row_blocks = 1
    b_blk = B // row_blocks
    rows = b_blk * S

    # glue: NCHW -> (B*S, C)  (matches x.flatten(2).permute(0, 2, 1))
    src2d = jnp.transpose(x_nchw.reshape(B, C, S), (0, 2, 1)) \
               .reshape(B * S, C).astype(jnp.float32)
    pos = build_2d_sincos_position_embedding(Ww, Hh, C)          # (S, C)

    # Fold the attention scale into the q projection; fuse Q/K/V weights with
    # columns grouped per head: [q_h | k_h | v_h] (3*Dh each).
    scale = 1.0 / math.sqrt(Dh)
    wq_s, bq_s = params["wq"] * scale, params["bq"] * scale

    def by_head(t):                                              # (.., C) -> (.., H, Dh)
        return t.reshape(t.shape[0], num_heads, Dh)

    wqkv = jnp.concatenate(
        [by_head(wq_s), by_head(params["wk"]), by_head(params["wv"])],
        axis=2).reshape(C, 3 * C)

    # Per-row fused bias: pos enters only q/k (forward_post), v keeps its bias.
    qb = pos @ wq_s + bq_s
    kb = pos @ params["wk"] + params["bk"]
    vb = jnp.broadcast_to(params["bv"], (S, C))
    qkvb = jnp.concatenate([by_head(qb), by_head(kb), by_head(vb)],
                           axis=2).reshape(S, 3 * C)
    qkvb_rows = jnp.tile(qkvb, (b_blk, 1))                       # (rows, 3C)

    # Out-proj weight as per-(batch, head) row blocks: z = b*H + h.
    wo_bh = jnp.tile(params["wo"].reshape(num_heads, Dh, C), (b_blk, 1, 1))

    # Pack the C-wide bias / LayerNorm vectors into one (8, C) slab.
    vecs = jnp.concatenate(
        [params["bo"], params["b2"], params["g1"], params["beta1"],
         params["g2"], params["beta2"], jnp.zeros((2, C), jnp.float32)], axis=0)

    # bf16 matmul operands (weights here, activations at the dot); all
    # elementwise math stays f32 inside the kernel.
    wqkv = wqkv.astype(matmul_dtype)
    wo_bh = wo_bh.astype(matmul_dtype)
    w1 = params["w1"].astype(matmul_dtype)
    w2 = params["w2"].astype(matmul_dtype)

    kernel = functools.partial(
        aifi_encoder_kernel, num_heads=num_heads, head_dim=Dh,
        batch_per_block=b_blk, seq_len=S, mm_dtype=matmul_dtype)

    full2 = lambda i: (0, 0)
    full3 = lambda i: (0, 0, 0)
    row_spec = pl.BlockSpec((rows, C), lambda i: (i, 0))

    out2d = pl.pallas_call(
        kernel,
        out_shape=jax.ShapeDtypeStruct((B * S, C), jnp.float32),
        grid=(row_blocks,),
        in_specs=[
            row_spec,                                            # src
            pl.BlockSpec((rows, 3 * C), full2),                  # fused per-row bias
            pl.BlockSpec((C, 3 * C), full2),                     # wqkv (fused, head-grouped)
            pl.BlockSpec((b_blk * num_heads, Dh, C), full3),     # wo per-(b,h) blocks
            pl.BlockSpec((C, cm), full2),                        # w1
            pl.BlockSpec((1, cm), full2),                        # b1
            pl.BlockSpec((cm, C), full2),                        # w2
            pl.BlockSpec((8, C), full2),                         # packed bias/LN vecs
        ],
        out_specs=row_spec,
        compiler_params=pltpu.CompilerParams(
            dimension_semantics=("parallel",)),
    )(src2d, qkvb_rows, wqkv, wo_bh, w1, params["b1"], w2, vecs)

    # glue: (B*S, C) -> NCHW, matching x.permute(0, 2, 1).view(-1, c, h, w)
    return jnp.transpose(out2d.reshape(B, S, C), (0, 2, 1)).reshape(B, C, Hh, Ww)


# --------------------------- pure-JAX reference ---------------------------- #

def aifi_reference(x_nchw, params, num_heads):
    B, C, Hh, Ww = x_nchw.shape
    S = Hh * Ww
    head_dim = C // num_heads
    src = jnp.transpose(x_nchw.reshape(B, C, S), (0, 2, 1)).astype(jnp.float32)
    pos = build_2d_sincos_position_embedding(Ww, Hh, C)[None]

    qk_in = src + pos
    q = qk_in @ params["wq"] + params["bq"]
    k = qk_in @ params["wk"] + params["bk"]
    v = src @ params["wv"] + params["bv"]

    def split(t):
        return t.reshape(B, S, num_heads, head_dim).transpose(0, 2, 1, 3)

    qh, kh, vh = split(q), split(k), split(v)
    scores = jnp.einsum("bhqd,bhkd->bhqk", qh, kh) / math.sqrt(head_dim)
    p = jax.nn.softmax(scores, axis=-1)
    attn = jnp.einsum("bhqk,bhkd->bhqd", p, vh).transpose(0, 2, 1, 3).reshape(B, S, C)
    attn = attn @ params["wo"] + params["bo"]

    def ln(x, g, b):
        mu = jnp.mean(x, axis=-1, keepdims=True)
        var = jnp.mean((x - mu) ** 2, axis=-1, keepdims=True)
        return (x - mu) / jnp.sqrt(var + 1e-5) * g + b

    x1 = ln(src + attn, params["g1"], params["beta1"])
    h1 = jax.nn.gelu(x1 @ params["w1"] + params["b1"], approximate=False)
    h2 = h1 @ params["w2"] + params["b2"]
    out = ln(x1 + h2, params["g2"], params["beta2"])
    return jnp.transpose(out, (0, 2, 1)).reshape(B, C, Hh, Ww)


# --------------------------------- main ------------------------------------ #

if __name__ == "__main__":
    B, C, H, W = 2, 32, 8, 8
    NUM_HEADS = 4          # C % NUM_HEADS == 0; C % 4 == 0 for sincos embed
    CM = 64                # feed-forward hidden dim (cm)

    key = jax.random.PRNGKey(0)
    kx, kp = jax.random.split(key)
    x = jax.random.normal(kx, (B, C, H, W), jnp.float32)
    params = make_params(kp, C, CM)

    ref = aifi_reference(x, params, NUM_HEADS)

    # Exact path: f32 matmul operands.
    out = jax.block_until_ready(
        aifi_forward(x, params, NUM_HEADS, matmul_dtype=jnp.float32))
    assert out.shape == (B, C, H, W)
    err = float(jnp.max(jnp.abs(out - ref)))
    assert jnp.allclose(out, ref, rtol=2e-3, atol=2e-3), err

    # Perf path (v5e/v6e/v7x MXUs are bf16-native; f32 matmuls are emulated):
    # bf16 matmul operands, f32 accumulation, f32 elementwise math.
    out_bf = jax.block_until_ready(
        aifi_forward(x, params, NUM_HEADS, matmul_dtype=jnp.bfloat16))
    err_bf = float(jnp.max(jnp.abs(out_bf - ref)))
    assert jnp.allclose(out_bf, ref, rtol=2e-2, atol=2e-2), err_bf

    print("KERNEL_OK")
</pallas_src>

<mosaic_0001>
module attributes {stable_mosaic.version = 11 : i64} {
  func.func @aifi_encoder_kernel(%arg0: i32, %arg1: memref<128x32xf32, #tpu.memory_space<vmem>>, %arg2: memref<128x96xf32, #tpu.memory_space<vmem>>, %arg3: memref<32x96xf32, #tpu.memory_space<vmem>>, %arg4: memref<8x8x32xf32, #tpu.memory_space<vmem>>, %arg5: memref<32x64xf32, #tpu.memory_space<vmem>>, %arg6: memref<1x64xf32, #tpu.memory_space<vmem>>, %arg7: memref<64x32xf32, #tpu.memory_space<vmem>>, %arg8: memref<8x32xf32, #tpu.memory_space<vmem>>, %arg9: memref<128x32xf32, #tpu.memory_space<vmem>>) attributes {dimension_semantics = [#tpu.dimension_semantics<parallel>], iteration_bounds = array<i64: 1>, scalar_prefetch = 0 : i64, scratch_operands = 0 : i64, tpu.core_type = #tpu.core_type<tc>, window_params = [{transform_indices = @transform_0, window_bounds = array<i64: 128, 32>}, {pipeline_mode = #tpu.pipeline_mode<synchronous>, transform_indices = @transform_1, window_bounds = array<i64: 128, 96>}, {pipeline_mode = #tpu.pipeline_mode<synchronous>, transform_indices = @transform_2, window_bounds = array<i64: 32, 96>}, {pipeline_mode = #tpu.pipeline_mode<synchronous>, transform_indices = @transform_3, window_bounds = array<i64: 8, 8, 32>}, {pipeline_mode = #tpu.pipeline_mode<synchronous>, transform_indices = @transform_4, window_bounds = array<i64: 32, 64>}, {pipeline_mode = #tpu.pipeline_mode<synchronous>, transform_indices = @transform_5, window_bounds = array<i64: 1, 64>}, {pipeline_mode = #tpu.pipeline_mode<synchronous>, transform_indices = @transform_6, window_bounds = array<i64: 64, 32>}, {pipeline_mode = #tpu.pipeline_mode<synchronous>, transform_indices = @transform_7, window_bounds = array<i64: 8, 32>}, {transform_indices = @transform_8, window_bounds = array<i64: 128, 32>}]} {
    %c0 = arith.constant 0 : index
    %c0_0 = arith.constant 0 : index
    %0 = vector.load %arg1[%c0, %c0_0] : memref<128x32xf32, #tpu.memory_space<vmem>>, vector<128x32xf32>
    %c0_1 = arith.constant 0 : index
    %c0_2 = arith.constant 0 : index
    %1 = vector.load %arg8[%c0_1, %c0_2] : memref<8x32xf32, #tpu.memory_space<vmem>>, vector<8x32xf32>
    %2 = vector.extract_strided_slice %1 {offsets = [0, 0], sizes = [1, 32], strides = [1, 1]} : vector<8x32xf32> to vector<1x32xf32>
    %3 = vector.extract_strided_slice %1 {offsets = [1, 0], sizes = [1, 32], strides = [1, 1]} : vector<8x32xf32> to vector<1x32xf32>
    %4 = vector.extract_strided_slice %1 {offsets = [2, 0], sizes = [1, 32], strides = [1, 1]} : vector<8x32xf32> to vector<1x32xf32>
    %5 = vector.extract_strided_slice %1 {offsets = [3, 0], sizes = [1, 32], strides = [1, 1]} : vector<8x32xf32> to vector<1x32xf32>
    %6 = vector.extract_strided_slice %1 {offsets = [4, 0], sizes = [1, 32], strides = [1, 1]} : vector<8x32xf32> to vector<1x32xf32>
    %7 = vector.extract_strided_slice %1 {offsets = [5, 0], sizes = [1, 32], strides = [1, 1]} : vector<8x32xf32> to vector<1x32xf32>
    %c0_3 = arith.constant 0 : index
    %c0_4 = arith.constant 0 : index
    %8 = vector.load %arg3[%c0_3, %c0_4] : memref<32x96xf32, #tpu.memory_space<vmem>>, vector<32x96xf32>
    %cst = arith.constant dense<0.000000e+00> : vector<128x96xf32>
    %9 = tpu.matmul %0, %8, %cst {dimension_numbers = #tpu.dot_dimension_numbers<[1], [0], [0], [1], [0, 0, 1, 1], [], []>} : vector<128x32xf32>, vector<32x96xf32>, vector<128x96xf32> -> vector<128x96xf32>
    %c0_5 = arith.constant 0 : index
    %c0_6 = arith.constant 0 : index
    %10 = vector.load %arg2[%c0_5, %c0_6] : memref<128x96xf32, #tpu.memory_space<vmem>>, vector<128x96xf32>
    %11 = arith.addf %9, %10 : vector<128x96xf32>
    %12 = vector.shape_cast %11 : vector<128x96xf32> to vector<2x64x96xf32>
    %13 = vector.extract_strided_slice %12 {offsets = [0, 0, 0], sizes = [2, 64, 24], strides = [1, 1, 1]} : vector<2x64x96xf32> to vector<2x64x24xf32>
    %14 = vector.extract_strided_slice %12 {offsets = [0, 0, 24], sizes = [2, 64, 24], strides = [1, 1, 1]} : vector<2x64x96xf32> to vector<2x64x24xf32>
    %15 = vector.extract_strided_slice %12 {offsets = [0, 0, 48], sizes = [2, 64, 24], strides = [1, 1, 1]} : vector<2x64x96xf32> to vector<2x64x24xf32>
    %16 = vector.extract_strided_slice %12 {offsets = [0, 0, 72], sizes = [2, 64, 24], strides = [1, 1, 1]} : vector<2x64x96xf32> to vector<2x64x24xf32>
    %17 = vector.shape_cast %13 : vector<2x64x24xf32> to vector<2x1x64x24xf32>
    %18 = vector.shape_cast %14 : vector<2x64x24xf32> to vector<2x1x64x24xf32>
    %19 = vector.shape_cast %15 : vector<2x64x24xf32> to vector<2x1x64x24xf32>
    %20 = vector.shape_cast %16 : vector<2x64x24xf32> to vector<2x1x64x24xf32>
    %21 = tpu.concatenate %17, %18, %19, %20 in 1 : vector<2x1x64x24xf32>, vector<2x1x64x24xf32>, vector<2x1x64x24xf32>, vector<2x1x64x24xf32> -> vector<2x4x64x24xf32>
    %22 = vector.shape_cast %21 : vector<2x4x64x24xf32> to vector<8x64x24xf32>
    %23 = vector.extract_strided_slice %22 {offsets = [0, 0, 0], sizes = [8, 64, 8], strides = [1, 1, 1]} : vector<8x64x24xf32> to vector<8x64x8xf32>
    %24 = vector.extract_strided_slice %22 {offsets = [0, 0, 8], sizes = [8, 64, 8], strides = [1, 1, 1]} : vector<8x64x24xf32> to vector<8x64x8xf32>
    %25 = vector.extract_strided_slice %22 {offsets = [0, 0, 16], sizes = [8, 64, 8], strides = [1, 1, 1]} : vector<8x64x24xf32> to vector<8x64x8xf32>
    "tpu.trace_start"() <{level = 10 : i32, message = "zqd,zkd->zqk"}> : () -> ()
    %cst_7 = arith.constant dense<0.000000e+00> : vector<8x64x64xf32>
    %26 = tpu.matmul %23, %24, %cst_7 {dimension_numbers = #tpu.dot_dimension_numbers<[2], [2], [1], [1], [0, 0, 0, 1, 1, 1], [0], [0]>} : vector<8x64x8xf32>, vector<8x64x8xf32>, vector<8x64x64xf32> -> vector<8x64x64xf32>
    "tpu.trace_stop"() : () -> ()
    %cst_8 = arith.constant dense<0xFF800000> : vector<8x64xf32>
    %27 = vector.multi_reduction <maximumf>, %26, %cst_8 [2] : vector<8x64x64xf32> to vector<8x64xf32>
    %28 = vector.shape_cast %27 : vector<8x64xf32> to vector<8x64x1xf32>
    %29 = vector.broadcast %28 : vector<8x64x1xf32> to vector<8x64x64xf32>
    %30 = arith.subf %26, %29 : vector<8x64x64xf32>
    %31 = math.exp %30 : vector<8x64x64xf32>
    %cst_9 = arith.constant dense<0.000000e+00> : vector<8x64xf32>
    %32 = vector.multi_reduction <add>, %31, %cst_9 [2] : vector<8x64x64xf32> to vector<8x64xf32>
    %33 = vector.shape_cast %32 : vector<8x64xf32> to vector<8x64x1xf32>
    %34 = tpu.reciprocal %33 {approx = true} : vector<8x64x1xf32> -> vector<8x64x1xf32>
    %35 = vector.broadcast %34 : vector<8x64x1xf32> to vector<8x64x64xf32>
    %36 = arith.mulf %31, %35 : vector<8x64x64xf32>
    "tpu.trace_start"() <{level = 10 : i32, message = "zqk,zkd->zqd"}> : () -> ()
    %cst_10 = arith.constant dense<0.000000e+00> : vector<8x64x8xf32>
    %37 = tpu.matmul %36, %25, %cst_10 {dimension_numbers = #tpu.dot_dimension_numbers<[2], [1], [1], [2], [0, 0, 0, 1, 1, 2], [0], [0]>} : vector<8x64x64xf32>, vector<8x64x8xf32>, vector<8x64x8xf32> -> vector<8x64x8xf32>
    "tpu.trace_stop"() : () -> ()
    %c0_11 = arith.constant 0 : index
    %c0_12 = arith.constant 0 : index
    %c0_13 = arith.constant 0 : index
    %38 = vector.load %arg4[%c0_11, %c0_12, %c0_13] : memref<8x8x32xf32, #tpu.memory_space<vmem>>, vector<8x8x32xf32>
    "tpu.trace_start"() <{level = 10 : i32, message = "zqd,zdc->zqc"}> : () -> ()
    %cst_14 = arith.constant dense<0.000000e+00> : vector<8x64x32xf32>
    %39 = tpu.matmul %37, %38, %cst_14 {dimension_numbers = #tpu.dot_dimension_numbers<[2], [1], [1], [2], [0, 0, 0, 1, 1, 2], [0], [0]>} : vector<8x64x8xf32>, vector<8x8x32xf32>, vector<8x64x32xf32> -> vector<8x64x32xf32>
    "tpu.trace_stop"() : () -> ()
    %40 = vector.shape_cast %39 : vector<8x64x32xf32> to vector<2x4x64x32xf32>
    %cst_15 = arith.constant dense<0.000000e+00> : vector<2x64x32xf32>
    %41 = vector.multi_reduction <add>, %40, %cst_15 [1] : vector<2x4x64x32xf32> to vector<2x64x32xf32>
    %42 = vector.shape_cast %41 : vector<2x64x32xf32> to vector<128x32xf32>
    %43 = vector.broadcast %2 : vector<1x32xf32> to vector<128x32xf32>
    %44 = arith.addf %42, %43 : vector<128x32xf32>
    %45 = arith.addf %0, %44 : vector<128x32xf32>
    %cst_16 = arith.constant dense<0.000000e+00> : vector<128xf32>
    %46 = vector.multi_reduction <add>, %45, %cst_16 [1] : vector<128x32xf32> to vector<128xf32>
    %47 = vector.shape_cast %46 : vector<128xf32> to vector<128x1xf32>
    %cst_17 = arith.constant 3.200000e+01 : f32
    %48 = vector.broadcast %cst_17 : f32 to vector<128x1xf32>
    %49 = arith.divf %47, %48 : vector<128x1xf32>
    %50 = vector.broadcast %49 : vector<128x1xf32> to vector<128x32xf32>
    %51 = arith.subf %45, %50 : vector<128x32xf32>
    %52 = arith.mulf %51, %51 : vector<128x32xf32>
    %cst_18 = arith.constant dense<0.000000e+00> : vector<128xf32>
    %53 = vector.multi_reduction <add>, %52, %cst_18 [1] : vector<128x32xf32> to vector<128xf32>
    %54 = vector.shape_cast %53 : vector<128xf32> to vector<128x1xf32>
    %cst_19 = arith.constant 3.200000e+01 : f32
    %55 = vector.broadcast %cst_19 : f32 to vector<128x1xf32>
    %56 = arith.divf %54, %55 : vector<128x1xf32>
    %cst_20 = arith.constant 9.99999974E-6 : f32
    %57 = vector.broadcast %cst_20 : f32 to vector<128x1xf32>
    %58 = arith.addf %56, %57 : vector<128x1xf32>
    %59 = math.rsqrt %58 : vector<128x1xf32>
    %60 = vector.broadcast %59 : vector<128x1xf32> to vector<128x32xf32>
    %61 = arith.mulf %51, %60 : vector<128x32xf32>
    %62 = vector.broadcast %4 : vector<1x32xf32> to vector<128x32xf32>
    %63 = arith.mulf %61, %62 : vector<128x32xf32>
    %64 = vector.broadcast %5 : vector<1x32xf32> to vector<128x32xf32>
    %65 = arith.addf %63, %64 : vector<128x32xf32>
    %c0_21 = arith.constant 0 : index
    %c0_22 = arith.constant 0 : index
    %66 = vector.load %arg5[%c0_21, %c0_22] : memref<32x64xf32, #tpu.memory_space<vmem>>, vector<32x64xf32>
    %cst_23 = arith.constant dense<0.000000e+00> : vector<128x64xf32>
    %67 = tpu.matmul %65, %66, %cst_23 {dimension_numbers = #tpu.dot_dimension_numbers<[1], [0], [0], [1], [0, 0, 1, 1], [], []>} : vector<128x32xf32>, vector<32x64xf32>, vector<128x64xf32> -> vector<128x64xf32>
    %c0_24 = arith.constant 0 : index
    %c0_25 = arith.constant 0 : index
    %68 = vector.load %arg6[%c0_24, %c0_25] : memref<1x64xf32, #tpu.memory_space<vmem>>, vector<1x64xf32>
    %69 = vector.broadcast %68 : vector<1x64xf32> to vector<128x64xf32>
    %70 = arith.addf %67, %69 : vector<128x64xf32>
    %cst_26 = arith.constant 5.000000e-01 : f32
    %71 = vector.broadcast %cst_26 : f32 to vector<128x64xf32>
    %72 = arith.mulf %71, %70 : vector<128x64xf32>
    %cst_27 = arith.constant 0.707106769 : f32
    %73 = vector.broadcast %cst_27 : f32 to vector<128x64xf32>
    %74 = arith.mulf %70, %73 : vector<128x64xf32>
    %75 = math.erf %74 : vector<128x64xf32>
    %cst_28 = arith.constant 1.000000e+00 : f32
    %76 = vector.broadcast %cst_28 : f32 to vector<128x64xf32>
    %77 = arith.addf %76, %75 : vector<128x64xf32>
    %78 = arith.mulf %72, %77 : vector<128x64xf32>
    %c0_29 = arith.constant 0 : index
    %c0_30 = arith.constant 0 : index
    %79 = vector.load %arg7[%c0_29, %c0_30] : memref<64x32xf32, #tpu.memory_space<vmem>>, vector<64x32xf32>
    %cst_31 = arith.constant dense<0.000000e+00> : vector<128x32xf32>
    %80 = tpu.matmul %78, %79, %cst_31 {dimension_numbers = #tpu.dot_dimension_numbers<[1], [0], [0], [1], [0, 0, 1, 1], [], []>} : vector<128x64xf32>, vector<64x32xf32>, vector<128x32xf32> -> vector<128x32xf32>
    %81 = vector.broadcast %3 : vector<1x32xf32> to vector<128x32xf32>
    %82 = arith.addf %80, %81 : vector<128x32xf32>
    %83 = arith.addf %65, %82 : vector<128x32xf32>
    %cst_32 = arith.constant dense<0.000000e+00> : vector<128xf32>
    %84 = vector.multi_reduction <add>, %83, %cst_32 [1] : vector<128x32xf32> to vector<128xf32>
    %85 = vector.shape_cast %84 : vector<128xf32> to vector<128x1xf32>
    %cst_33 = arith.constant 3.200000e+01 : f32
    %86 = vector.broadcast %cst_33 : f32 to vector<128x1xf32>
    %87 = arith.divf %85, %86 : vector<128x1xf32>
    %88 = vector.broadcast %87 : vector<128x1xf32> to vector<128x32xf32>
    %89 = arith.subf %83, %88 : vector<128x32xf32>
    %90 = arith.mulf %89, %89 : vector<128x32xf32>
    %cst_34 = arith.constant dense<0.000000e+00> : vector<128xf32>
    %91 = vector.multi_reduction <add>, %90, %cst_34 [1] : vector<128x32xf32> to vector<128xf32>
    %92 = vector.shape_cast %91 : vector<128xf32> to vector<128x1xf32>
    %cst_35 = arith.constant 3.200000e+01 : f32
    %93 = vector.broadcast %cst_35 : f32 to vector<128x1xf32>
    %94 = arith.divf %92, %93 : vector<128x1xf32>
    %cst_36 = arith.constant 9.99999974E-6 : f32
    %95 = vector.broadcast %cst_36 : f32 to vector<128x1xf32>
    %96 = arith.addf %94, %95 : vector<128x1xf32>
    %97 = math.rsqrt %96 : vector<128x1xf32>
    %98 = vector.broadcast %97 : vector<128x1xf32> to vector<128x32xf32>
    %99 = arith.mulf %89, %98 : vector<128x32xf32>
    %100 = vector.broadcast %6 : vector<1x32xf32> to vector<128x32xf32>
    %101 = arith.mulf %99, %100 : vector<128x32xf32>
    %102 = vector.broadcast %7 : vector<1x32xf32> to vector<128x32xf32>
    %103 = arith.addf %101, %102 : vector<128x32xf32>
    %c0_37 = arith.constant 0 : index
    %c0_38 = arith.constant 0 : index
    %104 = vector.load %arg9[%c0_37, %c0_38] : memref<128x32xf32, #tpu.memory_space<vmem>>, vector<128x32xf32>
    tpu.vector_store %arg9[%c0_37, %c0_38], %103 {strides = array<i32>} : memref<128x32xf32, #tpu.memory_space<vmem>>, vector<128x32xf32>,
    return
  }
  func.func @transform_0(%arg0: i32) -> (i32, i32) {
    %c0_i32 = arith.constant 0 : i32
    %c0_i32_0 = arith.constant 0 : i32
    return %arg0, %c0_i32 : i32, i32
  }
  func.func @transform_1(%arg0: i32) -> (i32, i32) {
    %c0_i32 = arith.constant 0 : i32
    %c0_i32_0 = arith.constant 0 : i32
    %c0_i32_1 = arith.constant 0 : i32
    return %c0_i32, %c0_i32_0 : i32, i32
  }
  func.func @transform_2(%arg0: i32) -> (i32, i32) {
    %c0_i32 = arith.constant 0 : i32
    %c0_i32_0 = arith.constant 0 : i32
    %c0_i32_1 = arith.constant 0 : i32
    return %c0_i32, %c0_i32_0 : i32, i32
  }
  func.func @transform_3(%arg0: i32) -> (i32, i32, i32) {
    %c0_i32 = arith.constant 0 : i32
    %c0_i32_0 = arith.constant 0 : i32
    %c0_i32_1 = arith.constant 0 : i32
    %c0_i32_2 = arith.constant 0 : i32
    return %c0_i32, %c0_i32_0, %c0_i32_1 : i32, i32, i32
  }
  func.func @transform_4(%arg0: i32) -> (i32, i32) {
    %c0_i32 = arith.constant 0 : i32
    %c0_i32_0 = arith.constant 0 : i32
    %c0_i32_1 = arith.constant 0 : i32
    return %c0_i32, %c0_i32_0 : i32, i32
  }
  func.func @transform_5(%arg0: i32) -> (i32, i32) {
    %c0_i32 = arith.constant 0 : i32
    %c0_i32_0 = arith.constant 0 : i32
    %c0_i32_1 = arith.constant 0 : i32
    return %c0_i32, %c0_i32_0 : i32, i32
  }
  func.func @transform_6(%arg0: i32) -> (i32, i32) {
    %c0_i32 = arith.constant 0 : i32
    %c0_i32_0 = arith.constant 0 : i32
    %c0_i32_1 = arith.constant 0 : i32
    return %c0_i32, %c0_i32_0 : i32, i32
  }
  func.func @transform_7(%arg0: i32) -> (i32, i32) {
    %c0_i32 = arith.constant 0 : i32
    %c0_i32_0 = arith.constant 0 : i32
    %c0_i32_1 = arith.constant 0 : i32
    return %c0_i32, %c0_i32_0 : i32, i32
  }
  func.func @transform_8(%arg0: i32) -> (i32, i32) {
    %c0_i32 = arith.constant 0 : i32
    %c0_i32_0 = arith.constant 0 : i32
    return %arg0, %c0_i32 : i32, i32
  }
}

</mosaic_0001>

<bundles_post_ra>
// kernel: tpu_custom_call.1
= control target key start
LH: loop header
LB: loop body
LE: loop exit
PB: predicated region body
PF: predicated region fallthrough
CT: control target
= control target key end

     0   :  { %vm66_vm0 = vcmask 261120   ;;  %vm388_vm1 = vcmask 64512   ;;  %s8151_s25 = smov 80   ;;  %s8152_s26 = smov 104   ;;  %vm1597_vm3 = vcmask 523264   ;;  %s10879_s2 = inlined_call_operand.vmem [shape: f32[32,96], index: 2, kind: input, shape index: {}]   ;;  %s10880_s0 = inlined_call_operand.vmem [shape: f32[128,32], index: 0, kind: input, shape index: {}]   ;;  %s10881_s1 = inlined_call_operand.vmem [shape: f32[128,96], index: 1, kind: input, shape index: {}]   ;;  %s10882_s3 = inlined_call_operand.vmem [shape: f32[8,8,32], index: 3, kind: input, shape index: {}]   ;;  %s10883_s7 = inlined_call_operand.vmem [shape: f32[8,32], index: 7, kind: input, shape index: {}]   ;;  %s10884_s4 = inlined_call_operand.vmem [shape: f32[32,64], index: 4, kind: input, shape index: {}]   ;;  %s10885_s6 = inlined_call_operand.vmem [shape: f32[64,32], index: 6, kind: input, shape index: {}]   ;;  %s10886_s5 = inlined_call_operand.vmem [shape: f32[1,64], index: 5, kind: input, shape index: {}]   ;;  %s10887_s8 = inlined_call_operand.vmem [shape: f32[128,32], index: 8, kind: output, shape index: {}]  }
   0x1   :  { %v46_v0 = vld [vmem:[%s10879_s2] sm:$0xff]  ;;  %v47_v1 = vld [vmem:[%s10879_s2 + $0x8] sm:$0xff]  ;;  %v48_v2 = vld [vmem:[%s10879_s2 + $0x10] sm:$0xff]  ;;  %s8153_s29 = smov 56   ;;  %s8154_s10 = smov 120  }
   0x2   :  { %v7097_v3 = vpack.c.bf16 %v47_v1, %v46_v0  ;;  %v49_v4 = vld [vmem:[%s10879_s2 + $0x18] sm:$0xff]  ;;  %v29_v5 = vld [vmem:[%s10880_s0] sm:$0xff]  ;;  %v30_v7 = vld [vmem:[%s10880_s0 + $0x8] sm:$0xff] }
   0x3   :  { %v7101_v6 = vpack.c.bf16 %v49_v4, %v48_v2  ;;  %6441 = vmatprep.mubr.msk.f32.mxu0 %vm66_vm0, %v29_v5  ;;  %v31_v8 = vld [vmem:[%s10880_s0 + $0x10] sm:$0xff]  ;;  %v32_v9 = vld [vmem:[%s10880_s0 + $0x18] sm:$0xff]  ;;  %v33_v10 = vld [vmem:[%s10880_s0 + $0x20] sm:$0xff] }
   0x4   :  { %7098 = vmatprep.subr.bf16.mxu0 %v7097_v3  ;;  %v34_v11 = vld [vmem:[%s10880_s0 + $0x28] sm:$0xff]  ;;  %v35_v12 = vld [vmem:[%s10880_s0 + $0x30] sm:$0xff]  ;;  %v36_v13 = vld [vmem:[%s10880_s0 + $0x38] sm:$0xff] }
   0x5   :  { %7100 = vmatpush3.bf16.msra.mxu0 %v7097_v3  ;;  %v37_v14 = vld [vmem:[%s10880_s0 + $0x40] sm:$0xff]  ;;  %v38_v15 = vld [vmem:[%s10880_s0 + $0x48] sm:$0xff]  ;;  %v39_v16 = vld [vmem:[%s10880_s0 + $0x50] sm:$0xff] }
   0x6   :  { %7102 = vmatprep.subr.bf16.mxu0 %v7101_v6  ;;  %v40_v17 = vld [vmem:[%s10880_s0 + $0x58] sm:$0xff]  ;;  %v41_v18 = vld [vmem:[%s10880_s0 + $0x60] sm:$0xff]  ;;  %v42_v19 = vld [vmem:[%s10880_s0 + $0x68] sm:$0xff] }
   0x7   :  { %v43_v20 = vld [vmem:[%s10880_s0 + $0x70] sm:$0xff]  ;;  %v44_v21 = vld [vmem:[%s10880_s0 + $0x78] sm:$0xff]  ;;  %v51_v22 = vld [vmem:[%s10881_s1 + $0x8] sm:$0xff] }
   0x8   :  { %v50_v23 = vld [vmem:[%s10881_s1] sm:$0xff]  ;;  %v53_v28 = vld [vmem:[%s10881_s1 + $0x18] sm:$0xff]  ;;  %v52_v36 = vld [vmem:[%s10881_s1 + $0x10] sm:$0xff] }
   0x9   :  { %7104 = vmatpush3.bf16.msra.mxu0 %v7101_v6  ;;  %v55_v41 = vld [vmem:[%s10881_s1 + $0x28] sm:$0xff]  ;;  %v54_v47 = vld [vmem:[%s10881_s1 + $0x20] sm:$0xff]  ;;  %v57_v52 = vld [vmem:[%s10881_s1 + $0x38] sm:$0xff] }
   0xa   :  { %v56_v54 = vld [vmem:[%s10881_s1 + $0x30] sm:$0xff]  ;;  %v59_v57 = vld [vmem:[%s10881_s1 + $0x48] sm:$0xff]  ;;  %v58_v59 = vld [vmem:[%s10881_s1 + $0x40] sm:$0xff] }
   0xb   :  { %v61_v61 = vld [vmem:[%s10881_s1 + $0x58] sm:$0xff]  ;;  %v60_v62 = vld [vmem:[%s10881_s1 + $0x50] sm:$0xff]  ;;  %v63_v2 = vld [vmem:[%s10881_s1 + $0x68] sm:$0xff] }
   0xc   :  { %6442 = vmatmul.mubr.msk.f32.vlgmr.msra.gmra.mrb[0].mxu0 %vm66_vm0, %v30_v7  ;;  %v62_v4 = vld [vmem:[%s10881_s1 + $0x60] sm:$0xff]  ;;  %v65_v7 = vld [vmem:[%s10881_s1 + $0x78] sm:$0xff]  ;;  %vm8529_vm2 = vmpackc.low %vm388_vm1, %vm388_vm1 }
   0xd   :  { %6444 = vmatprep.mubr.msk.f32.mxu0 %vm66_vm0, %v31_v8 }
  0x10   :  { %6445 = vmatmul.mubr.msk.f32.gmra.mrb[2].mxu0 %vm66_vm0, %v32_v9  ;;  %v64_v9 = vld [vmem:[%s10881_s1 + $0x70] sm:$0xff]  ;;  %s8155_s1 = smov 112  }
  0x11   :  { %6447 = vmatprep.mubr.msk.f32.mxu0 %vm66_vm0, %v33_v10 }
  0x14   :  { %6448 = vmatmul.mubr.msk.f32.gmra.mrb[4].mxu0 %vm66_vm0, %v34_v11 }
  0x15   :  { %6450 = vmatprep.mubr.msk.f32.mxu0 %vm66_vm0, %v35_v12 }
  0x18   :  { %6451 = vmatmul.mubr.msk.f32.gmra.mrb[6].mxu0 %vm66_vm0, %v36_v13 }
  0x19   :  { %6453 = vmatprep.mubr.msk.f32.mxu0 %vm66_vm0, %v37_v14 }
  0x1c   :  { %6454 = vmatmul.mubr.msk.f32.gmra.mrb[8].mxu0 %vm66_vm0, %v38_v15 }
  0x1d   :  { %6456 = vmatprep.mubr.msk.f32.mxu0 %vm66_vm0, %v39_v16 }
  0x20   :  { %6457 = vmatmul.mubr.msk.f32.gmra.mrb[10].mxu0 %vm66_vm0, %v40_v17 }
  0x21   :  { %6459 = vmatprep.mubr.msk.f32.mxu0 %vm66_vm0, %v41_v18 }
  0x24   :  { %6460 = vmatmul.mubr.msk.f32.gmra.mrb[12].mxu0 %vm66_vm0, %v42_v19 }
  0x25   :  { %6462 = vmatprep.mubr.msk.f32.mxu0 %vm66_vm0, %v43_v20 }
  0x28   :  { %6463 = vmatmul.mubr.msk.f32.gmra.mrb[14].mxu0 %vm66_vm0, %v44_v21 }
  0xdf   :  { %v6443_v24 = vpop.f32.mrb[0].mxu0 }
  0xe0   :  { %v8283_v25 = vadd.f32 %v6443_v24, %v51_v22  ;;  %v181_v26 = vpop.f32.mrb[1].mxu0 }
  0xe1   :  { %v182_v27 = vadd.f32 %v181_v26, %v50_v23 }
  0xe2   :  { %310 = vrot.lane.b32.xlu1 %v8283_v25, %s8151_s25  ;;  %278 = vrot.lane.b32.xlu0 %v8283_v25, %s8152_s26 }
  0xe3   :  { %6481 = vmatprep.mubr.msk.f32.mxu1 %vm388_vm1, %v182_v27  ;;  %v6446_v29 = vpop.f32.mrb[2].mxu0  ;;  %v8308_v38 = vpack.i.bf16 %v8283_v25, %v182_v27 }
  0xe4   :  { %v191_v30 = vpop.f32.mrb[3].mxu0  ;;  %v8296_v31 = vadd.f32 %v6446_v29, %v53_v28 }
  0xe5   :  { %v8312_v40 = vadd.f32 %v191_v30, %v52_v36 }
  0xe6   :  { %342 = vrot.lane.b32.xlu1 %v8283_v25, %s8153_s29  ;;  %276 = vrot.lane.b32.xlu0 %v182_v27, %s8152_s26 }
  0xe7   :  { %v6449_v32 = vpop.f32.mrb[4].mxu0  ;;  %v8334_v49 = vpack.i.bf16 %v8296_v31, %v8312_v40 }
  0xe8   :  { %v201_v33 = vpop.f32.mrb[5].mxu0  ;;  %v8323_v44 = vadd.f32 %v6449_v32, %v55_v41 }
  0xe9   :  { %v8336_v51 = vadd.f32 %v201_v33, %v54_v47 }
  0xea   :  { %282 = vrot.lane.b32.xlu1 %v8296_v31, %s8152_s26  ;;  %308 = vrot.lane.b32.xlu0 %v182_v27, %s8151_s25 }
  0xeb   :  { %v6452_v34 = vpop.f32.mrb[6].mxu0  ;;  %v8366_v56 = vpack.i.bf16 %v8323_v44, %v8336_v51 }
  0xec   :  { %v211_v35 = vpop.f32.mrb[7].mxu0  ;;  %v8349_v53 = vadd.f32 %v6452_v34, %v57_v52 }
  0xed   :  { %v8362_v55 = vadd.f32 %v211_v35, %v56_v54 }
  0xee   :  { %314 = vrot.lane.b32.xlu1 %v8296_v31, %s8151_s25  ;;  %340 = vrot.lane.b32.xlu0 %v182_v27, %s8153_s29 }
  0xef   :  { %v6455_v37 = vpop.f32.mrb[8].mxu0  ;;  %v8402_v63 = vpack.i.bf16 %v8349_v53, %v8362_v55 }
  0xf0   :  { %v221_v39 = vpop.f32.mrb[9].mxu0  ;;  %v8375_v58 = vadd.f32 %v6455_v37, %v59_v57 }
  0xf1   :  { %v8384_v60 = vadd.f32 %v221_v39, %v58_v59 }
  0xf2   :  { %346 = vrot.lane.b32.xlu1 %v8296_v31, %s8153_s29  ;;  %7463 = vrot.lane.b32.xlu0 %v8308_v38, %s8154_s10 }
  0xf3   :  { %v6458_v42 = vpop.f32.mrb[10].mxu0  ;;  %v8432_v5 = vpack.i.bf16 %v8375_v58, %v8384_v60 }
  0xf4   :  { %v231_v43 = vpop.f32.mrb[11].mxu0  ;;  %v8404_v0 = vadd.f32 %v6458_v42, %v61_v61 }
  0xf5   :  { %v8408_v1 = vadd.f32 %v231_v43, %v60_v62 }
  0xf6   :  { %280 = vrot.lane.b32.xlu1 %v8312_v40, %s8152_s26  ;;  %312 = vrot.lane.b32.xlu0 %v8312_v40, %s8151_s25 }
  0xf7   :  { %v6461_v45 = vpop.f32.mrb[12].mxu0  ;;  %v8464_v11 = vpack.i.bf16 %v8404_v0, %v8408_v1 }
  0xf8   :  { %v241_v46 = vpop.f32.mrb[13].mxu0  ;;  %v8421_v3 = vadd.f32 %v6461_v45, %v63_v2 }
  0xf9   :  { %v8436_v6 = vadd.f32 %v241_v46, %v62_v4 }
  0xfa   :  { %286 = vrot.lane.b32.xlu1 %v8323_v44, %s8152_s26  ;;  %344 = vrot.lane.b32.xlu0 %v8312_v40, %s8153_s29 }
  0xfb   :  { %v6464_v48 = vpop.f32.mrb[14].mxu0  ;;  %v8480_v12 = vpack.i.bf16 %v8421_v3, %v8436_v6 }
  0xfc   :  { %v251_v50 = vpop.f32.mrb[15].mxu0  ;;  %v8449_v8 = vadd.f32 %v6464_v48, %v65_v7 }
  0xfd   :  { %v8458_v10 = vadd.f32 %v251_v50, %v64_v9 }
  0xfe   :  { %318 = vrot.lane.b32.xlu1 %v8323_v44, %s8151_s25  ;;  %7468 = vrot.lane.b32.xlu0 %v8334_v49, %s8154_s10 }
  0xff   :  { %v8500_v18 = vpack.i.bf16 %v8449_v8, %v8458_v10 }
 0x102   :  { %350 = vrot.lane.b32.xlu1 %v8323_v44, %s8153_s29  ;;  %284 = vrot.lane.b32.xlu0 %v8336_v51, %s8152_s26 }
 0x106   :  { %316 = vrot.lane.b32.xlu0 %v8336_v51, %s8151_s25  ;;  %290 = vrot.lane.b32.xlu1 %v8349_v53, %s8152_s26 }
 0x10a   :  { %348 = vrot.lane.b32.xlu0 %v8336_v51, %s8153_s29  ;;  %322 = vrot.lane.b32.xlu1 %v8349_v53, %s8151_s25 }
 0x10e   :  { %7473 = vrot.lane.b32.xlu0 %v8366_v56, %s8154_s10  ;;  %352 = vrot.lane.b32.xlu1 %v8362_v55, %s8153_s29 }
 0x112   :  { %354 = vrot.lane.b32.xlu0 %v8349_v53, %s8153_s29  ;;  %326 = vrot.lane.b32.xlu1 %v8375_v58, %s8151_s25 }
 0x116   :  { %288 = vrot.lane.b32.xlu0 %v8362_v55, %s8152_s26  ;;  %292 = vrot.lane.b32.xlu1 %v8384_v60, %s8152_s26 }
 0x11a   :  { %320 = vrot.lane.b32.xlu0 %v8362_v55, %s8151_s25  ;;  %356 = vrot.lane.b32.xlu1 %v8384_v60, %s8153_s29 }
 0x11e   :  { %7478 = vrot.lane.b32.xlu0 %v8402_v63, %s8154_s10  ;;  %330 = vrot.lane.b32.xlu1 %v8404_v0, %s8151_s25 }
 0x122   :  { %294 = vrot.lane.b32.xlu0 %v8375_v58, %s8152_s26  ;;  %296 = vrot.lane.b32.xlu1 %v8408_v1, %s8152_s26 }
 0x126   :  { %358 = vrot.lane.b32.xlu0 %v8375_v58, %s8153_s29  ;;  %360 = vrot.lane.b32.xlu1 %v8408_v1, %s8153_s29 }
 0x12a   :  { %324 = vrot.lane.b32.xlu0 %v8384_v60, %s8151_s25  ;;  %334 = vrot.lane.b32.xlu1 %v8421_v3, %s8151_s25 }
 0x12e   :  { %7483 = vrot.lane.b32.xlu0 %v8432_v5, %s8154_s10  ;;  %300 = vrot.lane.b32.xlu1 %v8436_v6, %s8152_s26 }
 0x132   :  { %298 = vrot.lane.b32.xlu0 %v8404_v0, %s8152_s26  ;;  %364 = vrot.lane.b32.xlu1 %v8436_v6, %s8153_s29 }
 0x136   :  { %362 = vrot.lane.b32.xlu0 %v8404_v0, %s8153_s29  ;;  %338 = vrot.lane.b32.xlu1 %v8449_v8, %s8151_s25 }
 0x13a   :  { %328 = vrot.lane.b32.xlu0 %v8408_v1, %s8151_s25  ;;  %304 = vrot.lane.b32.xlu1 %v8458_v10, %s8152_s26 }
 0x13e   :  { %7488 = vrot.lane.b32.xlu0 %v8464_v11, %s8154_s10  ;;  %368 = vrot.lane.b32.xlu1 %v8458_v10, %s8153_s29 }
 0x142   :  { %302 = vrot.lane.b32.xlu0 %v8421_v3, %s8152_s26 }
 0x146   :  { %366 = vrot.lane.b32.xlu0 %v8421_v3, %s8153_s29 }
 0x14a   :  { %332 = vrot.lane.b32.xlu0 %v8436_v6, %s8151_s25 }
 0x14e   :  { %7493 = vrot.lane.b32.xlu0 %v8480_v12, %s8154_s10 }
 0x152   :  { %306 = vrot.lane.b32.xlu0 %v8449_v8, %s8152_s26 }
 0x154   :  { %v8486_v13 = vpop.permute.xlu1 %310  ;;  %v8488_v14 = vpop.permute.xlu0 %278 }
 0x156   :  { %370 = vrot.lane.b32.xlu0 %v8449_v8, %s8153_s29 }
 0x158   :  { %v8492_v15 = vpop.permute.xlu1 %342  ;;  %v277_v16 = vpop.permute.xlu0 %276 }
 0x159   :  { %6509 = vmatprep.mubr.msk.f32.mxu0 %vm388_vm1, %v277_v16  ;;  %v7502_v17 = vpack.i.bf16 %v8488_v14, %v277_v16 }
 0x15a   :  { %336 = vrot.lane.b32.xlu0 %v8458_v10, %s8151_s25 }
 0x15b   :  { %7503 = vrot.lane.b32.xlu1 %v7502_v17, %s8154_s10 }
 0x15c   :  { %v8503_v19 = vpop.permute.xlu1 %282  ;;  %v8505_v20 = vpop.permute.xlu0 %308 }
 0x15d   :  { %v8515_v23 = vpack.i.bf16 %v8486_v13, %v8505_v20 }
 0x15e   :  { %7498 = vrot.lane.b32.xlu0 %v8500_v18, %s8154_s10 }
 0x160   :  { %v8509_v21 = vpop.permute.xlu1 %314  ;;  %v8511_v22 = vpop.permute.xlu0 %340 }
 0x161   :  { %v8519_v24 = vpack.i.bf16 %v8492_v15, %v8511_v22 }
 0x162   :  { %7508 = vrot.lane.b32.xlu0 %v8515_v23, %s8154_s10 }
 0x163   :  { %7513 = vrot.lane.b32.xlu1 %v8519_v24, %s8154_s10 }
 0x164   :  { %v8525_v26 = vpop.permute.xlu1 %346  ;;  %v7464_v27 = vpop.permute.xlu0 %7463 }
 0x165   :  { %v7466_v28 = vunpack.i.h.bf16 %v7464_v27  ;;  %v7465_v29 = vunpack.i.l.bf16 %v7464_v27 }
 0x167   :  { %v7105_v32 = vpack.c.bf16 %v7466_v28, %v7465_v29 }
 0x168   :  { %v8533_v33 = vpop.permute.xlu1 %280  ;;  %v8535_v34 = vpop.permute.xlu0 %312 }
 0x169   :  { %7107 = vmatprep.subr.msk.bf16.mxu1 %vm8529_vm2, %v7105_v32  ;;  %v7517_v35 = vpack.i.bf16 %v8503_v19, %v8533_v33  ;;  %v7522_v36 = vpack.i.bf16 %v8509_v21, %v8535_v34 }
 0x16a   :  { %7110 = vmatpush3.bf16.xpose.msk.msra.mxu1 %vm8529_vm2, %v7105_v32 }
 0x16b   :  { %7518 = vrot.lane.b32.xlu1 %v7517_v35, %s8154_s10  ;;  %7523 = vrot.lane.b32.xlu0 %v7522_v36, %s8154_s10 }
 0x16c   :  { %v8547_v37 = vpop.permute.xlu1 %286  ;;  %v8549_v39 = vpop.permute.xlu0 %344 }
 0x16d   :  { %v8553_v41 = vpack.i.bf16 %v8525_v26, %v8549_v39 }
 0x16f   :  { %7528 = vrot.lane.b32.xlu1 %v8553_v41, %s8154_s10 }
 0x170   :  { %v8557_v42 = vpop.permute.xlu1 %318  ;;  %v7469_v43 = vpop.permute.xlu0 %7468 }
 0x171   :  { %v7471_v45 = vunpack.i.h.bf16 %v7469_v43  ;;  %v7470_v46 = vunpack.i.l.bf16 %v7469_v43 }
 0x173   :  { %v7111_v47 = vpack.c.bf16 %v7471_v45, %v7470_v46 }
 0x174   :  { %v8559_v48 = vpop.permute.xlu1 %350  ;;  %v8561_v50 = vpop.permute.xlu0 %284 }
 0x175   :  { %7113 = vmatprep.subr.msk.bf16.mxu1 %vm8529_vm2, %v7111_v47  ;;  %v7532_v52 = vpack.i.bf16 %v8547_v37, %v8561_v50 }
 0x176   :  { %7116 = vmatpush3.bf16.xpose.msk.msra.mxu1 %vm8529_vm2, %v7111_v47 }
 0x177   :  { %7533 = vrot.lane.b32.xlu1 %v7532_v52, %s8154_s10 }
 0x178   :  { %v8570_v54 = vpop.permute.xlu0 %316  ;;  %v8572_v57 = vpop.permute.xlu1 %290 }
 0x179   :  { %v7537_v59 = vpack.i.bf16 %v8557_v42, %v8570_v54 }
 0x17b   :  { %7538 = vrot.lane.b32.xlu0 %v7537_v59, %s8154_s10 }
 0x17c   :  { %v8577_v61 = vpop.permute.xlu0 %348  ;;  %v8579_v62 = vpop.permute.xlu1 %322 }
 0x17d   :  { %v8583_v2 = vpack.i.bf16 %v8559_v48, %v8577_v61 }
 0x17f   :  { %7563 = vrot.lane.b32.xlu0 %v7502_v17, %s8155_s1  ;;  %7543 = vrot.lane.b32.xlu1 %v8583_v2, %s8154_s10 }
 0x180   :  { %v7474_v4 = vpop.permute.xlu0 %7473  ;;  %v8588_v16 = vpop.permute.xlu1 %352 }
 0x181   :  { %v7476_v7 = vunpack.i.h.bf16 %v7474_v4  ;;  %v7475_v9 = vunpack.i.l.bf16 %v7474_v4 }
 0x183   :  { %v7117_v27 = vpack.c.bf16 %v7476_v7, %v7475_v9  ;;  %7573 = vrot.lane.b32.xlu0 %v7517_v35, %s8155_s1 }
 0x184   :  { %v8591_v28 = vpop.permute.xlu0 %354  ;;  %v8595_v29 = vpop.permute.xlu1 %326 }
 0x185   :  { %7119 = vmatprep.subr.msk.bf16.mxu1 %vm8529_vm2, %v7117_v27 }
 0x186   :  { %7122 = vmatpush3.bf16.xpose.msk.msra.mxu1 %vm8529_vm2, %v7117_v27 }
 0x187   :  { %7578 = vrot.lane.b32.xlu0 %v8402_v63, %s8155_s1 }
 0x188   :  { %v8601_v17 = vpop.permute.xlu0 %288  ;;  %v8606_v35 = vpop.permute.xlu1 %292 }
 0x189   :  { %v7547_v32 = vpack.i.bf16 %v8572_v57, %v8601_v17 }
 0x18b   :  { %7548 = vrot.lane.b32.xlu1 %v7547_v32, %s8154_s10 }
 0x18c   :  { %v8608_v43 = vpop.permute.xlu0 %320  ;;  %v8615_v4 = vpop.permute.xlu1 %356 }
 0x18d   :  { %v7592_v45 = vpack.i.bf16 %v8579_v62, %v8608_v43  ;;  %10955 = vst [vmem:[#allocation2_spill] sm:$0xff] %v8615_v4 }
 0x18f   :  { %7553 = vrot.lane.b32.xlu1 %v8308_v38, %s8155_s1  ;;  %7593 = vrot.lane.b32.xlu0 %v7592_v45, %s8154_s10 }
 0x190   :  { %v7479_v63 = vpop.permute.xlu0 %7478  ;;  %v8629_v38 = vpop.permute.xlu1 %330 }
 0x191   :  { %v7481_v46 = vunpack.i.h.bf16 %v7479_v63  ;;  %v7480_v47 = vunpack.i.l.bf16 %v7479_v63 }
 0x193   :  { %v7123_v7 = vpack.c.bf16 %v7481_v46, %v7480_v47  ;;  %7558 = vrot.lane.b32.xlu1 %v8334_v49, %s8155_s1  ;;  %7598 = vrot.lane.b32.xlu0 %v7522_v36, %s8155_s1 }
 0x194   :  { %v8620_v9 = vpop.permute.xlu0 %294  ;;  %v8639_v36 = vpop.permute.xlu1 %296 }
 0x195   :  { %7125 = vmatprep.subr.msk.bf16.mxu1 %vm8529_vm2, %v7123_v7 }
 0x196   :  { %7128 = vmatpush3.bf16.xpose.msk.msra.mxu1 %vm8529_vm2, %v7123_v7 }
 0x197   :  { %7568 = vrot.lane.b32.xlu1 %v8366_v56, %s8155_s1  ;;  %7608 = vrot.lane.b32.xlu0 %v7537_v59, %s8155_s1 }
 0x198   :  { %v8631_v27 = vpop.permute.xlu0 %358 }
 0x199   :  { %10956 = vst [vmem:[#allocation3_spill] sm:$0xff] %v8631_v27  ;;  %v8703_v59 = vpack.i.bf16 %v8631_v27, %v8615_v4 }
 0x19b   :  { %7583 = vrot.lane.b32.xlu1 %v7532_v52, %s8155_s1  ;;  %7628 = vrot.lane.b32.xlu0 %v7547_v32, %s8155_s1  ;;  %v7637_v52 = vpack.i.bf16 %v8591_v28, %v8588_v16  ;;  %10962 = vst [vmem:[#allocation9_spill] sm:$0xff] %v8703_v59 }
 0x19c   :  { %v8635_v49 = vpop.permute.xlu0 %324 }
 0x19d   :  { %6482 = vmatmul.mubr.msk.f32.vlgmr.msra.gmra.mrb[0].mxu1 %vm388_vm1, %v8283_v25  ;;  %v8659_v25 = vpack.i.bf16 %v8595_v29, %v8635_v49 }
 0x19e   :  { %6484 = vmatprep.mubr.msk.f32.mxu1 %vm388_vm1, %v8312_v40  ;;  %v8661_v40 = vpop.permute.xlu1 %360 }
 0x19f   :  { %7588 = vrot.lane.b32.xlu1 %v8515_v23, %s8155_s1  ;;  %7633 = vrot.lane.b32.xlu0 %v7592_v45, %s8155_s1  ;;  %10957 = vst [vmem:[#allocation4_spill] sm:$0xff] %v8659_v25  ;;  %10958 = vst [vmem:[#allocation5_spill] sm:$0xff] %v8661_v40 }
 0x1a0   :  { %v8646_v56 = vpop.permute.xlu0 %7483 }
 0x1a1   :  { %6485 = vmatmul.mubr.msk.f32.gmra.mrb[2].mxu1 %vm388_vm1, %v8296_v31 }
 0x1a2   :  { %6487 = vmatprep.mubr.msk.f32.mxu1 %vm388_vm1, %v8336_v51  ;;  %v8677_v51 = vpop.permute.xlu1 %334 }
 0x1a3   :  { %7603 = vrot.lane.b32.xlu1 %v8519_v24, %s8155_s1  ;;  %7638 = vrot.lane.b32.xlu0 %v7637_v52, %s8155_s1  ;;  %10960 = vst [vmem:[#allocation7_spill] sm:$0xff] %v8677_v51 }
 0x1a4   :  { %v8663_v23 = vpop.permute.xlu0 %298 }
 0x1a5   :  { %6488 = vmatmul.mubr.msk.f32.gmra.mrb[4].mxu1 %vm388_vm1, %v8323_v44  ;;  %v7657_v45 = vpack.i.bf16 %v8663_v23, %v8639_v36 }
 0x1a6   :  { %6490 = vmatprep.mubr.msk.f32.mxu1 %vm388_vm1, %v8362_v55 }
 0x1a7   :  { %7613 = vrot.lane.b32.xlu1 %v8553_v41, %s8155_s1  ;;  %7648 = vrot.lane.b32.xlu0 %v8659_v25, %s8154_s10 }
 0x1a8   :  { %v8673_v31 = vpop.permute.xlu0 %362 }
 0x1a9   :  { %10959 = vst [vmem:[#allocation6_spill] sm:$0xff] %v8673_v31  ;;  %6491 = vmatmul.mubr.msk.f32.gmra.mrb[6].mxu1 %vm388_vm1, %v8349_v53  ;;  %v8692_v53 = vpop.permute.xlu1 %300  ;;  %v8720_v47 = vpack.i.bf16 %v8673_v31, %v8661_v40 }
 0x1aa   :  { %6537 = vmatprep.mubr.msk.f32.mxu1 %vm388_vm1, %v8505_v20  ;;  %v7642_v20 = vpack.i.bf16 %v8620_v9, %v8606_v35 }
 0x1ab   :  { %7618 = vrot.lane.b32.xlu1 %v7637_v52, %s8154_s10  ;;  %10967 = vst [vmem:[#allocation14_spill] sm:$0xff] %v8720_v47 }
 0x1ac   :  { %v8682_v44 = vpop.permute.xlu0 %328 }
 0x1ad   :  { %v8686_v55 = vpack.i.bf16 %v8629_v38, %v8682_v44  ;;  %v8705_v32 = vpop.permute.xlu1 %364 }
 0x1ae   :  { %10963 = vst [vmem:[#allocation10_spill] sm:$0xff] %v8705_v32 }
 0x1af   :  { %10961 = vst [vmem:[#allocation8_spill] sm:$0xff] %v8686_v55  ;;  %7623 = vrot.lane.b32.xlu1 %v8583_v2, %s8155_s1  ;;  %7663 = vrot.lane.b32.xlu0 %v8686_v55, %s8154_s10 }
 0x1b0   :  { %v8694_v24 = vpop.permute.xlu0 %7488 }
 0x1b1   :  { %v8714_v63 = vpop.permute.xlu1 %338 }
 0x1b2   :  { %10965 = vst [vmem:[#allocation12_spill] sm:$0xff] %v8714_v63 }
 0x1b3   :  { %7643 = vrot.lane.b32.xlu1 %v7642_v20, %s8154_s10 }
 0x1b4   :  { %v8699_v41 = vpop.permute.xlu0 %302 }
 0x1b5   :  { %v7672_v52 = vpack.i.bf16 %v8699_v41, %v8692_v53 }
 0x1b7   :  { %7653 = vrot.lane.b32.xlu1 %v8703_v59, %s8154_s10  ;;  %v8734_v59 = vpop.permute.xlu1 %304 }
 0x1b8   :  { %v8709_v2 = vpop.permute.xlu0 %366 }
 0x1b9   :  { %10964 = vst [vmem:[#allocation11_spill] sm:$0xff] %v8709_v2  ;;  %v8741_v25 = vpack.i.bf16 %v8709_v2, %v8705_v32 }
 0x1bb   :  { %7658 = vrot.lane.b32.xlu1 %v7657_v45, %s8154_s10  ;;  %10969 = vst [vmem:[#allocation16_spill] sm:$0xff] %v8741_v25 }
 0x1bc   :  { %v8716_v46 = vpop.permute.xlu0 %332 }
 0x1bd   :  { %10966 = vst [vmem:[#allocation13_spill] sm:$0xff] %v8716_v46  ;;  %v8724_v7 = vpack.i.bf16 %v8677_v51, %v8716_v46 }
 0x1bf   :  { %10968 = vst [vmem:[#allocation15_spill] sm:$0xff] %v8724_v7  ;;  %7668 = vrot.lane.b32.xlu1 %v8720_v47, %s8154_s10  ;;  %7678 = vrot.lane.b32.xlu0 %v8724_v7, %s8154_s10  ;;  %v8747_v7 = vpop.permute.xlu1 %368 }
 0x1c0   :  { %v8732_v55 = vpop.permute.xlu0 %7493  ;;  %10971 = vst [vmem:[#allocation18_spill] sm:$0xff] %v8747_v7 }
 0x1c3   :  { %7673 = vrot.lane.b32.xlu1 %v7672_v52, %s8154_s10  ;;  %7698 = vrot.lane.b32.xlu0 %v8464_v11, %s8155_s1 }
 0x1c4   :  { %v8743_v47 = vpop.permute.xlu0 %306 }
 0x1c5   :  { %10970 = vst [vmem:[#allocation17_spill] sm:$0xff] %v8743_v47  ;;  %v8751_v31 = vpack.i.bf16 %v8743_v47, %v8734_v59 }
 0x1c7   :  { %7683 = vrot.lane.b32.xlu1 %v8741_v25, %s8154_s10  ;;  %10972 = vst [vmem:[#allocation19_spill] sm:$0xff] %v8751_v31 }
 0x1c8   :  { %v8753_v40 = vpop.permute.xlu0 %370 }
 0x1c9   :  { %10973 = vst [vmem:[#allocation20_spill] sm:$0xff] %v8753_v40 }
 0x1cb   :  { %7688 = vrot.lane.b32.xlu1 %v8751_v31, %s8154_s10 }
 0x1cc   :  { %v8757_v11 = vpop.permute.xlu0 %336 }
 0x1cd   :  { %10974 = vst [vmem:[#allocation21_spill] sm:$0xff] %v8757_v11  ;;  %v7504_v2 = vpop.permute.xlu1 %7503  ;;  %v8761_v32 = vpack.i.bf16 %v8714_v63, %v8757_v11  ;;  %v7485_v11 = vunpack.i.l.bf16 %v8646_v56 }
 0x1ce   :  { %v7506_v27 = vunpack.i.h.bf16 %v7504_v2  ;;  %v7505_v25 = vunpack.i.l.bf16 %v7504_v2 }
 0x1cf   :  { %10975 = vst [vmem:[#allocation22_spill] sm:$0xff] %v8761_v32  ;;  %7693 = vrot.lane.b32.xlu1 %v8432_v5, %s8155_s1  ;;  %7708 = vrot.lane.b32.xlu0 %v8761_v32, %s8154_s10 }
 0x1d0   :  { %v7129_v4 = vpack.c.bf16 %v7506_v27, %v7505_v25  ;;  %v8767_v51 = vpop.permute.xlu0 %7498 }
 0x1d2   :  { %7131 = vmatprep.subr.msk.bf16.mxu0 %vm8529_vm2, %v7129_v4 }
 0x1d3   :  { %7134 = vmatpush3.bf16.xpose.msk.msra.mxu0 %vm8529_vm2, %v7129_v4  ;;  %7703 = vrot.lane.b32.xlu1 %v7642_v20, %s8155_s1 }
 0x1d4   :  { %7713 = vrot.lane.b32.xlu0 %v8480_v12, %s8155_s1  ;;  %v7509_v2 = vpop.permute.xlu0 %7508  ;;  %v8786_v12 = vpack.i.bf16 %v8753_v40, %v8747_v7 }
 0x1d5   :  { %v7511_v31 = vunpack.i.h.bf16 %v7509_v2  ;;  %v7510_v5 = vunpack.i.l.bf16 %v7509_v2  ;;  %v7514_v27 = vpop.permute.xlu1 %7513 }
 0x1d6   :  { %10976 = vst [vmem:[#allocation23_spill] sm:$0xff] %v8786_v12 }
 0x1d7   :  { %v7153_v63 = vpack.c.bf16 %v7511_v31, %v7510_v5  ;;  %7718 = vrot.lane.b32.xlu1 %v7657_v45, %s8155_s1 }
 0x1d8   :  { %7723 = vrot.lane.b32.xlu0 %v8500_v18, %s8155_s1 }
 0x1d9   :  { %7155 = vmatprep.subr.msk.bf16.mxu1 %vm8529_vm2, %v7153_v63 }
 0x1da   :  { %7158 = vmatpush3.bf16.xpose.msk.msra.mxu1 %vm8529_vm2, %v7153_v63 }
 0x1db   :  { %7728 = vrot.lane.b32.xlu1 %v7672_v52, %s8155_s1 }
 0x1dd   :  { %v7519_v4 = vpop.permute.xlu1 %7518  ;;  %v7524_v25 = vpop.permute.xlu0 %7523 }
 0x1de   :  { %v7521_v31 = vunpack.i.h.bf16 %v7519_v4  ;;  %v7520_v20 = vunpack.i.l.bf16 %v7519_v4  ;;  %v7526_v45 = vunpack.i.h.bf16 %v7524_v25  ;;  %v7525_v2 = vunpack.i.l.bf16 %v7524_v25 }
 0x1df   :  { %7733 = vrot.lane.b32.xlu1 %v8786_v12, %s8154_s10 }
 0x1e0   :  { %v7135_v18 = vpack.c.bf16 %v7521_v31, %v7520_v20  ;;  %v7159_v5 = vpack.c.bf16 %v7526_v45, %v7525_v2 }
 0x1e1   :  { %v7529_v63 = vpop.permute.xlu1 %7528 }
 0x1e2   :  { %7137 = vmatprep.subr.msk.bf16.mxu0 %vm8529_vm2, %v7135_v18  ;;  %7161 = vmatprep.subr.msk.bf16.mxu1 %vm8529_vm2, %v7159_v5 }
 0x1e3   :  { %7140 = vmatpush3.bf16.xpose.msk.msra.mxu0 %vm8529_vm2, %v7135_v18  ;;  %7164 = vmatpush3.bf16.xpose.msk.msra.mxu1 %vm8529_vm2, %v7159_v5 }
 0x1e9   :  { %v7534_v52 = vpop.permute.xlu1 %7533 }
 0x1ea   :  { %v7536_v4 = vunpack.i.h.bf16 %v7534_v52  ;;  %v7535_v25 = vunpack.i.l.bf16 %v7534_v52 }
 0x1ec   :  { %v7141_v32 = vpack.c.bf16 %v7536_v4, %v7535_v25  ;;  %v7516_v4 = vunpack.i.h.bf16 %v7514_v27  ;;  %v7515_v25 = vunpack.i.l.bf16 %v7514_v27 }
 0x1ed   :  { %v7539_v12 = vpop.permute.xlu0 %7538 }
 0x1ee   :  { %v7541_v31 = vunpack.i.h.bf16 %v7539_v12  ;;  %v7540_v20 = vunpack.i.l.bf16 %v7539_v12  ;;  %7143 = vmatprep.subr.msk.bf16.mxu0 %vm8529_vm2, %v7141_v32  ;;  %v7177_v47 = vpack.c.bf16 %v7516_v4, %v7515_v25 }
 0x1ef   :  { %7146 = vmatpush3.bf16.xpose.msk.msra.mxu0 %vm8529_vm2, %v7141_v32 }
 0x1f0   :  { %v7165_v45 = vpack.c.bf16 %v7541_v31, %v7540_v20  ;;  %v7486_v31 = vunpack.i.h.bf16 %v8646_v56  ;;  %v7530_v56 = vunpack.i.l.bf16 %v7529_v63 }
 0x1f1   :  { %v8802_v2 = vpop.permute.xlu0 %7563  ;;  %v7544_v5 = vpop.permute.xlu1 %7543 }
 0x1f2   :  { %10977 = vst [vmem:[#allocation24_spill] sm:$0xff] %v8802_v2  ;;  %7167 = vmatprep.subr.msk.bf16.mxu1 %vm8529_vm2, %v7165_v45 }
 0x1f3   :  { %7170 = vmatpush3.bf16.xpose.msk.msra.mxu1 %vm8529_vm2, %v7165_v45 }
 0x1f5   :  { %v8808_v18 = vpop.permute.xlu0 %7573 }
 0x1f6   :  { %10978 = vst [vmem:[#allocation25_spill] sm:$0xff] %v8808_v18  ;;  %v7531_v18 = vunpack.i.h.bf16 %v7529_v63  ;;  %v7490_v63 = vunpack.i.l.bf16 %v8694_v24 }
 0x1f8   :  { %v7183_v4 = vpack.c.bf16 %v7531_v18, %v7530_v56  ;;  %v7545_v18 = vunpack.i.l.bf16 %v7544_v5 }
 0x1f9   :  { %v8810_v52 = vpop.permute.xlu0 %7578 }
 0x1fd   :  { %v7549_v12 = vpop.permute.xlu1 %7548 }
 0x1fe   :  { %v7551_v40 = vunpack.i.h.bf16 %v7549_v12  ;;  %v7550_v7 = vunpack.i.l.bf16 %v7549_v12  ;;  %v7201_v12 = vpack.c.bf16 %v7486_v31, %v7485_v11  ;;  %v7491_v11 = vunpack.i.h.bf16 %v8694_v24 }
 0x1ff   :  { %v7546_v24 = vunpack.i.h.bf16 %v7544_v5 }
 0x200   :  { %v7147_v32 = vpack.c.bf16 %v7551_v40, %v7550_v7 }
 0x201   :  { %v8813_v20 = vpop.permute.xlu1 %7553  ;;  %v7594_v2 = vpop.permute.xlu0 %7593 }
 0x202   :  { %v7596_v45 = vunpack.i.h.bf16 %v7594_v2  ;;  %v7595_v46 = vunpack.i.l.bf16 %v7594_v2  ;;  %7149 = vmatprep.subr.msk.bf16.mxu0 %vm8529_vm2, %v7147_v32 }
 0x203   :  { %7152 = vmatpush3.bf16.xpose.msk.msra.mxu0 %vm8529_vm2, %v7147_v32 }
 0x204   :  { %v7171_v27 = vpack.c.bf16 %v7596_v45, %v7595_v46  ;;  %7179 = vmatprep.subr.msk.bf16.mxu0 %vm8529_vm2, %v7177_v47 }
 0x205   :  { %v8822_v40 = vpop.permute.xlu1 %7558  ;;  %v8824_v7 = vpop.permute.xlu0 %7598 }
 0x206   :  { %7173 = vmatprep.subr.msk.bf16.mxu1 %vm8529_vm2, %v7171_v27 }
 0x207   :  { %7176 = vmatpush3.bf16.xpose.msk.msra.mxu1 %vm8529_vm2, %v7171_v27 }
 0x208   :  { %7203 = vmatprep.subr.msk.bf16.mxu1 %vm8529_vm2, %v7201_v12 }
 0x209   :  { %v8832_v46 = vpop.permute.xlu1 %7568  ;;  %v8834_v2 = vpop.permute.xlu0 %7608 }
 0x20a   :  { %6510 = vmatmul.mubr.msk.f32.vlgmr.msra.gmra.mrb[16].mxu0 %vm388_vm1, %v8488_v14  ;;  %v7207_v14 = vpack.c.bf16 %v7491_v11, %v7490_v63 }
 0x20b   :  { %6512 = vmatprep.mubr.msk.f32.mxu0 %vm388_vm1, %v8533_v33  ;;  %7182 = vmatpush3.bf16.xpose.msk.msra.mxu0 %vm8529_vm2, %v7177_v47 }
 0x20c   :  { %7185 = vmatprep.subr.msk.bf16.mxu0 %vm8529_vm2, %v7183_v4 }
 0x20d   :  { %v8846_v25 = vpop.permute.xlu1 %7583  ;;  %v8848_v32 = vpop.permute.xlu0 %7628 }
 0x20e   :  { %6513 = vmatmul.mubr.msk.f32.gmra.mrb[18].mxu0 %vm388_vm1, %v8503_v19  ;;  %6538 = vmatmul.mubr.msk.f32.vlgmr.msra.gmra.mrb[8].mxu1 %vm388_vm1, %v8486_v13  ;;  %v7496_v13 = vunpack.i.h.bf16 %v8732_v55  ;;  %v7495_v19 = vunpack.i.l.bf16 %v8732_v55 }
 0x20f   :  { %6515 = vmatprep.mubr.msk.f32.mxu0 %vm388_vm1, %v8561_v50  ;;  %6540 = vmatprep.mubr.msk.f32.mxu1 %vm388_vm1, %v8535_v34  ;;  %v7189_v50 = vpack.c.bf16 %v7546_v24, %v7545_v18 }
 0x210   :  { %7206 = vmatpush3.bf16.xpose.msk.msra.mxu1 %vm8529_vm2, %v7201_v12 }
 0x211   :  { %7209 = vmatprep.subr.msk.bf16.mxu1 %vm8529_vm2, %v7207_v14  ;;  %v8862_v33 = vpop.permute.xlu1 %7588  ;;  %v8874_v34 = vpop.permute.xlu0 %7633 }
 0x212   :  { %6516 = vmatmul.mubr.msk.f32.gmra.mrb[20].mxu0 %vm388_vm1, %v8547_v37  ;;  %6541 = vmatmul.mubr.msk.f32.gmra.mrb[10].mxu1 %vm388_vm1, %v8509_v21  ;;  %v7213_v37 = vpack.c.bf16 %v7496_v13, %v7495_v19 }
 0x213   :  { %6518 = vmatprep.mubr.msk.f32.mxu0 %vm388_vm1, %v8601_v17  ;;  %6543 = vmatprep.mubr.msk.f32.mxu1 %vm388_vm1, %v8570_v54 }
 0x214   :  { %7188 = vmatpush3.bf16.xpose.msk.msra.mxu0 %vm8529_vm2, %v7183_v4 }
 0x215   :  { %7191 = vmatprep.subr.msk.bf16.mxu0 %vm8529_vm2, %v7189_v50  ;;  %v8880_v21 = vpop.permute.xlu1 %7603  ;;  %v8896_v17 = vpop.permute.xlu0 %7638 }
 0x216   :  { %6519 = vmatmul.mubr.msk.f32.gmra.mrb[22].mxu0 %vm388_vm1, %v8572_v57  ;;  %6544 = vmatmul.mubr.msk.f32.gmra.mrb[12].mxu1 %vm388_vm1, %v8557_v42  ;;  %10980 = vst [vmem:[#allocation27_spill] sm:$0xff] %v8896_v17  ;;  %v7501_v42 = vunpack.i.h.bf16 %v8767_v51  ;;  %v7500_v57 = vunpack.i.l.bf16 %v8767_v51 }
 0x217   :  { %6546 = vmatprep.mubr.msk.f32.mxu1 %vm388_vm1, %v8608_v43  ;;  %6565 = vmatprep.mubr.msk.f32.mxu0 %vm388_vm1, %v8511_v22 }
 0x218   :  { %7212 = vmatpush3.bf16.xpose.msk.msra.mxu1 %vm8529_vm2, %v7207_v14  ;;  %v7219_v47 = vpack.c.bf16 %v7501_v42, %v7500_v57 }
 0x219   :  { %7215 = vmatprep.subr.msk.bf16.mxu1 %vm8529_vm2, %v7213_v37  ;;  %v8894_v54 = vpop.permute.xlu1 %7613  ;;  %v7649_v5 = vpop.permute.xlu0 %7648 }
 0x21a   :  { %10979 = vst [vmem:[#allocation26_spill] sm:$0xff] %v8894_v54  ;;  %6547 = vmatmul.mubr.msk.f32.gmra.mrb[14].mxu1 %vm388_vm1, %v8579_v62  ;;  %v7650_v51 = vunpack.i.l.bf16 %v7649_v5 }
 0x21b   :  { %6593 = vmatprep.mubr.msk.f32.mxu1 %vm388_vm1, %v8384_v60  ;;  %v7651_v60 = vunpack.i.h.bf16 %v7649_v5  ;;  %v7555_v5 = vunpack.i.l.bf16 %v8813_v20 }
 0x21c   :  { %7194 = vmatpush3.bf16.xpose.msk.msra.mxu0 %vm8529_vm2, %v7189_v50 }
 0x21d   :  { %v7619_v22 = vpop.permute.xlu1 %7618  ;;  %v7249_v56 = vpack.c.bf16 %v7651_v60, %v7650_v51 }
 0x21e   :  { %v7621_v43 = vunpack.i.h.bf16 %v7619_v22  ;;  %v7620_v55 = vunpack.i.l.bf16 %v7619_v22 }
 0x220   :  { %v7195_v31 = vpack.c.bf16 %v7621_v43, %v7620_v55  ;;  %7218 = vmatpush3.bf16.xpose.msk.msra.mxu1 %vm8529_vm2, %v7213_v37 }
 0x221   :  { %7221 = vmatprep.subr.msk.bf16.mxu1 %vm8529_vm2, %v7219_v47  ;;  %v8910_v62 = vpop.permute.xlu1 %7623  ;;  %v7664_v63 = vpop.permute.xlu0 %7663 }
 0x222   :  { %10981 = vst [vmem:[#allocation28_spill] sm:$0xff] %v8910_v62  ;;  %7197 = vmatprep.subr.msk.bf16.mxu0 %vm8529_vm2, %v7195_v31  ;;  %v7666_v14 = vunpack.i.h.bf16 %v7664_v63  ;;  %v7665_v24 = vunpack.i.l.bf16 %v7664_v63 }
 0x224   :  { %7200 = vmatpush3.bf16.xpose.msk.msra.mxu0 %vm8529_vm2, %v7195_v31  ;;  %v7255_v50 = vpack.c.bf16 %v7666_v14, %v7665_v24  ;;  %v7570_v14 = vunpack.i.l.bf16 %v8832_v46 }
 0x225   :  { %v7644_v45 = vpop.permute.xlu1 %7643 }
 0x226   :  { %v7646_v27 = vunpack.i.h.bf16 %v7644_v45  ;;  %v7645_v12 = vunpack.i.l.bf16 %v7644_v45 }
 0x228   :  { %v7225_v4 = vpack.c.bf16 %v7646_v27, %v7645_v12  ;;  %7224 = vmatpush3.bf16.xpose.msk.msra.mxu1 %vm8529_vm2, %v7219_v47 }
 0x229   :  { %7251 = vmatprep.subr.msk.bf16.mxu1 %vm8529_vm2, %v7249_v56  ;;  %v7654_v11 = vpop.permute.xlu1 %7653 }
 0x22a   :  { %7227 = vmatprep.subr.msk.bf16.mxu0 %vm8529_vm2, %v7225_v4 }
 0x22b   :  { %6566 = vmatmul.mubr.msk.f32.vlgmr.msra.gmra.mrb[24].mxu0 %vm388_vm1, %v8492_v15 }
 0x22c   :  { %6568 = vmatprep.mubr.msk.f32.mxu0 %vm388_vm1, %v8549_v39  ;;  %7230 = vmatpush3.bf16.xpose.msk.msra.mxu0 %vm8529_vm2, %v7225_v4  ;;  %v7560_v4 = vunpack.i.l.bf16 %v8822_v40 }
 0x22d   :  { %v7659_v18 = vpop.permute.xlu1 %7658 }
 0x22e   :  { %v7661_v13 = vunpack.i.h.bf16 %v7659_v18  ;;  %v7660_v19 = vunpack.i.l.bf16 %v7659_v18  ;;  %v7580_v18 = vunpack.i.l.bf16 %v8810_v52 }
 0x22f   :  { %6569 = vmatmul.mubr.msk.f32.gmra.mrb[26].mxu0 %vm388_vm1, %v8525_v26  ;;  %6594 = vmatmul.mubr.msk.f32.vlgmr.msra.gmra.mrb[16].mxu1 %vm388_vm1, %v8375_v58 }
 0x230   :  { %v7231_v37 = vpack.c.bf16 %v7661_v13, %v7660_v19  ;;  %6571 = vmatprep.mubr.msk.f32.mxu0 %vm388_vm1, %v8577_v61  ;;  %6596 = vmatprep.mubr.msk.f32.mxu1 %vm388_vm1, %v8408_v1  ;;  %v7590_v13 = vunpack.i.l.bf16 %v8862_v33 }
 0x231   :  { %7254 = vmatpush3.bf16.xpose.msk.msra.mxu1 %vm8529_vm2, %v7249_v56  ;;  %v7669_v15 = vpop.permute.xlu1 %7668  ;;  %v7679_v39 = vpop.permute.xlu0 %7678  ;;  %v7561_v56 = vunpack.i.h.bf16 %v8822_v40 }
 0x232   :  { %7257 = vmatprep.subr.msk.bf16.mxu1 %vm8529_vm2, %v7255_v50  ;;  %v7681_v26 = vunpack.i.h.bf16 %v7679_v39  ;;  %v7680_v42 = vunpack.i.l.bf16 %v7679_v39  ;;  %7233 = vmatprep.subr.msk.bf16.mxu0 %vm8529_vm2, %v7231_v37  ;;  %v7671_v45 = vunpack.i.h.bf16 %v7669_v15  ;;  %v7670_v27 = vunpack.i.l.bf16 %v7669_v15  ;;  %v10990_v15 = vld [vmem:[#allocation2_spill] sm:$0xff]  ;;  %v10991_v39 = vld [vmem:[#allocation12_spill] sm:$0xff] }
 0x233   :  { %6572 = vmatmul.mubr.msk.f32.gmra.mrb[28].mxu0 %vm388_vm1, %v8559_v48  ;;  %6597 = vmatmul.mubr.msk.f32.gmra.mrb[18].mxu1 %vm388_vm1, %v8404_v0  ;;  %v7301_v40 = vpack.c.bf16 %v7561_v56, %v7560_v4 }
 0x234   :  { %6574 = vmatprep.mubr.msk.f32.mxu0 %vm388_vm1, %v8588_v16  ;;  %6599 = vmatprep.mubr.msk.f32.mxu1 %vm388_vm1, %v8436_v6  ;;  %v7261_v1 = vpack.c.bf16 %v7681_v26, %v7680_v42 }
 0x235   :  { %7236 = vmatpush3.bf16.xpose.msk.msra.mxu0 %vm8529_vm2, %v7231_v37  ;;  %v7674_v58 = vpop.permute.xlu1 %7673  ;;  %v10989_v37 = vld [vmem:[#allocation21_spill] sm:$0xff] }
 0x236   :  { %v7676_v61 = vunpack.i.h.bf16 %v7674_v58  ;;  %v7675_v57 = vunpack.i.l.bf16 %v7674_v58 }
 0x237   :  { %6575 = vmatmul.mubr.msk.f32.gmra.mrb[30].mxu0 %vm388_vm1, %v8591_v28  ;;  %6600 = vmatmul.mubr.msk.f32.gmra.mrb[20].mxu1 %vm388_vm1, %v8421_v3  ;;  %v8970_v3 = vpop.permute.xlu0 %7698  ;;  %v7656_v28 = vunpack.i.h.bf16 %v7654_v11 }
 0x238   :  { %v7237_v0 = vpack.c.bf16 %v7676_v61, %v7675_v57  ;;  %6602 = vmatprep.mubr.msk.f32.mxu1 %vm388_vm1, %v8458_v10  ;;  %6621 = vmatprep.mubr.msk.f32.mxu0 %vm388_vm1, %v8606_v35  ;;  %10982 = vst [vmem:[#allocation29_spill] sm:$0xff] %v8970_v3  ;;  %v7655_v35 = vunpack.i.l.bf16 %v7654_v11  ;;  %v7279_v11 = vpack.c.bf16 %v7671_v45, %v7670_v27  ;;  %v10993_v57 = vld [vmem:[#allocation25_spill] sm:$0xff]  ;;  %v7605_v45 = vunpack.i.l.bf16 %v8880_v21  ;;  %v10998_v27 = vld [vmem:[#allocation11_spill] sm:$0xff] }
 0x239   :  { %7260 = vmatpush3.bf16.xpose.msk.msra.mxu1 %vm8529_vm2, %v7255_v50  ;;  %v7684_v6 = vpop.permute.xlu1 %7683 }
 0x23a   :  { %7239 = vmatprep.subr.msk.bf16.mxu0 %vm8529_vm2, %v7237_v0  ;;  %7263 = vmatprep.subr.msk.bf16.mxu1 %vm8529_vm2, %v7261_v1  ;;  %v7273_v31 = vpack.c.bf16 %v7656_v28, %v7655_v35  ;;  %v7685_v24 = vunpack.i.l.bf16 %v7684_v6  ;;  %v10995_v35 = vld [vmem:[#allocation5_spill] sm:$0xff] }
 0x23b   :  { %6603 = vmatmul.mubr.msk.f32.gmra.mrb[22].mxu1 %vm388_vm1, %v8449_v8 }
 0x23c   :  { %6649 = vmatprep.mubr.msk.f32.mxu1 %vm388_vm1, %v8635_v49  ;;  %v7556_v49 = vunpack.i.h.bf16 %v8813_v20 }
 0x23d   :  { %7242 = vmatpush3.bf16.xpose.msk.msra.mxu0 %vm8529_vm2, %v7237_v0  ;;  %v7689_v10 = vpop.permute.xlu1 %7688  ;;  %v7576_v0 = vunpack.i.h.bf16 %v10993_v57 }
 0x23e   :  { %v7691_v48 = vunpack.i.h.bf16 %v7689_v10  ;;  %v7690_v16 = vunpack.i.l.bf16 %v7689_v10  ;;  %v7297_v12 = vpack.c.bf16 %v7556_v49, %v7555_v5  ;;  %v7586_v10 = vunpack.i.h.bf16 %v8846_v25  ;;  %v10997_v5 = vld [vmem:[#allocation10_spill] sm:$0xff] }
 0x240   :  { %v7243_v22 = vpack.c.bf16 %v7691_v48, %v7690_v16  ;;  %v7585_v48 = vunpack.i.l.bf16 %v8846_v25  ;;  %v10994_v16 = vld [vmem:[#allocation3_spill] sm:$0xff] }
 0x241   :  { %7266 = vmatpush3.bf16.xpose.msk.msra.mxu1 %vm8529_vm2, %v7261_v1  ;;  %v8976_v43 = vpop.permute.xlu1 %7693  ;;  %v7709_v8 = vpop.permute.xlu0 %7708 }
 0x242   :  { %v7711_v55 = vunpack.i.h.bf16 %v7709_v8  ;;  %v7710_v47 = vunpack.i.l.bf16 %v7709_v8  ;;  %7245 = vmatprep.subr.msk.bf16.mxu0 %vm8529_vm2, %v7243_v22  ;;  %v7630_v8 = vunpack.i.l.bf16 %v8848_v32  ;;  %v7321_v25 = vpack.c.bf16 %v7586_v10, %v7585_v48 }
 0x244   :  { %v7267_v60 = vpack.c.bf16 %v7711_v55, %v7710_v47  ;;  %v10996_v55 = vld [vmem:[#allocation6_spill] sm:$0xff] }
 0x245   :  { %7248 = vmatpush3.bf16.xpose.msk.msra.mxu0 %vm8529_vm2, %v7243_v22  ;;  %v8984_v51 = vpop.permute.xlu1 %7703  ;;  %v7631_v22 = vunpack.i.h.bf16 %v8848_v32 }
 0x246   :  { %10983 = vst [vmem:[#allocation30_spill] sm:$0xff] %v8984_v51  ;;  %7275 = vmatprep.subr.msk.bf16.mxu0 %vm8529_vm2, %v7273_v31  ;;  %7269 = vmatprep.subr.msk.bf16.mxu1 %vm8529_vm2, %v7267_v60 }
 0x249   :  { %7272 = vmatpush3.bf16.xpose.msk.msra.mxu1 %vm8529_vm2, %v7267_v60  ;;  %v8992_v20 = vpop.permute.xlu1 %7718  ;;  %v7606_v60 = vunpack.i.h.bf16 %v8880_v21 }
 0x24a   :  { %7298 = vmatprep.subr.bf16.mxu1 %v7297_v12  ;;  %10984 = vst [vmem:[#allocation31_spill] sm:$0xff] %v8992_v20 }
 0x24c   :  { %6622 = vmatmul.mubr.msk.f32.vlgmr.msra.gmra.mrb[32].mxu0 %vm388_vm1, %v8620_v9  ;;  %v7571_v9 = vunpack.i.h.bf16 %v8832_v46 }
 0x24d   :  { %6624 = vmatprep.mubr.msk.f32.mxu0 %vm388_vm1, %v8639_v36  ;;  %7278 = vmatpush3.bf16.xpose.msk.msra.mxu0 %vm8529_vm2, %v7273_v31  ;;  %v9004_v63 = vpop.permute.xlu1 %7728  ;;  %v7686_v36 = vunpack.i.h.bf16 %v7684_v6  ;;  %v7575_v6 = vunpack.i.l.bf16 %v10993_v57 }
 0x24e   :  { %7281 = vmatprep.subr.msk.bf16.mxu0 %vm8529_vm2, %v7279_v11  ;;  %10985 = vst [vmem:[#allocation32_spill] sm:$0xff] %v9004_v63 }
 0x24f   :  { %v7317_v28 = vpack.c.bf16 %v7576_v0, %v7575_v6 }
 0x250   :  { %6625 = vmatmul.mubr.msk.f32.gmra.mrb[34].mxu0 %vm388_vm1, %v8663_v23  ;;  %6650 = vmatmul.mubr.msk.f32.vlgmr.msra.gmra.mrb[24].mxu1 %vm388_vm1, %v8595_v29  ;;  %v7581_v23 = vunpack.i.h.bf16 %v8810_v52  ;;  %v7285_v29 = vpack.c.bf16 %v7686_v36, %v7685_v24  ;;  %v7591_v52 = vunpack.i.h.bf16 %v8862_v33  ;;  %v10992_v33 = vld [vmem:[#allocation24_spill] sm:$0xff] }
 0x251   :  { %6627 = vmatprep.mubr.msk.f32.mxu0 %vm388_vm1, %v8692_v53  ;;  %6652 = vmatprep.mubr.msk.f32.mxu1 %vm388_vm1, %v8682_v44  ;;  %v10986_v53 = vld [vmem:[#allocation13_spill] sm:$0xff]  ;;  %v7305_v44 = vpack.c.bf16 %v7571_v9, %v7570_v14  ;;  %v7734_v46 = vpop.permute.xlu1 %7733  ;;  %v7566_v58 = vunpack.i.h.bf16 %v10992_v33  ;;  %v7565_v1 = vunpack.i.l.bf16 %v10992_v33  ;;  %v11000_v9 = vld [vmem:[#allocation20_spill] sm:$0xff]  ;;  %v9093_v14 = vpack.c.bf16 %v7606_v60, %v7605_v45 }
 0x252   :  { %7300 = vmatpush3.bf16.msra.mxu1 %v7297_v12  ;;  %v7736_v19 = vunpack.i.h.bf16 %v7734_v46  ;;  %v7735_v50 = vunpack.i.l.bf16 %v7734_v46  ;;  %v9042_v42 = vpack.c.bf16 %v7591_v52, %v7590_v13  ;;  %v7325_v12 = vpack.c.bf16 %v7631_v22, %v7630_v8 }
 0x253   :  { %7302 = vmatprep.subr.bf16.mxu1 %v7301_v40  ;;  %v7313_v61 = vpack.c.bf16 %v7566_v58, %v7565_v1  ;;  %11001 = vst [vmem:[#allocation13_spill] sm:$0xff] %v9093_v14 }
 0x254   :  { %6628 = vmatmul.mubr.msk.f32.gmra.mrb[36].mxu0 %vm388_vm1, %v8699_v41  ;;  %6653 = vmatmul.mubr.msk.f32.gmra.mrb[26].mxu1 %vm388_vm1, %v8629_v38  ;;  %v10987_v41 = vld [vmem:[#allocation17_spill] sm:$0xff]  ;;  %v10988_v38 = vld [vmem:[#allocation7_spill] sm:$0xff]  ;;  %v7291_v26 = vpack.c.bf16 %v7736_v19, %v7735_v50 }
 0x255   :  { %6630 = vmatprep.mubr.msk.f32.mxu0 %vm388_vm1, %v8734_v59  ;;  %6655 = vmatprep.mubr.msk.f32.mxu1 %vm388_vm1, %v10986_v53  ;;  %v7309_v59 = vpack.c.bf16 %v7581_v23, %v7580_v18 }
 0x256   :  { %7284 = vmatpush3.bf16.xpose.msk.msra.mxu0 %vm8529_vm2, %v7279_v11  ;;  %7304 = vmatpush3.bf16.msra.mxu1 %v7301_v40  ;;  %v10999_v11 = vld [vmem:[#allocation18_spill] sm:$0xff] }
 0x257   :  { %7287 = vmatprep.subr.msk.bf16.mxu0 %vm8529_vm2, %v7285_v29  ;;  %7306 = vmatprep.subr.bf16.mxu1 %v7305_v44 }
 0x258   :  { %6631 = vmatmul.mubr.msk.f32.gmra.mrb[38].mxu0 %vm388_vm1, %v10987_v41  ;;  %6656 = vmatmul.mubr.msk.f32.gmra.mrb[28].mxu1 %vm388_vm1, %v10988_v38 }
 0x259   :  { %6658 = vmatprep.mubr.msk.f32.mxu1 %vm388_vm1, %v10989_v37  ;;  %6677 = vmatprep.mubr.msk.f32.mxu0 %vm388_vm1, %v10990_v15 }
 0x25a   :  { %7308 = vmatpush3.bf16.msra.mxu1 %v7305_v44 }
 0x25b   :  { %7310 = vmatprep.subr.bf16.mxu1 %v7309_v59 }
 0x25c   :  { %6659 = vmatmul.mubr.msk.f32.gmra.mrb[30].mxu1 %vm388_vm1, %v10991_v39 }
 0x25e   :  { %7290 = vmatpush3.bf16.xpose.msk.msra.mxu0 %vm8529_vm2, %v7285_v29  ;;  %7312 = vmatpush3.bf16.msra.mxu1 %v7309_v59 }
 0x25f   :  { %7293 = vmatprep.subr.msk.bf16.mxu0 %vm8529_vm2, %v7291_v26  ;;  %7330 = vmatprep.subr.bf16.mxu1 %v9042_v42 }
 0x266   :  { %7296 = vmatpush3.bf16.xpose.msk.msra.mxu0 %vm8529_vm2, %v7291_v26 }
 0x267   :  { %7314 = vmatprep.subr.bf16.mxu0 %v7313_v61 }
 0x26d   :  { %6678 = vmatmul.mubr.msk.f32.vlgmr.msra.gmra.mrb[40].mxu0 %vm388_vm1, %v10994_v16 }
 0x26e   :  { %6680 = vmatprep.mubr.msk.f32.mxu0 %vm388_vm1, %v10995_v35  ;;  %7316 = vmatpush3.bf16.msra.mxu0 %v7313_v61 }
 0x26f   :  { %7318 = vmatprep.subr.bf16.mxu0 %v7317_v28 }
 0x270   :  { %v9061_v30 = vpop.f32.mrb[0].mxu1 }
 0x271   :  { %6681 = vmatmul.mubr.msk.f32.gmra.mrb[42].mxu0 %vm388_vm1, %v10996_v55  ;;  %v9067_v47 = vpop.f32.mrb[1].mxu1  ;;  %v1601_v49 = vsel %vm1597_vm3, %v9061_v30, -inf }
 0x272   :  { %6683 = vmatprep.mubr.msk.f32.mxu0 %vm388_vm1, %v10997_v5  ;;  %7320 = vmatpush3.bf16.msra.mxu0 %v7317_v28  ;;  %v1598_v31 = vsel %vm1597_vm3, %v9067_v47, -inf }
 0x273   :  { %7322 = vmatprep.subr.bf16.mxu0 %v7321_v25  ;;  %1602 = vmax.xlane.f32.xlu1 %v1601_v49 }
 0x274   :  { %1599 = vmax.xlane.f32.xlu0 %v1598_v31  ;;  %v9075_v32 = vpop.f32.mrb[2].mxu1  ;;  %v9170_v31 = vpop.permute.xlu0 %7713 }
 0x275   :  { %6684 = vmatmul.mubr.msk.f32.gmra.mrb[44].mxu0 %vm388_vm1, %v10998_v27  ;;  %v9081_v56 = vpop.f32.mrb[3].mxu1  ;;  %v1607_v4 = vsel %vm1597_vm3, %v9075_v32, -inf  ;;  %11002 = vst [vmem:[#allocation17_spill] sm:$0xff] %v9170_v31 }
 0x276   :  { %6686 = vmatprep.mubr.msk.f32.mxu0 %vm388_vm1, %v10999_v11  ;;  %7324 = vmatpush3.bf16.msra.mxu0 %v7321_v25  ;;  %v1604_v40 = vsel %vm1597_vm3, %v9081_v56, -inf }
 0x277   :  { %7326 = vmatprep.subr.bf16.mxu0 %v7325_v12  ;;  %1608 = vmax.xlane.f32.xlu1 %v1607_v4 }
 0x278   :  { %1605 = vmax.xlane.f32.xlu0 %v1604_v40  ;;  %v9089_v21 = vpop.f32.mrb[4].mxu1  ;;  %v9180_v11 = vpop.permute.xlu0 %7723 }
 0x279   :  { %6687 = vmatmul.mubr.msk.f32.gmra.mrb[46].mxu0 %vm388_vm1, %v11000_v9  ;;  %v9095_v36 = vpop.f32.mrb[5].mxu1  ;;  %v1613_v24 = vsel %vm1597_vm3, %v9089_v21, -inf  ;;  %11003 = vst [vmem:[#allocation7_spill] sm:$0xff] %v9180_v11 }
 0x27a   :  { %7328 = vmatpush3.bf16.msra.mxu0 %v7325_v12  ;;  %v1610_v29 = vsel %vm1597_vm3, %v9095_v36, -inf }
 0x27b   :  { %7346 = vmatprep.subr.bf16.mxu0 %v9093_v14  ;;  %1614 = vmax.xlane.f32.xlu1 %v1613_v24 }
 0x27c   :  { %v9100_v23 = vpop.f32.mrb[6].mxu1 }
 0x27d   :  { %v9102_v18 = vpop.f32.mrb[7].mxu1  ;;  %v1619_v53 = vsel %vm1597_vm3, %v9100_v23, -inf }
 0x27e   :  { %v1616_v44 = vsel %vm1597_vm3, %v9102_v18, -inf }
 0x27f   :  { %1611 = vmax.xlane.f32.xlu1 %v1610_v29 }
 0x283   :  { %1620 = vmax.xlane.f32.xlu1 %v1619_v53 }
 0x287   :  { %1617 = vmax.xlane.f32.xlu1 %v1616_v44 }
 0x2dd   :  { %v9110_v46 = vpop.f32.mrb[16].mxu0 }
 0x2de   :  { %v9112_v41 = vpop.f32.mrb[17].mxu0  ;;  %v1625_v38 = vsel %vm1597_vm3, %v9110_v46, -inf }
 0x2df   :  { %1626 = vmax.xlane.f32.xlu0 %v1625_v38  ;;  %v1622_v33 = vsel %vm1597_vm3, %v9112_v41, -inf }
 0x2e1   :  { %v9116_v59 = vpop.f32.mrb[18].mxu0  ;;  %v9118_v52 = vpop.f32.mrb[8].mxu1 }
 0x2e2   :  { %v9120_v13 = vpop.f32.mrb[19].mxu0  ;;  %v9122_v19 = vpop.f32.mrb[9].mxu1  ;;  %v1649_v50 = vsel %vm1597_vm3, %v9118_v52, -inf  ;;  %v1631_v28 = vsel %vm1597_vm3, %v9116_v59, -inf }
 0x2e3   :  { %1650 = vmax.xlane.f32.xlu0 %v1649_v50  ;;  %v1646_v6 = vsel %vm1597_vm3, %v9122_v19, -inf  ;;  %v1628_v22 = vsel %vm1597_vm3, %v9120_v13, -inf }
 0x2e5   :  { %v9126_v37 = vpop.f32.mrb[20].mxu0  ;;  %v9128_v15 = vpop.f32.mrb[10].mxu1 }
 0x2e6   :  { %v9130_v39 = vpop.f32.mrb[21].mxu0  ;;  %v9132_v26 = vpop.f32.mrb[11].mxu1  ;;  %v1655_v58 = vsel %vm1597_vm3, %v9128_v15, -inf  ;;  %v1637_v55 = vsel %vm1597_vm3, %v9126_v37, -inf }
 0x2e7   :  { %1623 = vmax.xlane.f32.xlu0 %v1622_v33  ;;  %1656 = vmax.xlane.f32.xlu1 %v1655_v58  ;;  %v1652_v10 = vsel %vm1597_vm3, %v9132_v26, -inf  ;;  %v1634_v49 = vsel %vm1597_vm3, %v9130_v39, -inf }
 0x2e9   :  { %v9138_v1 = vpop.f32.mrb[22].mxu0  ;;  %v9140_v61 = vpop.f32.mrb[12].mxu1 }
 0x2ea   :  { %v9142_v57 = vpop.f32.mrb[23].mxu0  ;;  %v9144_v0 = vpop.f32.mrb[13].mxu1  ;;  %v1661_v35 = vsel %vm1597_vm3, %v9140_v61, -inf  ;;  %v1643_v25 = vsel %vm1597_vm3, %v9138_v1, -inf }
 0x2eb   :  { %1647 = vmax.xlane.f32.xlu0 %v1646_v6  ;;  %1653 = vmax.xlane.f32.xlu1 %v1652_v10  ;;  %v1658_v8 = vsel %vm1597_vm3, %v9144_v0, -inf  ;;  %v1640_v45 = vsel %vm1597_vm3, %v9142_v57, -inf }
 0x2ed   :  { %v9150_v48 = vpop.f32.mrb[14].mxu1 }
 0x2ee   :  { %v9152_v16 = vpop.f32.mrb[15].mxu1  ;;  %v1667_v5 = vsel %vm1597_vm3, %v9150_v48, -inf }
 0x2ef   :  { %1632 = vmax.xlane.f32.xlu0 %v1631_v28  ;;  %1662 = vmax.xlane.f32.xlu1 %v1661_v35  ;;  %v1664_v24 = vsel %vm1597_vm3, %v9152_v16, -inf }
 0x2f3   :  { %1629 = vmax.xlane.f32.xlu0 %v1628_v22  ;;  %1659 = vmax.xlane.f32.xlu1 %v1658_v8 }
 0x2f7   :  { %1638 = vmax.xlane.f32.xlu0 %v1637_v55  ;;  %1644 = vmax.xlane.f32.xlu1 %v1643_v25 }
 0x2fb   :  { %1635 = vmax.xlane.f32.xlu0 %v1634_v49  ;;  %1668 = vmax.xlane.f32.xlu1 %v1667_v5 }
 0x2fe   :  { %v9172_v60 = vpop.f32.mrb[24].mxu0 }
 0x2ff   :  { %v9176_v27 = vpop.f32.mrb[25].mxu0  ;;  %v1673_v12 = vsel %vm1597_vm3, %v9172_v60, -inf  ;;  %1641 = vmax.xlane.f32.xlu1 %v1640_v45 }
 0x300   :  { %v1603_v4 = vpop.xlane.xlu1 %1602  ;;  %1674 = vmax.xlane.f32.xlu0 %v1673_v12  ;;  %v1670_v28 = vsel %vm1597_vm3, %v9176_v27, -inf }
 0x301   :  { %v1600_v50 = vpop.xlane.xlu0 %1599  ;;  %v1791_v8 = vsub.f32 %v9061_v30, %v1603_v4 }
 0x302   :  { %v9182_v40 = vpop.f32.mrb[26].mxu0  ;;  %v9184_v9 = vpop.f32.mrb[16].mxu1  ;;  %v1790_v55 = vsub.f32 %v9067_v47, %v1600_v50 }
 0x303   :  { %v9188_v29 = vpop.f32.mrb[27].mxu0  ;;  %v9190_v53 = vpop.f32.mrb[17].mxu1  ;;  %1665 = vmax.xlane.f32.xlu1 %v1664_v24  ;;  %v1697_v44 = vsel %vm1597_vm3, %v9184_v9, -inf  ;;  %v1856_v30 = vmul.f32 1.442695, %v1791_v8 }
 0x304   :  { %v1609_v38 = vpop.xlane.xlu1 %1608  ;;  %1698 = vmax.xlane.f32.xlu0 %v1697_v44  ;;  %v1694_v12 = vsel %vm1597_vm3, %v9190_v53, -inf  ;;  %v1854_v4 = vmul.f32 1.442695, %v1790_v55  ;;  %v1676_v8 = vsel %vm1597_vm3, %v9188_v29, -inf }
 0x305   :  { %7782 = vpow2.f32 %v1856_v30  ;;  %v1793_v51 = vsub.f32 %v9075_v32, %v1609_v38 }
 0x306   :  { %v9194_v33 = vpop.f32.mrb[28].mxu0  ;;  %v9196_v58 = vpop.f32.mrb[18].mxu1  ;;  %7784 = vpow2.f32 %v1854_v4 }
 0x307   :  { %v9198_v6 = vpop.f32.mrb[29].mxu0  ;;  %v9200_v10 = vpop.f32.mrb[19].mxu1  ;;  %v1703_v35 = vsel %vm1597_vm3, %v9196_v58, -inf }
 0x308   :  { %v1615_v22 = vpop.xlane.xlu1 %1614  ;;  %1671 = vmax.xlane.f32.xlu0 %v1670_v28  ;;  %1704 = vmax.xlane.f32.xlu1 %v1703_v35  ;;  %v1700_v24 = vsel %vm1597_vm3, %v9200_v10, -inf  ;;  %v1679_v28 = vsel %vm1597_vm3, %v9182_v40, -inf  ;;  %v1682_v32 = vsel %vm1597_vm3, %v9198_v6, -inf }
 0x30a   :  { %v9208_v25 = vpop.f32.mrb[30].mxu0  ;;  %v9210_v49 = vpop.f32.mrb[20].mxu1 }
 0x30b   :  { %v9212_v5 = vpop.f32.mrb[31].mxu0  ;;  %v9214_v45 = vpop.f32.mrb[21].mxu1  ;;  %v1709_v35 = vsel %vm1597_vm3, %v9210_v49, -inf }
 0x30c   :  { %v1612_v44 = vpop.xlane.xlu1 %1611  ;;  %1695 = vmax.xlane.f32.xlu0 %v1694_v12  ;;  %1701 = vmax.xlane.f32.xlu1 %v1700_v24  ;;  %v1706_v55 = vsel %vm1597_vm3, %v9214_v45, -inf }
 0x30e   :  { %v9220_v47 = vpop.f32.mrb[22].mxu1 }
 0x30f   :  { %v9222_v50 = vpop.f32.mrb[23].mxu1 }
 0x310   :  { %v1621_v63 = vpop.xlane.xlu1 %1620  ;;  %1680 = vmax.xlane.f32.xlu0 %v1679_v28  ;;  %1710 = vmax.xlane.f32.xlu1 %v1709_v35  ;;  %v1606_v28 = vpop.xlane.xlu0 %1605 }
 0x311   :  { %v1797_v20 = vsub.f32 %v9100_v23, %v1621_v63  ;;  %v1685_v63 = vsel %vm1597_vm3, %v9194_v33, -inf  ;;  %v1860_v23 = vmul.f32 1.442695, %v1793_v51  ;;  %v1792_v4 = vsub.f32 %v9081_v56, %v1606_v28  ;;  %v9240_v35 = vpop.eup %7782 }
 0x312   :  { %v1985_v56 = vsel %vm1597_vm3, %v9240_v35, 0.0 }
 0x313   :  { %v1868_v12 = vmul.f32 1.442695, %v1797_v20  ;;  %v1691_v20 = vsel %vm1597_vm3, %v9208_v25, -inf  ;;  %v1858_v38 = vmul.f32 1.442695, %v1792_v4 }
 0x314   :  { %v1618_v24 = vpop.xlane.xlu1 %1617  ;;  %1677 = vmax.xlane.f32.xlu0 %v1676_v8  ;;  %1707 = vmax.xlane.f32.xlu1 %v1706_v55 }
 0x315   :  { %v1796_v11 = vsub.f32 %v9102_v18, %v1618_v24  ;;  %7786 = vpow2.f32 %v1868_v12  ;;  %v1715_v18 = vsel %vm1597_vm3, %v9220_v47, -inf  ;;  %v1795_v12 = vsub.f32 %v9089_v21, %v1615_v22 }
 0x317   :  { %v1866_v30 = vmul.f32 1.442695, %v1796_v11  ;;  %v9246_v11 = vpop.eup %7784  ;;  %v1864_v28 = vmul.f32 1.442695, %v1795_v12  ;;  %v1712_v12 = vsel %vm1597_vm3, %v9222_v50, -inf }
 0x318   :  { %1686 = vmax.xlane.f32.xlu0 %v1685_v63  ;;  %1692 = vmax.xlane.f32.xlu1 %v1691_v20  ;;  %v1982_v8 = vsel %vm1597_vm3, %v9246_v11, 0.0  ;;  %v1688_v20 = vsel %vm1597_vm3, %v9212_v5, -inf }
 0x319   :  { %7788 = vpow2.f32 %v1866_v30  ;;  %v1794_v30 = vsub.f32 %v9095_v36, %v1612_v44 }
 0x31a   :  { %7790 = vpow2.f32 %v1860_v23 }
 0x31b   :  { %7792 = vpow2.f32 %v1858_v38  ;;  %v1862_v36 = vmul.f32 1.442695, %v1794_v30 }
 0x31c   :  { %1683 = vmax.xlane.f32.xlu0 %v1682_v32  ;;  %1716 = vmax.xlane.f32.xlu1 %v1715_v18  ;;  %7794 = vpow2.f32 %v1864_v28 }
 0x31d   :  { %7796 = vpow2.f32 %v1862_v36 }
 0x31f   :  { %v9249_v51 = vpop.f32.mrb[32].mxu0  ;;  %v9255_v55 = vpop.eup %7786 }
 0x320   :  { %11004 = vst [vmem:[#allocation21_spill] sm:$0xff] %v9255_v55  ;;  %v9257_v24 = vpop.f32.mrb[33].mxu0  ;;  %1986 = vadd.xlane.f32.xlu0 %v1985_v56  ;;  %1983 = vadd.xlane.f32.xlu1 %v1982_v8  ;;  %v2003_v22 = vsel %vm1597_vm3, %v9255_v55, 0.0 }
 0x323   :  { %v9260_v63 = vpop.f32.mrb[34].mxu0  ;;  %v9262_v21 = vpop.f32.mrb[24].mxu1 }
 0x324   :  { %v9268_v23 = vpop.eup %7788  ;;  %v9270_v4 = vpop.f32.mrb[35].mxu0  ;;  %2004 = vadd.xlane.f32.xlu0 %v2003_v22  ;;  %1689 = vmax.xlane.f32.xlu1 %v1688_v20  ;;  %v1721_v22 = vsel %vm1597_vm3, %v9249_v51, -inf }
 0x325   :  { %11005 = vst [vmem:[#allocation2_spill] sm:$0xff] %v9268_v23  ;;  %v9272_v32 = vpop.f32.mrb[25].mxu1  ;;  %v2000_v38 = vsel %vm1597_vm3, %v9268_v23, 0.0  ;;  %v9282_v56 = vpop.eup %7790 }
 0x326   :  { %11007 = vst [vmem:[#allocation24_spill] sm:$0xff] %v9282_v56  ;;  %v1991_v20 = vsel %vm1597_vm3, %v9282_v56, 0.0  ;;  %v9296_v17 = vpop.eup %7792  ;;  %v1742_v56 = vsel %vm1597_vm3, %v9272_v32, -inf }
 0x327   :  { %v9274_v44 = vpop.f32.mrb[36].mxu0  ;;  %v9276_v18 = vpop.f32.mrb[26].mxu1  ;;  %v1988_v36 = vsel %vm1597_vm3, %v9296_v17, 0.0 }
 0x328   :  { %11006 = vst [vmem:[#allocation12_spill] sm:$0xff] %v9274_v44  ;;  %v9284_v8 = vpop.f32.mrb[37].mxu0  ;;  %v9286_v31 = vpop.f32.mrb[27].mxu1  ;;  %2001 = vadd.xlane.f32.xlu0 %v2000_v38  ;;  %1713 = vmax.xlane.f32.xlu1 %v1712_v12  ;;  %v1745_v12 = vsel %vm1597_vm3, %v9262_v21, -inf }
 0x329   :  { %11008 = vst [vmem:[#allocation25_spill] sm:$0xff] %v9284_v8  ;;  %11009 = vst [vmem:[#allocation3_spill] sm:$0xff] %v9286_v31  ;;  %v9308_v62 = vpop.eup %7794 }
 0x32a   :  { %11013 = vst [vmem:[#allocation11_spill] sm:$0xff] %v9308_v62  ;;  %v1997_v55 = vsel %vm1597_vm3, %v9308_v62, 0.0 }
 0x32b   :  { %v9288_v28 = vpop.f32.mrb[38].mxu0  ;;  %v9290_v30 = vpop.f32.mrb[28].mxu1 }
 0x32c   :  { %11010 = vst [vmem:[#allocation5_spill] sm:$0xff] %v9290_v30  ;;  %v9298_v14 = vpop.f32.mrb[39].mxu0  ;;  %v9300_v3 = vpop.f32.mrb[29].mxu1  ;;  %1722 = vmax.xlane.f32.xlu0 %v1721_v22  ;;  %1992 = vadd.xlane.f32.xlu1 %v1991_v20  ;;  %v1718_v22 = vsel %vm1597_vm3, %v9257_v24, -inf }
 0x32d   :  { %11011 = vst [vmem:[#allocation6_spill] sm:$0xff] %v9300_v3  ;;  %v9316_v20 = vpop.eup %7796 }
 0x32e   :  { %11015 = vst [vmem:[#allocation20_spill] sm:$0xff] %v9316_v20  ;;  %v1994_v23 = vsel %vm1597_vm3, %v9316_v20, 0.0  ;;  %v1757_v20 = vsel %vm1597_vm3, %v9290_v30, -inf }
 0x32f   :  { %v9302_v38 = vpop.f32.mrb[30].mxu1 }
 0x330   :  { %11012 = vst [vmem:[#allocation10_spill] sm:$0xff] %v9302_v38  ;;  %v9310_v54 = vpop.f32.mrb[31].mxu1  ;;  %1989 = vadd.xlane.f32.xlu1 %v1988_v36  ;;  %1746 = vmax.xlane.f32.xlu0 %v1745_v12  ;;  %v1727_v36 = vsel %vm1597_vm3, %v9260_v63, -inf  ;;  %v1751_v12 = vsel %vm1597_vm3, %v9276_v18, -inf }
 0x331   :  { %11014 = vst [vmem:[#allocation18_spill] sm:$0xff] %v9310_v54 }
 0x334   :  { %1998 = vadd.xlane.f32.xlu1 %v1997_v55  ;;  %1719 = vmax.xlane.f32.xlu0 %v1718_v22  ;;  %v1724_v55 = vsel %vm1597_vm3, %v9270_v4, -inf  ;;  %v1748_v22 = vsel %vm1597_vm3, %v9286_v31, -inf  ;;  %v1730_v31 = vsel %vm1597_vm3, %v9284_v8, -inf }
 0x338   :  { %1995 = vadd.xlane.f32.xlu1 %v1994_v23  ;;  %1743 = vmax.xlane.f32.xlu0 %v1742_v56  ;;  %v1733_v56 = vsel %vm1597_vm3, %v9274_v44, -inf }
 0x33c   :  { %1728 = vmax.xlane.f32.xlu0 %v1727_v36  ;;  %1752 = vmax.xlane.f32.xlu1 %v1751_v12 }
 0x340   :  { %v9330_v62 = vpop.f32.mrb[40].mxu0  ;;  %1725 = vmax.xlane.f32.xlu0 %v1724_v55  ;;  %1749 = vmax.xlane.f32.xlu1 %v1748_v22  ;;  %v1754_v55 = vsel %vm1597_vm3, %v9300_v3, -inf }
 0x341   :  { %11016 = vst [vmem:[#allocation33_spill] sm:$0xff] %v9330_v62  ;;  %v9332_v23 = vpop.f32.mrb[41].mxu0  ;;  %v1769_v30 = vsel %vm1597_vm3, %v9330_v62, -inf  ;;  %v1736_v62 = vsel %vm1597_vm3, %v9298_v14, -inf }
 0x342   :  { %v1766_v3 = vsel %vm1597_vm3, %v9332_v23, -inf }
 0x344   :  { %v9338_v36 = vpop.f32.mrb[42].mxu0  ;;  %1734 = vmax.xlane.f32.xlu0 %v1733_v56  ;;  %1758 = vmax.xlane.f32.xlu1 %v1757_v20  ;;  %v1739_v20 = vsel %vm1597_vm3, %v9288_v28, -inf }
 0x345   :  { %11017 = vst [vmem:[#allocation34_spill] sm:$0xff] %v9338_v36  ;;  %v9340_v12 = vpop.f32.mrb[43].mxu0 }
 0x346   :  { %11018 = vst [vmem:[#allocation35_spill] sm:$0xff] %v9340_v12 }
 0x348   :  { %v9346_v22 = vpop.f32.mrb[44].mxu0  ;;  %1731 = vmax.xlane.f32.xlu0 %v1730_v31  ;;  %1755 = vmax.xlane.f32.xlu1 %v1754_v55  ;;  %v1763_v31 = vsel %vm1597_vm3, %v9302_v38, -inf  ;;  %v1775_v55 = vsel %vm1597_vm3, %v9338_v36, -inf }
 0x349   :  { %11019 = vst [vmem:[#allocation36_spill] sm:$0xff] %v9346_v22  ;;  %v9348_v44 = vpop.f32.mrb[45].mxu0 }
 0x34a   :  { %11020 = vst [vmem:[#allocation37_spill] sm:$0xff] %v9348_v44 }
 0x34c   :  { %v9354_v56 = vpop.f32.mrb[46].mxu0  ;;  %1770 = vmax.xlane.f32.xlu0 %v1769_v30  ;;  %1740 = vmax.xlane.f32.xlu1 %v1739_v20  ;;  %v1772_v30 = vsel %vm1597_vm3, %v9340_v12, -inf  ;;  %v1760_v20 = vsel %vm1597_vm3, %v9310_v54, -inf }
 0x34d   :  { %11021 = vst [vmem:[#allocation38_spill] sm:$0xff] %v9354_v56  ;;  %v9356_v8 = vpop.f32.mrb[47].mxu0 }
 0x34e   :  { %11022 = vst [vmem:[#allocation39_spill] sm:$0xff] %v9356_v8 }
 0x350   :  { %1767 = vmax.xlane.f32.xlu0 %v1766_v3  ;;  %1764 = vmax.xlane.f32.xlu1 %v1763_v31  ;;  %v1781_v3 = vsel %vm1597_vm3, %v9346_v22, -inf  ;;  %v1784_v31 = vsel %vm1597_vm3, %v9356_v8, -inf }
 0x354   :  { %1776 = vmax.xlane.f32.xlu0 %v1775_v55  ;;  %1737 = vmax.xlane.f32.xlu1 %v1736_v62  ;;  %v1778_v55 = vsel %vm1597_vm3, %v9348_v44, -inf  ;;  %v1787_v62 = vsel %vm1597_vm3, %v9354_v56, -inf }
 0x358   :  { %1773 = vmax.xlane.f32.xlu0 %v1772_v30  ;;  %1761 = vmax.xlane.f32.xlu1 %v1760_v20 }
 0x35c   :  { %1782 = vmax.xlane.f32.xlu0 %v1781_v3  ;;  %1785 = vmax.xlane.f32.xlu1 %v1784_v31 }
 0x360   :  { %1779 = vmax.xlane.f32.xlu0 %v1778_v55 }
 0x364   :  { %1788 = vmax.xlane.f32.xlu0 %v1787_v62 }
 0x36c   :  { %v1627_v38 = vpop.xlane.xlu0 %1626 }
 0x36d   :  { %v1799_v30 = vsub.f32 %v9110_v46, %v1627_v38 }
 0x36f   :  { %v1872_v20 = vmul.f32 1.442695, %v1799_v30 }
 0x370   :  { %v1651_v54 = vpop.xlane.xlu0 %1650 }
 0x371   :  { %7798 = vpow2.f32 %v1872_v20  ;;  %v1807_v22 = vsub.f32 %v9118_v52, %v1651_v54 }
 0x373   :  { %v1888_v36 = vmul.f32 1.442695, %v1807_v22 }
 0x374   :  { %v1624_v8 = vpop.xlane.xlu0 %1623  ;;  %v1657_v3 = vpop.xlane.xlu1 %1656 }
 0x375   :  { %7800 = vpow2.f32 %v1888_v36  ;;  %v1798_v31 = vsub.f32 %v9112_v41, %v1624_v8  ;;  %v1809_v55 = vsub.f32 %v9128_v15, %v1657_v3 }
 0x377   :  { %v1870_v44 = vmul.f32 1.442695, %v1798_v31  ;;  %v1892_v12 = vmul.f32 1.442695, %v1809_v55 }
 0x378   :  { %v1648_v56 = vpop.xlane.xlu0 %1647  ;;  %v1654_v62 = vpop.xlane.xlu1 %1653 }
 0x379   :  { %7802 = vpow2.f32 %v1870_v44  ;;  %v1806_v46 = vsub.f32 %v9122_v19, %v1648_v56  ;;  %v1808_v38 = vsub.f32 %v9132_v26, %v1654_v62 }
 0x37a   :  { %7804 = vpow2.f32 %v1892_v12 }
 0x37b   :  { %v9384_v30 = vpop.eup %7798  ;;  %v1886_v54 = vmul.f32 1.442695, %v1806_v46  ;;  %v1890_v52 = vmul.f32 1.442695, %v1808_v38 }
 0x37c   :  { %v1633_v22 = vpop.xlane.xlu0 %1632  ;;  %v1663_v36 = vpop.xlane.xlu1 %1662  ;;  %v2009_v41 = vsel %vm1597_vm3, %v9384_v30, 0.0 }
 0x37d   :  { %7806 = vpow2.f32 %v1886_v54  ;;  %v1801_v15 = vsub.f32 %v9116_v59, %v1633_v22  ;;  %2010 = vadd.xlane.f32.xlu0 %v2009_v41  ;;  %v1811_v59 = vsub.f32 %v9140_v61, %v1663_v36 }
 0x37e   :  { %7808 = vpow2.f32 %v1890_v52 }
 0x37f   :  { %v9389_v44 = vpop.eup %7800  ;;  %v1876_v19 = vmul.f32 1.442695, %v1801_v15  ;;  %v1896_v22 = vmul.f32 1.442695, %v1811_v59 }
 0x380   :  { %v1630_v8 = vpop.xlane.xlu0 %1629  ;;  %v1660_v26 = vpop.xlane.xlu1 %1659  ;;  %v2033_v12 = vsel %vm1597_vm3, %v9389_v44, 0.0 }
 0x381   :  { %7810 = vpow2.f32 %v1876_v19  ;;  %v1800_v56 = vsub.f32 %v9120_v13, %v1630_v8  ;;  %v1810_v20 = vsub.f32 %v9144_v0, %v1660_v26  ;;  %2034 = vadd.xlane.f32.xlu1 %v2033_v12 }
 0x383   :  { %v9395_v3 = vpop.eup %7802  ;;  %v1874_v31 = vmul.f32 1.442695, %v1800_v56  ;;  %v1894_v55 = vmul.f32 1.442695, %v1810_v20 }
 0x384   :  { %v9398_v62 = vpop.eup %7804  ;;  %v1639_v46 = vpop.xlane.xlu0 %1638  ;;  %v2006_v54 = vsel %vm1597_vm3, %v9395_v3, 0.0 }
 0x385   :  { %v1645_v38 = vpop.xlane.xlu1 %1644  ;;  %7812 = vpow2.f32 %v1874_v31  ;;  %v1803_v52 = vsub.f32 %v9126_v37, %v1639_v46  ;;  %2007 = vadd.xlane.f32.xlu0 %v2006_v54  ;;  %v2039_v0 = vsel %vm1597_vm3, %v9398_v62, 0.0 }
 0x386   :  { %v1805_v13 = vsub.f32 %v9138_v1, %v1645_v38  ;;  %7814 = vpow2.f32 %v1894_v55  ;;  %2040 = vadd.xlane.f32.xlu1 %v2039_v0 }
 0x387   :  { %v9406_v61 = vpop.eup %7806  ;;  %v1880_v36 = vmul.f32 1.442695, %v1803_v52 }
 0x388   :  { %v1884_v41 = vmul.f32 1.442695, %v1805_v13  ;;  %v9408_v15 = vpop.eup %7808  ;;  %v1636_v19 = vpop.xlane.xlu0 %1635  ;;  %v2030_v37 = vsel %vm1597_vm3, %v9406_v61, 0.0 }
 0x389   :  { %v1669_v8 = vpop.xlane.xlu1 %1668  ;;  %7816 = vpow2.f32 %v1880_v36  ;;  %v1802_v1 = vsub.f32 %v9130_v39, %v1636_v19  ;;  %2031 = vadd.xlane.f32.xlu0 %v2030_v37  ;;  %v2036_v26 = vsel %vm1597_vm3, %v9408_v15, 0.0 }
 0x38a   :  { %7818 = vpow2.f32 %v1884_v41  ;;  %v1813_v12 = vsub.f32 %v9150_v48, %v1669_v8  ;;  %2037 = vadd.xlane.f32.xlu1 %v2036_v26 }
 0x38b   :  { %v9416_v56 = vpop.eup %7810  ;;  %7820 = vpow2.f32 %v1896_v22  ;;  %v1878_v20 = vmul.f32 1.442695, %v1802_v1 }
 0x38c   :  { %v2015_v31 = vsel %vm1597_vm3, %v9416_v56, 0.0  ;;  %v1900_v39 = vmul.f32 1.442695, %v1813_v12 }
 0x38d   :  { %v1642_v59 = vpop.xlane.xlu1 %1641  ;;  %v1675_v55 = vpop.xlane.xlu0 %1674  ;;  %2016 = vadd.xlane.f32.xlu0 %v2015_v31  ;;  %7822 = vpow2.f32 %v1878_v20 }
 0x38e   :  { %v1804_v46 = vsub.f32 %v9142_v57, %v1642_v59  ;;  %v1815_v38 = vsub.f32 %v9172_v60, %v1675_v55 }
 0x38f   :  { %v9422_v54 = vpop.eup %7812 }
 0x390   :  { %v1882_v48 = vmul.f32 1.442695, %v1804_v46  ;;  %v9424_v52 = vpop.eup %7814  ;;  %v2012_v0 = vsel %vm1597_vm3, %v9422_v54, 0.0  ;;  %v1904_v60 = vmul.f32 1.442695, %v1815_v38 }
 0x391   :  { %v1666_v13 = vpop.xlane.xlu1 %1665  ;;  %v1699_v36 = vpop.xlane.xlu0 %1698  ;;  %2013 = vadd.xlane.f32.xlu0 %v2012_v0  ;;  %v2042_v57 = vsel %vm1597_vm3, %v9424_v52, 0.0 }
 0x392   :  { %7824 = vpow2.f32 %v1882_v48  ;;  %v1812_v22 = vsub.f32 %v9152_v16, %v1666_v13  ;;  %2043 = vadd.xlane.f32.xlu1 %v2042_v57  ;;  %v1823_v8 = vsub.f32 %v9184_v9, %v1699_v36 }
 0x393   :  { %7826 = vpow2.f32 %v1900_v39  ;;  %v9431_v41 = vpop.eup %7816 }
 0x394   :  { %v1898_v19 = vmul.f32 1.442695, %v1812_v22  ;;  %v9434_v37 = vpop.eup %7818  ;;  %v2021_v1 = vsel %vm1597_vm3, %v9431_v41, 0.0  ;;  %v1920_v31 = vmul.f32 1.442695, %v1823_v8 }
 0x395   :  { %v9438_v26 = vpop.eup %7820  ;;  %v1672_v16 = vpop.xlane.xlu0 %1671  ;;  %2022 = vadd.xlane.f32.xlu0 %v2021_v1  ;;  %v2027_v20 = vsel %vm1597_vm3, %v9434_v37, 0.0 }
 0x396   :  { %7828 = vpow2.f32 %v1898_v19  ;;  %v1705_v12 = vpop.xlane.xlu1 %1704  ;;  %v1814_v59 = vsub.f32 %v9176_v27, %v1672_v16  ;;  %2028 = vadd.xlane.f32.xlu1 %v2027_v20  ;;  %v2045_v46 = vsel %vm1597_vm3, %v9438_v26, 0.0 }
 0x397   :  { %7830 = vpow2.f32 %v1904_v60  ;;  %v1825_v9 = vsub.f32 %v9196_v58, %v1705_v12  ;;  %v9446_v39 = vpop.eup %7822 }
 0x398   :  { %v1902_v55 = vmul.f32 1.442695, %v1814_v59  ;;  %v2018_v57 = vsel %vm1597_vm3, %v9446_v39, 0.0 }
 0x399   :  { %v1696_v38 = vpop.xlane.xlu0 %1695  ;;  %2046 = vadd.xlane.f32.xlu0 %v2045_v46  ;;  %v1924_v27 = vmul.f32 1.442695, %v1825_v9 }
 0x39a   :  { %v1702_v48 = vpop.xlane.xlu1 %1701  ;;  %7832 = vpow2.f32 %v1902_v55  ;;  %v1822_v13 = vsub.f32 %v9190_v53, %v1696_v38 }
 0x39b   :  { %7834 = vpow2.f32 %v1920_v31  ;;  %v1824_v58 = vsub.f32 %v9200_v10, %v1702_v48 }
 0x39c   :  { %v9449_v0 = vpop.eup %7824  ;;  %v1918_v36 = vmul.f32 1.442695, %v1822_v13 }
 0x39d   :  { %v9451_v22 = vpop.eup %7826  ;;  %v2024_v60 = vsel %vm1597_vm3, %v9449_v0, 0.0  ;;  %v1681_v19 = vpop.xlane.xlu0 %1680  ;;  %2019 = vadd.xlane.f32.xlu0 %v2018_v57  ;;  %v1922_v12 = vmul.f32 1.442695, %v1824_v58 }
 0x39e   :  { %v1711_v8 = vpop.xlane.xlu1 %1710  ;;  %2025 = vadd.xlane.f32.xlu1 %v2024_v60  ;;  %7836 = vpow2.f32 %v1918_v36  ;;  %v1817_v53 = vsub.f32 %v9182_v40, %v1681_v19  ;;  %v2051_v16 = vsel %vm1597_vm3, %v9451_v22, 0.0 }
 0x39f   :  { %7838 = vpow2.f32 %v1924_v27  ;;  %v1827_v59 = vsub.f32 %v9210_v49, %v1711_v8 }
 0x3a0   :  { %v9459_v1 = vpop.eup %7828  ;;  %v1908_v20 = vmul.f32 1.442695, %v1817_v53 }
 0x3a1   :  { %v9463_v10 = vpop.eup %7830  ;;  %v2048_v31 = vsel %vm1597_vm3, %v9459_v1, 0.0  ;;  %v1678_v9 = vpop.xlane.xlu0 %1677  ;;  %2052 = vadd.xlane.f32.xlu0 %v2051_v16  ;;  %v1928_v48 = vmul.f32 1.442695, %v1827_v59 }
 0x3a2   :  { %v1708_v55 = vpop.xlane.xlu1 %1707  ;;  %2049 = vadd.xlane.f32.xlu1 %v2048_v31  ;;  %7840 = vpow2.f32 %v1908_v20  ;;  %v1816_v40 = vsub.f32 %v9188_v29, %v1678_v9  ;;  %v2057_v46 = vsel %vm1597_vm3, %v9463_v10, 0.0 }
 0x3a3   :  { %7842 = vpow2.f32 %v1922_v12  ;;  %v1826_v49 = vsub.f32 %v9214_v45, %v1708_v55 }
 0x3a4   :  { %v9471_v38 = vpop.eup %7832  ;;  %v1906_v13 = vmul.f32 1.442695, %v1816_v40 }
 0x3a5   :  { %v9474_v27 = vpop.eup %7834  ;;  %v1687_v36 = vpop.xlane.xlu0 %1686  ;;  %v2054_v57 = vsel %vm1597_vm3, %v9471_v38, 0.0  ;;  %v1926_v8 = vmul.f32 1.442695, %v1826_v49 }
 0x3a6   :  { %v1693_v58 = vpop.xlane.xlu1 %1692  ;;  %2058 = vadd.xlane.f32.xlu1 %v2057_v46  ;;  %7844 = vpow2.f32 %v1906_v13  ;;  %v1819_v29 = vsub.f32 %v9194_v33, %v1687_v36  ;;  %2055 = vadd.xlane.f32.xlu0 %v2054_v57  ;;  %v2081_v45 = vsel %vm1597_vm3, %v9474_v27, 0.0 }
 0x3a7   :  { %v1821_v60 = vsub.f32 %v9208_v25, %v1693_v58  ;;  %7846 = vpow2.f32 %v1928_v48 }
 0x3a8   :  { %v9480_v19 = vpop.eup %7836  ;;  %v1912_v53 = vmul.f32 1.442695, %v1819_v29 }
 0x3a9   :  { %v9484_v16 = vpop.eup %7838  ;;  %v1684_v12 = vpop.xlane.xlu0 %1683  ;;  %v2078_v59 = vsel %vm1597_vm3, %v9480_v19, 0.0  ;;  %v1916_v25 = vmul.f32 1.442695, %v1821_v60 }
 0x3aa   :  { %v1717_v20 = vpop.xlane.xlu1 %1716  ;;  %2082 = vadd.xlane.f32.xlu1 %v2081_v45  ;;  %7848 = vpow2.f32 %v1912_v53  ;;  %v1818_v33 = vsub.f32 %v9198_v6, %v1684_v12  ;;  %2079 = vadd.xlane.f32.xlu0 %v2078_v59  ;;  %v2087_v48 = vsel %vm1597_vm3, %v9484_v16, 0.0 }
 0x3ab   :  { %7850 = vpow2.f32 %v1926_v8  ;;  %v1829_v55 = vsub.f32 %v9220_v47, %v1717_v20 }
 0x3ac   :  { %v9489_v31 = vpop.eup %7840  ;;  %v1910_v9 = vmul.f32 1.442695, %v1818_v33 }
 0x3ad   :  { %v1987_v40 = vpop.xlane.xlu0 %1986  ;;  %v2063_v13 = vsel %vm1597_vm3, %v9489_v31, 0.0  ;;  %v9496_v49 = vpop.eup %7842  ;;  %v1932_v36 = vmul.f32 1.442695, %v1829_v55 }
 0x3ae   :  { %v1984_v46 = vpop.xlane.xlu1 %1983  ;;  %7852 = vpow2.f32 %v1910_v9  ;;  %2088 = vadd.xlane.f32.xlu0 %v2087_v48  ;;  %2064 = vadd.xlane.f32.xlu1 %v2063_v13  ;;  %v2084_v29 = vsel %vm1597_vm3, %v9496_v49, 0.0 }
 0x3af   :  { %7854 = vpow2.f32 %v1916_v25 }
 0x3b0   :  { %v9498_v6 = vpop.eup %7844  ;;  %7856 = vrcp.f32 %v1987_v40 }
 0x3b1   :  { %7858 = vrcp.f32 %v1984_v46  ;;  %v9500_v47 = vpop.xlane.xlu0 %2004  ;;  %v2060_v57 = vsel %vm1597_vm3, %v9498_v6, 0.0  ;;  %v9506_v60 = vpop.eup %7846 }
 0x3b2   :  { %v1690_v58 = vpop.xlane.xlu1 %1689  ;;  %11023 = vst [vmem:[#allocation40_spill] sm:$0xff] %v9506_v60  ;;  %2061 = vadd.xlane.f32.xlu0 %v2060_v57  ;;  %2085 = vadd.xlane.f32.xlu1 %v2084_v29  ;;  %7860 = vpow2.f32 %v1932_v36  ;;  %v2093_v59 = vsel %vm1597_vm3, %v9506_v60, 0.0  ;;  %v7601_v29 = vunpack.i.h.bf16 %v8824_v7 }
 0x3b3   :  { %v1820_v8 = vsub.f32 %v9212_v5, %v1690_v58 }
 0x3b4   :  { %v9509_v53 = vpop.eup %7848 }
 0x3b5   :  { %v1914_v45 = vmul.f32 1.442695, %v1820_v8  ;;  %v2002_v12 = vpop.xlane.xlu0 %2001  ;;  %v2069_v33 = vsel %vm1597_vm3, %v9509_v53, 0.0  ;;  %v9515_v25 = vpop.eup %7850  ;;  %v7600_v8 = vunpack.i.l.bf16 %v8824_v7  ;;  %v7611_v7 = vunpack.i.h.bf16 %v8834_v2 }
 0x3b6   :  { %v1714_v20 = vpop.xlane.xlu1 %1713  ;;  %2094 = vadd.xlane.f32.xlu0 %v2093_v59  ;;  %2070 = vadd.xlane.f32.xlu1 %v2069_v33  ;;  %v2090_v36 = vsel %vm1597_vm3, %v9515_v25, 0.0 }
 0x3b7   :  { %7862 = vpow2.f32 %v1914_v45  ;;  %v1828_v9 = vsub.f32 %v9222_v50, %v1714_v20 }
 0x3b8   :  { %v9518_v5 = vpop.eup %7852 }
 0x3b9   :  { %v1930_v55 = vmul.f32 1.442695, %v1828_v9  ;;  %v9520_v40 = vpop.eup %7854  ;;  %v1723_v46 = vpop.xlane.xlu0 %1722  ;;  %v2066_v13 = vsel %vm1597_vm3, %v9518_v5, 0.0 }
 0x3ba   :  { %v1993_v48 = vpop.xlane.xlu1 %1992  ;;  %v7857_v58 = vpop.eup %7856  ;;  %v1831_v57 = vsub.f32 %v9249_v51, %v1723_v46  ;;  %2067 = vadd.xlane.f32.xlu0 %v2066_v13  ;;  %2091 = vadd.xlane.f32.xlu1 %v2090_v36 }
 0x3bb   :  { %7864 = vpow2.f32 %v1930_v55  ;;  %v7859_v50 = vpop.eup %7858  ;;  %v2239_v45 = vmul.f32 %v7857_v58, %v9240_v35  ;;  %v2075_v55 = vsel %vm1597_vm3, %v9520_v40, 0.0  ;;  %v7610_v35 = vunpack.i.l.bf16 %v8834_v2 }
 0x3bc   :  { %v1936_v20 = vmul.f32 1.442695, %v1831_v57  ;;  %v2238_v59 = vmul.f32 %v7859_v50, %v9246_v11  ;;  %7866 = vrcp.f32 %v1993_v48  ;;  %v9533_v60 = vpop.eup %7860  ;;  %v7333_v11 = vpack.c.bf16 %v7601_v29, %v7600_v8 }
 0x3bd   :  { %v1747_v9 = vpop.xlane.xlu0 %1746  ;;  %v7636_v57 = vunpack.i.h.bf16 %v8874_v34  ;;  %v7635_v50 = vunpack.i.l.bf16 %v8874_v34  ;;  %v7696_v34 = vunpack.i.h.bf16 %v8976_v43 }
 0x3be   :  { %v1990_v33 = vpop.xlane.xlu1 %1989  ;;  %7868 = vpow2.f32 %v1936_v20  ;;  %6705 = vmatprep.mubr.msk.f32.mxu1 %vm1597_vm3, %v2238_v59  ;;  %v1839_v51 = vsub.f32 %v9262_v21, %v1747_v9  ;;  %2076 = vadd.xlane.f32.xlu0 %v2075_v55  ;;  %v2099_v21 = vsel %vm1597_vm3, %v9533_v60, 0.0  ;;  %v7695_v9 = vunpack.i.l.bf16 %v8976_v43 }
 0x3bf   :  { %6706 = vmatmul.mubr.msk.f32.vlgmr.msra.gmra.mrb[32].mxu1 %vm1597_vm3, %v2239_v45  ;;  %7870 = vrcp.f32 %v1990_v33  ;;  %v7341_v55 = vpack.c.bf16 %v7636_v57, %v7635_v50 }
 0x3c0   :  { %7332 = vmatpush3.bf16.msra.mxu1 %v9042_v42  ;;  %v1952_v48 = vmul.f32 1.442695, %v1839_v51  ;;  %v7337_v42 = vpack.c.bf16 %v7611_v7, %v7610_v35 }
 0x3c1   :  { %v9540_v46 = vpop.eup %7862  ;;  %7334 = vmatprep.subr.bf16.mxu1 %v7333_v11  ;;  %v1720_v36 = vpop.xlane.xlu0 %1719 }
 0x3c2   :  { %v1999_v13 = vpop.xlane.xlu1 %1998  ;;  %v2072_v58 = vsel %vm1597_vm3, %v9540_v46, 0.0  ;;  %7872 = vpow2.f32 %v1952_v48  ;;  %v1830_v2 = vsub.f32 %v9257_v24, %v1720_v36  ;;  %2100 = vadd.xlane.f32.xlu0 %v2099_v21  ;;  %v9565_v36 = vpack.c.bf16 %v7696_v34, %v7695_v9  ;;  %v11024_v21 = vld [vmem:[#allocation24_spill] sm:$0xff] }
 0x3c3   :  { %2073 = vadd.xlane.f32.xlu1 %v2072_v58  ;;  %7874 = vrcp.f32 %v2002_v12 }
 0x3c4   :  { %7336 = vmatpush3.bf16.msra.mxu1 %v7333_v11  ;;  %v1934_v8 = vmul.f32 1.442695, %v1830_v2  ;;  %7876 = vrcp.f32 %v1999_v13 }
 0x3c5   :  { %v9550_v29 = vpop.eup %7864  ;;  %7338 = vmatprep.subr.bf16.mxu1 %v7337_v42  ;;  %v1744_v20 = vpop.xlane.xlu0 %1743 }
 0x3c6   :  { %v1996_v45 = vpop.xlane.xlu1 %1995  ;;  %v2096_v59 = vsel %vm1597_vm3, %v9550_v29, 0.0  ;;  %7878 = vpow2.f32 %v1934_v8  ;;  %v1838_v24 = vsub.f32 %v9272_v32, %v1744_v20  ;;  %v7867_v33 = vpop.eup %7866  ;;  %v11026_v8 = vld [vmem:[#allocation3_spill] sm:$0xff] }
 0x3c7   :  { %2097 = vadd.xlane.f32.xlu1 %v2096_v59  ;;  %7880 = vrcp.f32 %v1996_v45  ;;  %v2241_v58 = vmul.f32 %v7867_v33, %v11024_v21 }
 0x3c8   :  { %v9557_v12 = vpop.eup %7868  ;;  %7340 = vmatpush3.bf16.msra.mxu1 %v7337_v42  ;;  %v1950_v51 = vmul.f32 1.442695, %v1838_v24  ;;  %7882 = vrcp.f32 %v9500_v47 }
 0x3c9   :  { %v7871_v7 = vpop.eup %7870  ;;  %7342 = vmatprep.subr.bf16.mxu1 %v7341_v55  ;;  %v1729_v35 = vpop.xlane.xlu0 %1728  ;;  %v2105_v32 = vsel %vm1597_vm3, %v9557_v12, 0.0 }
 0x3ca   :  { %v1753_v11 = vpop.xlane.xlu1 %1752  ;;  %7884 = vpow2.f32 %v1950_v51  ;;  %v1833_v48 = vsub.f32 %v9260_v63, %v1729_v35  ;;  %v2240_v13 = vmul.f32 %v7871_v7, %v9296_v17  ;;  %v11027_v7 = vld [vmem:[#allocation12_spill] sm:$0xff] }
 0x3cb   :  { %v1841_v43 = vsub.f32 %v9276_v18, %v1753_v11  ;;  %2106 = vadd.xlane.f32.xlu1 %v2105_v32 }
 0x3cc   :  { %v9568_v2 = vpop.eup %7872  ;;  %7344 = vmatpush3.bf16.msra.mxu1 %v7341_v55  ;;  %v1940_v47 = vmul.f32 1.442695, %v1833_v48  ;;  %6708 = vmatprep.mubr.msk.f32.mxu1 %vm1597_vm3, %v2240_v13  ;;  %v11029_v48 = vld [vmem:[#allocation11_spill] sm:$0xff] }
 0x3cd   :  { %11025 = vst [vmem:[#allocation24_spill] sm:$0xff] %v9568_v2  ;;  %v1956_v57 = vmul.f32 1.442695, %v1841_v43  ;;  %7362 = vmatprep.subr.bf16.mxu1 %v9565_v36  ;;  %6709 = vmatmul.mubr.msk.f32.gmra.mrb[34].mxu1 %vm1597_vm3, %v2241_v58  ;;  %v1726_v63 = vpop.xlane.xlu0 %1725  ;;  %v2129_v17 = vsel %vm1597_vm3, %v9568_v2, 0.0  ;;  %v7875_v50 = vpop.eup %7874  ;;  %v11030_v58 = vld [vmem:[#allocation2_spill] sm:$0xff] }
 0x3ce   :  { %v1750_v18 = vpop.xlane.xlu1 %1749  ;;  %7886 = vpow2.f32 %v1940_v47  ;;  %v1832_v42 = vsub.f32 %v9270_v4, %v1726_v63  ;;  %v7877_v20 = vpop.eup %7876  ;;  %v11028_v4 = vld [vmem:[#allocation20_spill] sm:$0xff]  ;;  %v2244_v47 = vmul.f32 %v7875_v50, %v11030_v58  ;;  %v11053_v2 = vld [vmem:[#allocation18_spill] sm:$0xff] }
 0x3cf   :  { %v1840_v45 = vsub.f32 %v11026_v8, %v1750_v18  ;;  %2130 = vadd.xlane.f32.xlu1 %v2129_v17  ;;  %7888 = vpow2.f32 %v1956_v57  ;;  %v2243_v43 = vmul.f32 %v7877_v20, %v11029_v48  ;;  %v11031_v17 = vld [vmem:[#allocation25_spill] sm:$0xff] }
 0x3d0   :  { %v9577_v59 = vpop.eup %7878  ;;  %v1938_v24 = vmul.f32 1.442695, %v1832_v42  ;;  %v11032_v8 = vld [vmem:[#allocation21_spill] sm:$0xff] }
 0x3d1   :  { %v1954_v33 = vmul.f32 1.442695, %v1840_v45  ;;  %v7881_v34 = vpop.eup %7880  ;;  %v1735_v9 = vpop.xlane.xlu0 %1734  ;;  %v2102_v51 = vsel %vm1597_vm3, %v9577_v59, 0.0 }
 0x3d2   :  { %v9579_v55 = vpop.xlane.xlu1 %1758  ;;  %7890 = vpow2.f32 %v1938_v24  ;;  %v1835_v35 = vsub.f32 %v11027_v7, %v1735_v9  ;;  %2103 = vadd.xlane.f32.xlu0 %v2102_v51  ;;  %v2242_v11 = vmul.f32 %v7881_v34, %v11028_v4  ;;  %v7883_v32 = vpop.eup %7882 }
 0x3d3   :  { %7892 = vpow2.f32 %v1954_v33  ;;  %v2245_v45 = vmul.f32 %v7883_v32, %v11032_v8 }
 0x3d4   :  { %v9586_v13 = vpop.eup %7884  ;;  %v1944_v21 = vmul.f32 1.442695, %v1835_v35  ;;  %6711 = vmatprep.mubr.msk.f32.mxu1 %vm1597_vm3, %v2242_v11 }
 0x3d5   :  { %6712 = vmatmul.mubr.msk.f32.gmra.mrb[36].mxu1 %vm1597_vm3, %v2243_v43  ;;  %v1732_v57 = vpop.xlane.xlu0 %1731  ;;  %v2126_v18 = vsel %vm1597_vm3, %v9586_v13, 0.0 }
 0x3d6   :  { %v1756_v63 = vpop.xlane.xlu1 %1755  ;;  %7894 = vpow2.f32 %v1944_v21  ;;  %6714 = vmatprep.mubr.msk.f32.mxu1 %vm1597_vm3, %v2244_v47  ;;  %v1834_v42 = vsub.f32 %v11031_v17, %v1732_v57  ;;  %2127 = vadd.xlane.f32.xlu0 %v2126_v18  ;;  %v11035_v57 = vld [vmem:[#allocation33_spill] sm:$0xff] }
 0x3d8   :  { %v9596_v20 = vpop.eup %7886  ;;  %v1942_v24 = vmul.f32 1.442695, %v1834_v42 }
 0x3d9   :  { %v9598_v33 = vpop.eup %7888  ;;  %6715 = vmatmul.mubr.msk.f32.gmra.mrb[38].mxu1 %vm1597_vm3, %v2245_v45  ;;  %v1771_v50 = vpop.xlane.xlu0 %1770  ;;  %v2111_v9 = vsel %vm1597_vm3, %v9596_v20, 0.0 }
 0x3da   :  { %11033 = vst [vmem:[#allocation3_spill] sm:$0xff] %v9598_v33  ;;  %v1741_v34 = vpop.xlane.xlu1 %1740  ;;  %7896 = vpow2.f32 %v1942_v24  ;;  %v2135_v7 = vsel %vm1597_vm3, %v9598_v33, 0.0  ;;  %2112 = vadd.xlane.f32.xlu1 %v2111_v9  ;;  %v1847_v18 = vsub.f32 %v11035_v57, %v1771_v50  ;;  %v11036_v24 = vld [vmem:[#allocation5_spill] sm:$0xff]  ;;  %v11051_v33 = vld [vmem:[#allocation26_spill] sm:$0xff] }
 0x3db   :  { %v1837_v51 = vsub.f32 %v9288_v28, %v1741_v34  ;;  %2136 = vadd.xlane.f32.xlu0 %v2135_v7  ;;  %v1843_v34 = vsub.f32 %v11036_v24, %v9579_v55 }
 0x3dc   :  { %v9606_v35 = vpop.eup %7890 }
 0x3dd   :  { %v1948_v4 = vmul.f32 1.442695, %v1837_v51  ;;  %v9608_v11 = vpop.eup %7892  ;;  %v1768_v32 = vpop.xlane.xlu0 %1767  ;;  %v2108_v43 = vsel %vm1597_vm3, %v9606_v35, 0.0  ;;  %v11037_v51 = vld [vmem:[#allocation6_spill] sm:$0xff] }
 0x3de   :  { %11034 = vst [vmem:[#allocation12_spill] sm:$0xff] %v9608_v11  ;;  %v9610_v48 = vpop.xlane.xlu1 %1764  ;;  %v1846_v21 = vsub.f32 %v9332_v23, %v1768_v32  ;;  %v2132_v28 = vsel %vm1597_vm3, %v9608_v11, 0.0  ;;  %v1842_v7 = vsub.f32 %v11037_v51, %v1756_v63  ;;  %v7615_v11 = vunpack.i.l.bf16 %v11051_v33 }
 0x3df   :  { %7898 = vpow2.f32 %v1948_v4  ;;  %2109 = vadd.xlane.f32.xlu0 %v2108_v43  ;;  %2133 = vadd.xlane.f32.xlu1 %v2132_v28  ;;  %v1968_v4 = vmul.f32 1.442695, %v1847_v18  ;;  %v11038_v43 = vld [vmem:[#allocation35_spill] sm:$0xff]  ;;  %v1960_v28 = vmul.f32 1.442695, %v1843_v34 }
 0x3e0   :  { %v9617_v58 = vpop.eup %7894  ;;  %v1966_v47 = vmul.f32 1.442695, %v1846_v21  ;;  %v1958_v57 = vmul.f32 1.442695, %v1842_v7 }
 0x3e1   :  { %v1777_v17 = vpop.xlane.xlu0 %1776  ;;  %v2117_v8 = vsel %vm1597_vm3, %v9617_v58, 0.0 }
 0x3e2   :  { %v1738_v42 = vpop.xlane.xlu1 %1737  ;;  %7900 = vpow2.f32 %v1966_v47 }
 0x3e3   :  { %v1836_v45 = vsub.f32 %v9298_v14, %v1738_v42  ;;  %2118 = vadd.xlane.f32.xlu1 %v2117_v8  ;;  %v11040_v42 = vld [vmem:[#allocation34_spill] sm:$0xff] }
 0x3e4   :  { %v9623_v23 = vpop.eup %7896  ;;  %v1849_v55 = vsub.f32 %v11040_v42, %v1777_v17 }
 0x3e5   :  { %v1946_v9 = vmul.f32 1.442695, %v1836_v45  ;;  %v1774_v32 = vpop.xlane.xlu0 %1773  ;;  %v2114_v50 = vsel %vm1597_vm3, %v9623_v23, 0.0 }
 0x3e6   :  { %v1848_v21 = vsub.f32 %v11038_v43, %v1774_v32  ;;  %2115 = vadd.xlane.f32.xlu0 %v2114_v50  ;;  %v1972_v8 = vmul.f32 1.442695, %v1849_v55 }
 0x3e7   :  { %7902 = vpow2.f32 %v1946_v9 }
 0x3e8   :  { %v1970_v14 = vmul.f32 1.442695, %v1848_v21  ;;  %7904 = vpow2.f32 %v1968_v4 }
 0x3e9   :  { %v9631_v47 = vpop.eup %7898 }
 0x3ea   :  { %11039 = vst [vmem:[#allocation20_spill] sm:$0xff] %v9631_v47  ;;  %7906 = vpow2.f32 %v1970_v14  ;;  %v2123_v63 = vsel %vm1597_vm3, %v9631_v47, 0.0 }
 0x3eb   :  { %2124 = vadd.xlane.f32.xlu0 %v2123_v63  ;;  %7908 = vpow2.f32 %v1960_v28  ;;  %v9662_v28 = vpop.xlane.xlu0 %1782 }
 0x3ec   :  { %v9636_v18 = vpop.eup %7900  ;;  %7910 = vpow2.f32 %v1958_v57  ;;  %v1762_v57 = vpop.xlane.xlu1 %1761 }
 0x3ed   :  { %11041 = vst [vmem:[#allocation11_spill] sm:$0xff] %v9636_v18  ;;  %v2150_v45 = vsel %vm1597_vm3, %v9636_v18, 0.0  ;;  %7912 = vpow2.f32 %v1972_v8  ;;  %v11054_v18 = vld [vmem:[#allocation28_spill] sm:$0xff] }
 0x3ee   :  { %v7626_v47 = vunpack.i.h.bf16 %v11054_v18 }
 0x3ef   :  { %2151 = vadd.xlane.f32.xlu0 %v2150_v45  ;;  %v1780_v42 = vpop.xlane.xlu0 %1779 }
 0x3f0   :  { %v9666_v55 = vpop.xlane.xlu1 %1785 }
 0x3f1   :  { %v9640_v24 = vpop.eup %7902 }
 0x3f2   :  { %11042 = vst [vmem:[#allocation2_spill] sm:$0xff] %v9640_v24  ;;  %v2120_v17 = vsel %vm1597_vm3, %v9640_v24, 0.0  ;;  %v9644_v34 = vpop.eup %7904  ;;  %v7625_v24 = vunpack.i.l.bf16 %v11054_v18 }
 0x3f3   :  { %11043 = vst [vmem:[#allocation25_spill] sm:$0xff] %v9644_v34  ;;  %2121 = vadd.xlane.f32.xlu1 %v2120_v17  ;;  %v2153_v4 = vsel %vm1597_vm3, %v9644_v34, 0.0  ;;  %v9668_v63 = vpop.xlane.xlu0 %1788  ;;  %v11048_v17 = vld [vmem:[#allocation4_spill] sm:$0xff] }
 0x3f4   :  { %v9646_v9 = vpop.eup %7906 }
 0x3f5   :  { %11044 = vst [vmem:[#allocation21_spill] sm:$0xff] %v9646_v9  ;;  %v2156_v51 = vsel %vm1597_vm3, %v9646_v9, 0.0  ;;  %v9650_v7 = vpop.eup %7908 }
 0x3f6   :  { %11045 = vst [vmem:[#allocation33_spill] sm:$0xff] %v9650_v7  ;;  %2157 = vadd.xlane.f32.xlu0 %v2156_v51  ;;  %v9654_v32 = vpop.eup %7910  ;;  %v2141_v50 = vsel %vm1597_vm3, %v9650_v7, 0.0  ;;  %v11049_v51 = vld [vmem:[#allocation19_spill] sm:$0xff] }
 0x3f7   :  { %11046 = vst [vmem:[#allocation5_spill] sm:$0xff] %v9654_v32  ;;  %2154 = vadd.xlane.f32.xlu1 %v2153_v4  ;;  %v2138_v43 = vsel %vm1597_vm3, %v9654_v32, 0.0  ;;  %v9660_v21 = vpop.eup %7912 }
 0x3f8   :  { %11047 = vst [vmem:[#allocation6_spill] sm:$0xff] %v9660_v21  ;;  %v2159_v14 = vsel %vm1597_vm3, %v9660_v21, 0.0  ;;  %v11050_v21 = vld [vmem:[#allocation37_spill] sm:$0xff] }
 0x3f9   :  { %v1850_v7 = vsub.f32 %v11050_v21, %v1780_v42 }
 0x3fa   :  { %2142 = vadd.xlane.f32.xlu0 %v2141_v50 }
 0x3fb   :  { %2139 = vadd.xlane.f32.xlu1 %v2138_v43 }
 0x3ff   :  { %2160 = vadd.xlane.f32.xlu1 %v2159_v14 }
 0x40a   :  { %v2011_v8 = vpop.xlane.xlu0 %2010 }
 0x40b   :  { %7914 = vrcp.f32 %v2011_v8  ;;  %v11052_v8 = vld [vmem:[#allocation10_spill] sm:$0xff] }
 0x40e   :  { %v2035_v45 = vpop.xlane.xlu1 %2034 }
 0x410   :  { %7743 = vrot.lane.b32.xlu1 %v11048_v17, %s8155_s1  ;;  %7738 = vrot.lane.b32.xlu0 %v11049_v51, %s8155_s1  ;;  %v7616_v17 = vunpack.i.h.bf16 %v11051_v33  ;;  %v1845_v51 = vsub.f32 %v11052_v8, %v9610_v48  ;;  %v11057_v8 = vld [vmem:[#allocation13_spill] sm:$0xff] }
 0x412   :  { %v2008_v4 = vpop.xlane.xlu0 %2007  ;;  %v1964_v48 = vmul.f32 1.442695, %v1845_v51 }
 0x413   :  { %7916 = vrcp.f32 %v2008_v4  ;;  %v2041_v50 = vpop.xlane.xlu1 %2040  ;;  %v1974_v4 = vmul.f32 1.442695, %v1850_v7 }
 0x414   :  { %7918 = vrcp.f32 %v2035_v45  ;;  %v1844_v45 = vsub.f32 %v11053_v2, %v1762_v57  ;;  %v11055_v2 = vld [vmem:[#allocation36_spill] sm:$0xff] }
 0x415   :  { %v7915_v32 = vpop.eup %7914 }
 0x416   :  { %v2032_v43 = vpop.xlane.xlu0 %2031  ;;  %v2247_v21 = vmul.f32 %v7915_v32, %v9384_v30  ;;  %v1962_v57 = vmul.f32 1.442695, %v1844_v45 }
 0x417   :  { %7920 = vrcp.f32 %v2032_v43  ;;  %v2038_v14 = vpop.xlane.xlu1 %2037 }
 0x418   :  { %7922 = vrcp.f32 %v2038_v14 }
 0x419   :  { %7924 = vrcp.f32 %v2041_v50 }
 0x41a   :  { %v2017_v9 = vpop.xlane.xlu0 %2016 }
 0x41b   :  { %7926 = vrcp.f32 %v2017_v9  ;;  %v1851_v9 = vsub.f32 %v11055_v2, %v9662_v28  ;;  %v11058_v28 = vld [vmem:[#allocation27_spill] sm:$0xff] }
 0x41d   :  { %v7917_v34 = vpop.eup %7916  ;;  %v1976_v2 = vmul.f32 1.442695, %v1851_v9 }
 0x41e   :  { %v2014_v43 = vpop.xlane.xlu0 %2013  ;;  %v2246_v14 = vmul.f32 %v7917_v34, %v9395_v3  ;;  %v7919_v50 = vpop.eup %7918  ;;  %v7349_v3 = vpack.c.bf16 %v7616_v17, %v7615_v11  ;;  %v11056_v34 = vld [vmem:[#allocation29_spill] sm:$0xff] }
 0x41f   :  { %7928 = vrcp.f32 %v2014_v43  ;;  %v2044_v42 = vpop.xlane.xlu1 %2043  ;;  %v7701_v7 = vunpack.i.h.bf16 %v11056_v34  ;;  %v7700_v32 = vunpack.i.l.bf16 %v11056_v34  ;;  %v2255_v51 = vmul.f32 %v7919_v50, %v9389_v44  ;;  %v11059_v11 = vld [vmem:[#allocation17_spill] sm:$0xff]  ;;  %v11060_v34 = vld [vmem:[#allocation30_spill] sm:$0xff] }
 0x420   :  { %7930 = vrcp.f32 %v2044_v42  ;;  %6733 = vmatprep.mubr.msk.f32.mxu0 %vm1597_vm3, %v2246_v14  ;;  %v7716_v17 = vunpack.i.h.bf16 %v11059_v11  ;;  %v7353_v42 = vpack.c.bf16 %v7626_v47, %v7625_v24  ;;  %v7715_v45 = vunpack.i.l.bf16 %v11059_v11 }
 0x421   :  { %v7921_v33 = vpop.eup %7920  ;;  %7932 = vpow2.f32 %v1974_v4  ;;  %6734 = vmatmul.mubr.msk.f32.vlgmr.msra.gmra.mrb[48].mxu0 %vm1597_vm3, %v2247_v21  ;;  %v7641_v4 = vunpack.i.h.bf16 %v11058_v28  ;;  %v7640_v21 = vunpack.i.l.bf16 %v11058_v28 }
 0x422   :  { %v7923_v30 = vpop.eup %7922  ;;  %7348 = vmatpush3.bf16.msra.mxu0 %v11057_v8  ;;  %v2023_v18 = vpop.xlane.xlu0 %2022  ;;  %v2254_v43 = vmul.f32 %v7921_v33, %v9406_v61  ;;  %7934 = vpow2.f32 %v1964_v48  ;;  %v7365_v33 = vpack.c.bf16 %v7701_v7, %v7700_v32  ;;  %v7706_v8 = vunpack.i.h.bf16 %v11060_v34 }
 0x423   :  { %7350 = vmatprep.subr.bf16.mxu0 %v7349_v3  ;;  %v7925_v14 = vpop.eup %7924  ;;  %v2256_v61 = vmul.f32 %v7923_v30, %v9408_v15  ;;  %7936 = vpow2.f32 %v1962_v57  ;;  %v2029_v44 = vpop.xlane.xlu1 %2028  ;;  %v7357_v48 = vpack.c.bf16 %v7641_v4, %v7640_v21  ;;  %v7705_v15 = vunpack.i.l.bf16 %v11060_v34  ;;  %v11061_v30 = vld [vmem:[#allocation7_spill] sm:$0xff] }
 0x424   :  { %6761 = vmatprep.mubr.msk.f32.mxu1 %vm1597_vm3, %v2254_v43  ;;  %v2257_v47 = vmul.f32 %v7925_v14, %v9398_v62  ;;  %v7726_v7 = vunpack.i.h.bf16 %v11061_v30  ;;  %v7725_v32 = vunpack.i.l.bf16 %v11061_v30 }
 0x425   :  { %6762 = vmatmul.mubr.msk.f32.vlgmr.msra.gmra.mrb[40].mxu1 %vm1597_vm3, %v2255_v51  ;;  %v7927_v24 = vpop.eup %7926 }
 0x426   :  { %7352 = vmatpush3.bf16.msra.mxu0 %v7349_v3  ;;  %7364 = vmatpush3.bf16.msra.mxu1 %v9565_v36  ;;  %v2047_v50 = vpop.xlane.xlu0 %2046  ;;  %v7369_v36 = vpack.c.bf16 %v7716_v17, %v7715_v45  ;;  %v2249_v28 = vmul.f32 %v7927_v24, %v9416_v56  ;;  %v7373_v21 = vpack.c.bf16 %v7726_v7, %v7725_v32 }
 0x427   :  { %7354 = vmatprep.subr.bf16.mxu0 %v7353_v42  ;;  %7938 = vrcp.f32 %v2047_v50  ;;  %6764 = vmatprep.mubr.msk.f32.mxu1 %vm1597_vm3, %v2256_v61 }
 0x428   :  { %7366 = vmatprep.subr.bf16.mxu1 %v7365_v33  ;;  %7940 = vpow2.f32 %v1976_v2 }
 0x429   :  { %v7929_v9 = vpop.eup %7928  ;;  %6765 = vmatmul.mubr.msk.f32.gmra.mrb[42].mxu1 %vm1597_vm3, %v2257_v47  ;;  %7942 = vrcp.f32 %v2023_v18  ;;  %v9716_v18 = vpack.c.bf16 %v7706_v8, %v7705_v15 }
 0x42a   :  { %v7931_v3 = vpop.eup %7930  ;;  %7356 = vmatpush3.bf16.msra.mxu0 %v7353_v42  ;;  %7368 = vmatpush3.bf16.msra.mxu1 %v7365_v33  ;;  %v2020_v62 = vpop.xlane.xlu0 %2019  ;;  %v2248_v43 = vmul.f32 %v7929_v9, %v9422_v54 }
 0x42b   :  { %v2026_v57 = vpop.xlane.xlu1 %2025  ;;  %v9709_v51 = vpop.eup %7932  ;;  %7358 = vmatprep.subr.bf16.mxu0 %v7357_v48  ;;  %7944 = vrcp.f32 %v2020_v62  ;;  %7370 = vmatprep.subr.bf16.mxu1 %v7369_v36  ;;  %v2258_v14 = vmul.f32 %v7931_v3, %v9424_v52 }
 0x42c   :  { %7946 = vrcp.f32 %v2026_v57  ;;  %6736 = vmatprep.mubr.msk.f32.mxu0 %vm1597_vm3, %v2248_v43  ;;  %v2162_v4 = vsel %vm1597_vm3, %v9709_v51, 0.0  ;;  %v9720_v11 = vpop.eup %7934  ;;  %v11062_v43 = vld [vmem:[#allocation31_spill] sm:$0xff] }
 0x42d   :  { %6767 = vmatprep.mubr.msk.f32.mxu1 %vm1597_vm3, %v2258_v14  ;;  %6737 = vmatmul.mubr.msk.f32.gmra.mrb[50].mxu0 %vm1597_vm3, %v2249_v28  ;;  %7948 = vrcp.f32 %v2029_v44  ;;  %v9723_v56 = vpop.eup %7936  ;;  %v2147_v42 = vsel %vm1597_vm3, %v9720_v11, 0.0  ;;  %v7721_v14 = vunpack.i.h.bf16 %v11062_v43  ;;  %v7720_v28 = vunpack.i.l.bf16 %v11062_v43 }
 0x42e   :  { %7360 = vmatpush3.bf16.msra.mxu0 %v7357_v48  ;;  %7372 = vmatpush3.bf16.msra.mxu1 %v7369_v36  ;;  %v2053_v54 = vpop.xlane.xlu0 %2052  ;;  %v2144_v50 = vsel %vm1597_vm3, %v9723_v56, 0.0 }
 0x42f   :  { %v2050_v52 = vpop.xlane.xlu1 %2049  ;;  %7378 = vmatprep.subr.bf16.mxu0 %v9716_v18  ;;  %7950 = vrcp.f32 %v2053_v54  ;;  %2163 = vadd.xlane.f32.xlu0 %v2162_v4 }
 0x430   :  { %7374 = vmatprep.subr.bf16.mxu1 %v7373_v21  ;;  %7952 = vrcp.f32 %v2050_v52  ;;  %v11063_v52 = vld [vmem:[#allocation32_spill] sm:$0xff] }
 0x431   :  { %v7939_v17 = vpop.eup %7938 }
 0x432   :  { %7376 = vmatpush3.bf16.msra.mxu1 %v7373_v21  ;;  %v2259_v2 = vmul.f32 %v7939_v17, %v9438_v26  ;;  %v9728_v61 = vpop.eup %7940  ;;  %v7731_v17 = vunpack.i.h.bf16 %v11063_v52 }
 0x433   :  { %v2059_v45 = vpop.xlane.xlu1 %2058  ;;  %v2056_v44 = vpop.xlane.xlu0 %2055  ;;  %2148 = vadd.xlane.f32.xlu0 %v2147_v42  ;;  %v2165_v26 = vsel %vm1597_vm3, %v9728_v61, 0.0  ;;  %v7730_v42 = vunpack.i.l.bf16 %v11063_v52 }
 0x434   :  { %7954 = vrcp.f32 %v2059_v45  ;;  %v7943_v33 = vpop.eup %7942  ;;  %2145 = vadd.xlane.f32.xlu1 %v2144_v50  ;;  %6768 = vmatmul.mubr.msk.f32.gmra.mrb[44].mxu1 %vm1597_vm3, %v2259_v2  ;;  %v7381_v45 = vpack.c.bf16 %v7721_v14, %v7720_v28 }
 0x435   :  { %7956 = vrcp.f32 %v2056_v44  ;;  %v7945_v47 = vpop.eup %7944  ;;  %v2251_v8 = vmul.f32 %v7943_v33, %v9431_v41  ;;  %v7385_v50 = vpack.c.bf16 %v7731_v17, %v7730_v42 }
 0x436   :  { %v7947_v24 = vpop.eup %7946  ;;  %v2250_v9 = vmul.f32 %v7945_v47, %v9446_v39 }
 0x437   :  { %v2083_v48 = vpop.xlane.xlu1 %2082  ;;  %v2080_v34 = vpop.xlane.xlu0 %2079  ;;  %v2252_v36 = vmul.f32 %v7947_v24, %v9449_v0 }
 0x438   :  { %7958 = vrcp.f32 %v2083_v48  ;;  %v7949_v15 = vpop.eup %7948  ;;  %2166 = vadd.xlane.f32.xlu1 %v2165_v26  ;;  %6739 = vmatprep.mubr.msk.f32.mxu0 %vm1597_vm3, %v2250_v9 }
 0x439   :  { %7960 = vrcp.f32 %v2080_v34  ;;  %v7951_v3 = vpop.eup %7950  ;;  %6740 = vmatmul.mubr.msk.f32.gmra.mrb[52].mxu0 %vm1597_vm3, %v2251_v8  ;;  %v2253_v41 = vmul.f32 %v7949_v15, %v9434_v37 }
 0x43a   :  { %v7953_v30 = vpop.eup %7952  ;;  %6742 = vmatprep.mubr.msk.f32.mxu0 %vm1597_vm3, %v2252_v36  ;;  %v2261_v39 = vmul.f32 %v7951_v3, %v9451_v22 }
 0x43b   :  { %v2089_v7 = vpop.xlane.xlu0 %2088  ;;  %v2065_v32 = vpop.xlane.xlu1 %2064  ;;  %v2260_v62 = vmul.f32 %v7953_v30, %v9459_v1 }
 0x43c   :  { %7962 = vrcp.f32 %v2089_v7 }
 0x43d   :  { %6770 = vmatprep.mubr.msk.f32.mxu1 %vm1597_vm3, %v2260_v62  ;;  %6743 = vmatmul.mubr.msk.f32.gmra.mrb[54].mxu0 %vm1597_vm3, %v2253_v41  ;;  %7964 = vrcp.f32 %v2065_v32 }
 0x43e   :  { %v7955_v57 = vpop.eup %7954  ;;  %6771 = vmatmul.mubr.msk.f32.gmra.mrb[46].mxu1 %vm1597_vm3, %v2261_v39 }
 0x43f   :  { %v7957_v0 = vpop.eup %7956  ;;  %v2263_v54 = vmul.f32 %v7955_v57, %v9463_v10  ;;  %v2062_v22 = vpop.xlane.xlu0 %2061 }
 0x440   :  { %v2086_v1 = vpop.xlane.xlu1 %2085  ;;  %v2262_v37 = vmul.f32 %v7957_v0, %v9471_v38  ;;  %7966 = vrcp.f32 %v2062_v22  ;;  %v11067_v0 = vld [vmem:[#allocation40_spill] sm:$0xff] }
 0x441   :  { %7968 = vrcp.f32 %v2086_v1 }
 0x442   :  { %v7959_v4 = vpop.eup %7958  ;;  %6789 = vmatprep.mubr.msk.f32.mxu0 %vm1597_vm3, %v2262_v37 }
 0x443   :  { %v7961_v21 = vpop.eup %7960  ;;  %v2271_v10 = vmul.f32 %v7959_v4, %v9474_v27  ;;  %6790 = vmatmul.mubr.msk.f32.vlgmr.msra.gmra.mrb[56].mxu0 %vm1597_vm3, %v2263_v54  ;;  %v2095_v2 = vpop.xlane.xlu0 %2094 }
 0x444   :  { %7380 = vmatpush3.bf16.msra.mxu0 %v9716_v18  ;;  %v2071_v44 = vpop.xlane.xlu1 %2070  ;;  %v2270_v38 = vmul.f32 %v7961_v21, %v9480_v19  ;;  %7970 = vrcp.f32 %v2095_v2  ;;  %v11064_v18 = vld [vmem:[#allocation9_spill] sm:$0xff]  ;;  %v11065_v19 = vld [vmem:[#allocation8_spill] sm:$0xff] }
 0x445   :  { %7382 = vmatprep.subr.bf16.mxu0 %v7381_v45  ;;  %7972 = vrcp.f32 %v2071_v44 }
 0x446   :  { %6817 = vmatprep.mubr.msk.f32.mxu1 %vm1597_vm3, %v2270_v38  ;;  %v7963_v47 = vpop.eup %7962 }
 0x447   :  { %6818 = vmatmul.mubr.msk.f32.vlgmr.msra.gmra.mrb[48].mxu1 %vm1597_vm3, %v2271_v10  ;;  %v2068_v33 = vpop.xlane.xlu0 %2067  ;;  %v7965_v24 = vpop.eup %7964  ;;  %v2273_v36 = vmul.f32 %v7963_v47, %v9484_v16 }
 0x448   :  { %7384 = vmatpush3.bf16.msra.mxu0 %v7381_v45  ;;  %v2092_v27 = vpop.xlane.xlu1 %2091  ;;  %7974 = vrcp.f32 %v2068_v33  ;;  %v2265_v15 = vmul.f32 %v7965_v24, %v9489_v31 }
 0x449   :  { %7386 = vmatprep.subr.bf16.mxu0 %v7385_v50  ;;  %7976 = vrcp.f32 %v2092_v27  ;;  %7753 = vrot.lane.b32.xlu1 %v11064_v18, %s8155_s1  ;;  %v11069_v18 = vld [vmem:[#allocation14_spill] sm:$0xff] }
 0x44a   :  { %7748 = vrot.lane.b32.xlu0 %v11065_v19, %s8155_s1  ;;  %v7967_v48 = vpop.eup %7966  ;;  %v11070_v19 = vld [vmem:[#allocation15_spill] sm:$0xff] }
 0x44b   :  { %v7969_v9 = vpop.eup %7968  ;;  %v2077_v34 = vpop.xlane.xlu0 %2076  ;;  %v2264_v26 = vmul.f32 %v7967_v48, %v9498_v6 }
 0x44c   :  { %7388 = vmatpush3.bf16.msra.mxu0 %v7385_v50  ;;  %v2272_v8 = vmul.f32 %v7969_v9, %v9496_v49  ;;  %7978 = vrcp.f32 %v2077_v34  ;;  %v11066_v49 = vld [vmem:[#allocation38_spill] sm:$0xff] }
 0x44d   :  { %6792 = vmatprep.mubr.msk.f32.mxu0 %vm1597_vm3, %v2264_v26  ;;  %v1853_v31 = vsub.f32 %v11066_v49, %v9668_v63  ;;  %v11068_v63 = vld [vmem:[#allocation39_spill] sm:$0xff]  ;;  %v11071_v34 = vld [vmem:[#allocation22_spill] sm:$0xff] }
 0x44e   :  { %6820 = vmatprep.mubr.msk.f32.mxu1 %vm1597_vm3, %v2272_v8  ;;  %6793 = vmatmul.mubr.msk.f32.gmra.mrb[58].mxu0 %vm1597_vm3, %v2265_v15  ;;  %v7971_v30 = vpop.eup %7970  ;;  %v1852_v28 = vsub.f32 %v11068_v63, %v9666_v55  ;;  %v11073_v15 = vld [vmem:[#allocation23_spill] sm:$0xff] }
 0x44f   :  { %6821 = vmatmul.mubr.msk.f32.gmra.mrb[50].mxu1 %vm1597_vm3, %v2273_v36  ;;  %v2101_v39 = vpop.xlane.xlu0 %2100  ;;  %v7973_v7 = vpop.eup %7972  ;;  %v2275_v43 = vmul.f32 %v7971_v30, %v11067_v0  ;;  %v1980_v14 = vmul.f32 1.442695, %v1853_v31 }
 0x450   :  { %v2074_v3 = vpop.xlane.xlu1 %2073  ;;  %v2267_v57 = vmul.f32 %v7973_v7, %v9509_v53 }
 0x451   :  { %7980 = vrcp.f32 %v2074_v3 }
 0x452   :  { %v7975_v6 = vpop.eup %7974  ;;  %7982 = vrcp.f32 %v2101_v39 }
 0x453   :  { %v7977_v32 = vpop.eup %7976  ;;  %v2266_v16 = vmul.f32 %v7975_v6, %v9518_v5 }
 0x454   :  { %v2098_v62 = vpop.xlane.xlu1 %2097  ;;  %v2274_v41 = vmul.f32 %v7977_v32, %v9515_v25  ;;  %v1978_v25 = vmul.f32 1.442695, %v1852_v28 }
 0x455   :  { %7984 = vrcp.f32 %v2098_v62  ;;  %6795 = vmatprep.mubr.msk.f32.mxu0 %vm1597_vm3, %v2266_v16 }
 0x456   :  { %6823 = vmatprep.mubr.msk.f32.mxu1 %vm1597_vm3, %v2274_v41  ;;  %6796 = vmatmul.mubr.msk.f32.gmra.mrb[60].mxu0 %vm1597_vm3, %v2267_v57  ;;  %v7979_v5 = vpop.eup %7978  ;;  %7986 = vpow2.f32 %v1980_v14 }
 0x457   :  { %6824 = vmatmul.mubr.msk.f32.gmra.mrb[52].mxu1 %vm1597_vm3, %v2275_v43  ;;  %v2269_v1 = vmul.f32 %v7979_v5, %v9520_v40  ;;  %7988 = vpow2.f32 %v1978_v25 }
 0x458   :  { %v2107_v40 = vpop.xlane.xlu1 %2106 }
 0x45b   :  { %v7981_v54 = vpop.eup %7980 }
 0x45c   :  { %v2268_v53 = vmul.f32 %v7981_v54, %v9540_v46  ;;  %v7983_v22 = vpop.eup %7982  ;;  %v9801_v45 = vpop.xlane.xlu1 %2130 }
 0x45d   :  { %v2277_v21 = vmul.f32 %v7983_v22, %v9533_v60 }
 0x45e   :  { %6798 = vmatprep.mubr.msk.f32.mxu0 %vm1597_vm3, %v2268_v53 }
 0x45f   :  { %v7985_v37 = vpop.eup %7984  ;;  %6799 = vmatmul.mubr.msk.f32.gmra.mrb[62].mxu0 %vm1597_vm3, %v2269_v1  ;;  %v2104_v4 = vpop.xlane.xlu0 %2103  ;;  %v11074_v1 = vld [vmem:[#allocation2_spill] sm:$0xff] }
 0x460   :  { %v2276_v55 = vmul.f32 %v7985_v37, %v9550_v29  ;;  %7990 = vrcp.f32 %v2104_v4  ;;  %v9792_v52 = vpop.eup %7986 }
 0x461   :  { %v2171_v17 = vsel %vm1597_vm3, %v9792_v52, 0.0  ;;  %v9796_v42 = vpop.eup %7988 }
 0x462   :  { %6826 = vmatprep.mubr.msk.f32.mxu1 %vm1597_vm3, %v2276_v55  ;;  %v2168_v2 = vsel %vm1597_vm3, %v9796_v42, 0.0  ;;  %v11075_v55 = vld [vmem:[#allocation20_spill] sm:$0xff] }
 0x463   :  { %6827 = vmatmul.mubr.msk.f32.gmra.mrb[54].mxu1 %vm1597_vm3, %v2277_v21  ;;  %v2128_v46 = vpop.xlane.xlu0 %2127  ;;  %v11076_v21 = vld [vmem:[#allocation11_spill] sm:$0xff] }
 0x464   :  { %7992 = vrcp.f32 %v2128_v46 }
 0x465   :  { %7994 = vrcp.f32 %v2107_v40 }
 0x467   :  { %v2113_v33 = vpop.xlane.xlu1 %2112 }
 0x468   :  { %v9798_v10 = vpop.xlane.xlu0 %2136 }
 0x469   :  { %2172 = vadd.xlane.f32.xlu0 %v2171_v17 }
 0x46a   :  { %v7991_v29 = vpop.eup %7990 }
 0x46b   :  { %v2278_v60 = vmul.f32 %v7991_v29, %v9577_v59 }
 0x46c   :  { %v2110_v38 = vpop.xlane.xlu0 %2109  ;;  %v9808_v47 = vpop.xlane.xlu1 %2133 }
 0x46d   :  { %2169 = vadd.xlane.f32.xlu1 %v2168_v2  ;;  %6845 = vmatprep.mubr.msk.f32.mxu0 %vm1597_vm3, %v2278_v60  ;;  %7996 = vrcp.f32 %v2110_v38 }
 0x46e   :  { %v7993_v44 = vpop.eup %7992  ;;  %7998 = vrcp.f32 %v2113_v33 }
 0x46f   :  { %v2286_v50 = vmul.f32 %v7993_v44, %v9586_v13  ;;  %v11072_v13 = vld [vmem:[#allocation16_spill] sm:$0xff]  ;;  %v7995_v31 = vpop.eup %7994 }
 0x470   :  { %v2119_v59 = vpop.xlane.xlu1 %2118  ;;  %v2279_v57 = vmul.f32 %v7995_v31, %v9557_v12 }
 0x471   :  { %6873 = vmatprep.mubr.msk.f32.mxu1 %vm1597_vm3, %v2286_v50 }
 0x473   :  { %v2116_v27 = vpop.xlane.xlu0 %2115 }
 0x474   :  { %8000 = vrcp.f32 %v2116_v27 }
 0x475   :  { %8002 = vrcp.f32 %v2119_v59 }
 0x477   :  { %v7997_v32 = vpop.eup %7996 }
 0x478   :  { %v2125_v24 = vpop.xlane.xlu0 %2124  ;;  %v7999_v43 = vpop.eup %7998  ;;  %v2280_v28 = vmul.f32 %v7997_v32, %v9606_v35 }
 0x479   :  { %v2281_v54 = vmul.f32 %v7999_v43, %v9596_v20 }
 0x47c   :  { %v2152_v48 = vpop.xlane.xlu0 %2151 }
 0x47e   :  { %7763 = vrot.lane.b32.xlu1 %v11069_v18, %s8155_s1  ;;  %v8001_v5 = vpop.eup %8000 }
 0x47f   :  { %7758 = vrot.lane.b32.xlu0 %v11070_v19, %s8155_s1  ;;  %v8003_v25 = vpop.eup %8002  ;;  %v2282_v12 = vmul.f32 %v8001_v5, %v9623_v23 }
 0x480   :  { %v2122_v9 = vpop.xlane.xlu1 %2121  ;;  %v2283_v22 = vmul.f32 %v8003_v25, %v9617_v58 }
 0x481   :  { %8004 = vrcp.f32 %v2122_v9 }
 0x482   :  { %7768 = vrot.lane.b32.xlu1 %v11071_v34, %s8155_s1  ;;  %8006 = vrcp.f32 %v2125_v24 }
 0x483   :  { %7773 = vrot.lane.b32.xlu0 %v11072_v13, %s8155_s1  ;;  %v9818_v26 = vpop.xlane.xlu0 %2157  ;;  %8008 = vrcp.f32 %v2152_v48 }
 0x484   :  { %v9820_v8 = vpop.xlane.xlu1 %2154  ;;  %8010 = vrcp.f32 %v9801_v45 }
 0x485   :  { %8012 = vrcp.f32 %v9808_v47 }
 0x486   :  { %7778 = vrot.lane.b32.xlu1 %v11073_v15, %s8155_s1  ;;  %8014 = vrcp.f32 %v9798_v10 }
 0x487   :  { %v9824_v36 = vpop.xlane.xlu0 %2142  ;;  %8016 = vrcp.f32 %v9820_v8 }
 0x488   :  { %v9826_v3 = vpop.xlane.xlu1 %2139 }
 0x489   :  { %8018 = vrcp.f32 %v9826_v3 }
 0x48a   :  { %8020 = vrcp.f32 %v9818_v26 }
 0x48b   :  { %v7739_v30 = vpop.permute.xlu0 %7738  ;;  %v8005_v53 = vpop.eup %8004  ;;  %8022 = vrcp.f32 %v9824_v36 }
 0x48c   :  { %v7741_v39 = vunpack.i.h.bf16 %v7739_v30  ;;  %v7740_v7 = vunpack.i.l.bf16 %v7739_v30  ;;  %v9828_v6 = vpop.xlane.xlu1 %2160  ;;  %v8007_v35 = vpop.eup %8006  ;;  %v2284_v37 = vmul.f32 %v8005_v53, %v11074_v1 }
 0x48d   :  { %v8009_v4 = vpop.eup %8008  ;;  %v2285_v20 = vmul.f32 %v8007_v35, %v11075_v55  ;;  %8024 = vrcp.f32 %v9828_v6  ;;  %v11077_v55 = vld [vmem:[#allocation24_spill] sm:$0xff] }
 0x48e   :  { %v7389_v49 = vpack.c.bf16 %v7741_v39, %v7740_v7  ;;  %v2294_v46 = vmul.f32 %v8009_v4, %v11076_v21  ;;  %v8011_v3 = vpop.eup %8010 }
 0x48f   :  { %v8013_v1 = vpop.eup %8012 }
 0x490   :  { %v7744_v62 = vpop.permute.xlu1 %7743  ;;  %7390 = vmatprep.subr.bf16.mxu0 %v7389_v49  ;;  %v8015_v4 = vpop.eup %8014 }
 0x491   :  { %v7746_v16 = vunpack.i.h.bf16 %v7744_v62  ;;  %v7745_v41 = vunpack.i.l.bf16 %v7744_v62  ;;  %7392 = vmatpush3.bf16.msra.mxu0 %v7389_v49 }
 0x492   :  { %v9831_v0 = vpop.f32.mrb[32].mxu1 }
 0x493   :  { %v7393_v14 = vpack.c.bf16 %v7746_v16, %v7745_v41  ;;  %v9833_v63 = vpop.f32.mrb[33].mxu1 }
 0x494   :  { %6846 = vmatmul.mubr.msk.f32.vlgmr.msra.gmra.mrb[64].mxu0 %vm1597_vm3, %v2279_v57 }
 0x495   :  { %7394 = vmatprep.subr.bf16.mxu1 %v7393_v14  ;;  %6848 = vmatprep.mubr.msk.f32.mxu0 %vm1597_vm3, %v2280_v28 }
 0x496   :  { %7396 = vmatpush3.bf16.msra.mxu1 %v7393_v14 }
 0x498   :  { %6849 = vmatmul.mubr.msk.f32.gmra.mrb[66].mxu0 %vm1597_vm3, %v2281_v54 }
 0x499   :  { %6851 = vmatprep.mubr.msk.f32.mxu0 %vm1597_vm3, %v2282_v12 }
 0x49c   :  { %6852 = vmatmul.mubr.msk.f32.gmra.mrb[68].mxu0 %vm1597_vm3, %v2283_v22 }
 0x49d   :  { %6854 = vmatprep.mubr.msk.f32.mxu0 %vm1597_vm3, %v2284_v37 }
 0x4a0   :  { %v9848_v23 = vpop.f32.mrb[34].mxu1  ;;  %6855 = vmatmul.mubr.msk.f32.gmra.mrb[70].mxu0 %vm1597_vm3, %v2285_v20  ;;  %v2287_v20 = vmul.f32 %v8011_v3, %v11077_v55  ;;  %v11084_v3 = vld [vmem:[#allocation6_spill] sm:$0xff] }
 0x4a1   :  { %v9851_v40 = vpop.f32.mrb[35].mxu1  ;;  %6901 = vmatprep.mubr.msk.f32.mxu0 %vm1597_vm3, %v2294_v46  ;;  %v8017_v46 = vpop.eup %8016 }
 0x4a8   :  { %v9854_v58 = vpop.f32.mrb[36].mxu1 }
 0x4a9   :  { %v9856_v17 = vpop.f32.mrb[37].mxu1 }
 0x4ac   :  { %v9858_v29 = vpop.f32.mrb[38].mxu1 }
 0x4ad   :  { %v9860_v60 = vpop.f32.mrb[39].mxu1 }
 0x4bc   :  { %v2164_v2 = vpop.xlane.xlu0 %2163 }
 0x4c0   :  { %v2149_v44 = vpop.xlane.xlu0 %2148 }
 0x4c1   :  { %v2146_v38 = vpop.xlane.xlu1 %2145 }
 0x4c2   :  { %8026 = vrcp.f32 %v2146_v38  ;;  %v8019_v38 = vpop.eup %8018 }
 0x4c3   :  { %8028 = vrcp.f32 %v2164_v2  ;;  %v11078_v2 = vld [vmem:[#allocation12_spill] sm:$0xff] }
 0x4c4   :  { %v7749_v50 = vpop.permute.xlu0 %7748  ;;  %8030 = vrcp.f32 %v2149_v44  ;;  %v2288_v44 = vmul.f32 %v8013_v1, %v11078_v2 }
 0x4c5   :  { %v7751_v33 = vunpack.i.h.bf16 %v7749_v50  ;;  %v7750_v27 = vunpack.i.l.bf16 %v7749_v50  ;;  %v2167_v24 = vpop.xlane.xlu1 %2166  ;;  %v3527_v50 = vld [vmem:[%s10882_s3 + $0x8] sm:$0xff] }
 0x4c6   :  { %8032 = vrcp.f32 %v2167_v24 }
 0x4c7   :  { %v7397_v59 = vpack.c.bf16 %v7751_v33, %v7750_v27  ;;  %v8021_v33 = vpop.eup %8020 }
 0x4c8   :  { %v8023_v24 = vpop.eup %8022 }
 0x4c9   :  { %v7754_v18 = vpop.permute.xlu1 %7753  ;;  %7398 = vmatprep.subr.bf16.mxu1 %v7397_v59 }
 0x4ca   :  { %v7756_v19 = vunpack.i.h.bf16 %v7754_v18  ;;  %v7755_v48 = vunpack.i.l.bf16 %v7754_v18  ;;  %7400 = vmatpush3.bf16.msra.mxu1 %v7397_v59  ;;  %v11079_v18 = vld [vmem:[#allocation3_spill] sm:$0xff] }
 0x4cc   :  { %v9862_v9 = vpack.c.bf16 %v7756_v19, %v7755_v48  ;;  %v2289_v19 = vmul.f32 %v8015_v4, %v11079_v18  ;;  %v8025_v48 = vpop.eup %8024 }
 0x4ce   :  { %7410 = vmatprep.subr.bf16.mxu0 %v9862_v9 }
 0x4cf   :  { %7412 = vmatpush3.bf16.msra.mxu0 %v9862_v9 }
 0x4f4   :  { %v9866_v34 = vpop.f32.mrb[48].mxu0 }
 0x4f5   :  { %v9870_v15 = vpop.f32.mrb[49].mxu0 }
 0x4f6   :  { %v9868_v13 = vpop.xlane.xlu0 %2172 }
 0x4f8   :  { %v9872_v30 = vpop.f32.mrb[40].mxu1 }
 0x4f9   :  { %v9874_v7 = vpop.f32.mrb[41].mxu1 }
 0x4fa   :  { %v7759_v39 = vpop.permute.xlu0 %7758  ;;  %v2170_v32 = vpop.xlane.xlu1 %2169 }
 0x4fb   :  { %v7761_v49 = vunpack.i.h.bf16 %v7759_v39  ;;  %v7760_v31 = vunpack.i.l.bf16 %v7759_v39  ;;  %8034 = vrcp.f32 %v2170_v32  ;;  %v11080_v39 = vld [vmem:[#allocation25_spill] sm:$0xff] }
 0x4fc   :  { %v9877_v16 = vpop.f32.mrb[42].mxu1  ;;  %8036 = vrcp.f32 %v9868_v13 }
 0x4fd   :  { %v7401_v62 = vpack.c.bf16 %v7761_v49, %v7760_v31  ;;  %v9880_v57 = vpop.f32.mrb[43].mxu1  ;;  %v2295_v49 = vmul.f32 %v8017_v46, %v11080_v39  ;;  %v11081_v31 = vld [vmem:[#allocation5_spill] sm:$0xff] }
 0x4fe   :  { %v7774_v41 = vpop.permute.xlu0 %7773  ;;  %v7764_v43 = vpop.permute.xlu1 %7763  ;;  %v2290_v32 = vmul.f32 %v8019_v38, %v11081_v31 }
 0x4ff   :  { %7402 = vmatprep.subr.bf16.mxu1 %v7401_v62  ;;  %v7776_v14 = vunpack.i.h.bf16 %v7774_v41  ;;  %v7775_v28 = vunpack.i.l.bf16 %v7774_v41  ;;  %v7766_v5 = vunpack.i.h.bf16 %v7764_v43  ;;  %v7765_v54 = vunpack.i.l.bf16 %v7764_v43 }
 0x500   :  { %7404 = vmatpush3.bf16.msra.mxu1 %v7401_v62  ;;  %v9884_v45 = vpop.f32.mrb[50].mxu0  ;;  %v8027_v62 = vpop.eup %8026 }
 0x501   :  { %v7413_v25 = vpack.c.bf16 %v7766_v5, %v7765_v54  ;;  %v9887_v47 = vpop.f32.mrb[51].mxu0  ;;  %v9891_v10 = vpack.c.bf16 %v7776_v14, %v7775_v28  ;;  %v8029_v43 = vpop.eup %8028  ;;  %v3529_v14 = vld [vmem:[%s10882_s3 + $0x18] sm:$0xff]  ;;  %v2292_v1 = vmul.f32 %v8027_v62, %v9723_v56 }
 0x502   :  { %v7769_v12 = vpop.permute.xlu1 %7768  ;;  %v8031_v28 = vpop.eup %8030 }
 0x503   :  { %v7771_v53 = vunpack.i.h.bf16 %v7769_v12  ;;  %v7770_v22 = vunpack.i.l.bf16 %v7769_v12  ;;  %7414 = vmatprep.subr.bf16.mxu0 %v7413_v25  ;;  %v11083_v12 = vld [vmem:[#allocation33_spill] sm:$0xff]  ;;  %v2293_v4 = vmul.f32 %v8031_v28, %v9720_v11 }
 0x504   :  { %7416 = vmatpush3.bf16.msra.mxu0 %v7413_v25 }
 0x505   :  { %v7405_v8 = vpack.c.bf16 %v7771_v53, %v7770_v22  ;;  %7418 = vmatprep.subr.bf16.mxu0 %v9891_v10  ;;  %v2291_v53 = vmul.f32 %v8023_v24, %v11083_v12  ;;  %v8033_v22 = vpop.eup %8032 }
 0x506   :  { %v7779_v35 = vpop.permute.xlu1 %7778  ;;  %v2299_v55 = vmul.f32 %v8033_v22, %v9728_v61 }
 0x507   :  { %v7781_v26 = vunpack.i.h.bf16 %v7779_v35  ;;  %v7780_v37 = vunpack.i.l.bf16 %v7779_v35  ;;  %7406 = vmatprep.subr.bf16.mxu1 %v7405_v8  ;;  %v9895_v36 = vpop.f32.mrb[44].mxu1  ;;  %v2297_v35 = vmul.f32 %v8025_v48, %v11084_v3 }
 0x508   :  { %7408 = vmatpush3.bf16.msra.mxu1 %v7405_v8  ;;  %7420 = vmatpush3.bf16.msra.mxu0 %v9891_v10  ;;  %v9898_v6 = vpop.f32.mrb[45].mxu1 }
 0x509   :  { %v7421_v21 = vpack.c.bf16 %v7781_v26, %v7780_v37  ;;  %7449 = vmatprep.subr.bf16.mxu1 %v9862_v9  ;;  %v8035_v26 = vpop.eup %8034 }
 0x50a   :  { %v8037_v46 = vpop.eup %8036 }
 0x50b   :  { %6874 = vmatmul.mubr.msk.f32.vlgmr.msra.gmra.mrb[56].mxu1 %vm1597_vm3, %v2287_v20  ;;  %7422 = vmatprep.subr.bf16.mxu0 %v7421_v21  ;;  %v2300_v20 = vmul.f32 %v8035_v26, %v9796_v42  ;;  %v2301_v61 = vmul.f32 %v8037_v46, %v9792_v52  ;;  %v3530_v52 = vld [vmem:[%s10882_s3 + $0x20] sm:$0xff] }
 0x50c   :  { %6876 = vmatprep.mubr.msk.f32.mxu1 %vm1597_vm3, %v2288_v44  ;;  %7453 = vmatpush3.bf16.msra.mxu1 %v9862_v9  ;;  %v9909_v27 = vpop.f32.mrb[52].mxu0  ;;  %v11082_v9 = vld [vmem:[#allocation21_spill] sm:$0xff] }
 0x50d   :  { %7424 = vmatpush3.bf16.msra.mxu0 %v7421_v21  ;;  %7450 = vmatprep.subr.bf16.mxu1 %v7413_v25  ;;  %v9912_v59 = vpop.f32.mrb[53].mxu0  ;;  %v2296_v41 = vmul.f32 %v8021_v33, %v11082_v9 }
 0x50e   :  { %6927 = vmatprep.subr.mxu0 %v3527_v50 }
 0x50f   :  { %6877 = vmatmul.mubr.msk.f32.gmra.mrb[58].mxu1 %vm1597_vm3, %v2289_v19 }
 0x510   :  { %6902 = vmatmul.mubr.msk.f32.vlgmr.msra.gmra.mrb[72].mxu0 %vm1597_vm3, %v2295_v49  ;;  %6879 = vmatprep.mubr.msk.f32.mxu1 %vm1597_vm3, %v2290_v32  ;;  %v9921_v13 = vpop.f32.mrb[54].mxu0 }
 0x511   :  { %7454 = vmatpush3.bf16.msra.mxu1 %v7413_v25  ;;  %6904 = vmatprep.mubr.msk.f32.mxu0 %vm1597_vm3, %v2296_v41  ;;  %v9927_v5 = vpop.f32.mrb[46].mxu1  ;;  %v2599_v54 = vpop.f32.mrb[55].mxu0  ;;  %v2298_v25 = vmul.f32 %v8029_v43, %v9709_v51  ;;  %v3526_v51 = vld [vmem:[%s10882_s3] sm:$0xff] }
 0x512   :  { %7451 = vmatprep.subr.bf16.mxu1 %v9891_v10  ;;  %v9931_v8 = vpop.f32.mrb[47].mxu1  ;;  %6928 = vmatpush3.msra.mxu0 %v3527_v50 }
 0x513   :  { %6880 = vmatmul.mubr.msk.f32.gmra.mrb[60].mxu1 %vm1597_vm3, %v2291_v53  ;;  %6955 = vmatprep.subr.mxu0 %v3529_v14 }
 0x514   :  { %6905 = vmatmul.mubr.msk.f32.gmra.mrb[74].mxu0 %vm1597_vm3, %v2297_v35  ;;  %6882 = vmatprep.mubr.msk.f32.mxu1 %vm1597_vm3, %v2292_v1 }
 0x515   :  { %7455 = vmatpush3.bf16.msra.mxu1 %v9891_v10  ;;  %6907 = vmatprep.mubr.msk.f32.mxu0 %vm1597_vm3, %v2298_v25  ;;  %v3528_v10 = vld [vmem:[%s10882_s3 + $0x10] sm:$0xff] }
 0x516   :  { %v6791_v37 = vpop.f32.mrb[56].mxu0  ;;  %7452 = vmatprep.subr.bf16.mxu1 %v7421_v21 }
 0x517   :  { %v2875_v56 = vpop.f32.mrb[57].mxu0  ;;  %6883 = vmatmul.mubr.msk.f32.gmra.mrb[62].mxu1 %vm1597_vm3, %v2293_v4 }
 0x518   :  { %6908 = vmatmul.mubr.msk.f32.gmra.mrb[76].mxu0 %vm1597_vm3, %v2299_v55  ;;  %6910 = vmatprep.mubr.msk.f32.mxu1 %vm1597_vm3, %v2300_v20 }
 0x519   :  { %7456 = vmatpush3.bf16.msra.mxu1 %v7421_v21  ;;  %6929 = vmatprep.mubr.msk.f32.mxu0 %vm388_vm1, %v9870_v15  ;;  %v3531_v21 = vld [vmem:[%s10882_s3 + $0x28] sm:$0xff] }
 0x51a   :  { %v9952_v11 = vpop.f32.mrb[48].mxu1  ;;  %6913 = vmatprep.subr.mxu1 %v3526_v51 }
 0x51b   :  { %v3028_v42 = vpop.f32.mrb[49].mxu1 }
 0x51c   :  { %6911 = vmatmul.mubr.msk.f32.vlgmr.msra.gmra.mrb[64].mxu1 %vm1597_vm3, %v2301_v61  ;;  %6930 = vmatmul.mubr.msk.f32.vlgmr.msra.gmra.mrb[78].mxu0 %vm388_vm1, %v9866_v34  ;;  %v4678_v61 = vlaneseq }
 0x51d   :  { %6915 = vmatprep.mubr.msk.f32.mxu1 %vm388_vm1, %v9833_v63  ;;  %6932 = vmatprep.mubr.msk.f32.mxu0 %vm388_vm1, %v9887_v47 }
 0x51e   :  { %6914 = vmatpush3.msra.mxu1 %v3526_v51  ;;  %6956 = vmatpush3.msra.mxu0 %v3529_v14 }
 0x51f   :  { %6941 = vmatprep.subr.mxu1 %v3528_v10  ;;  %6983 = vmatprep.subr.mxu0 %v3531_v21 }
 0x520   :  { %6916 = vmatmul.mubr.msk.f32.vlgmr.msra.gmra.mrb[66].mxu1 %vm388_vm1, %v9831_v0  ;;  %6933 = vmatmul.mubr.msk.f32.gmra.mrb[80].mxu0 %vm388_vm1, %v9884_v45 }
 0x521   :  { %6918 = vmatprep.mubr.msk.f32.mxu1 %vm388_vm1, %v9851_v40  ;;  %6935 = vmatprep.mubr.msk.f32.mxu0 %vm388_vm1, %v9912_v59  ;;  %v6794_v63 = vpop.f32.mrb[58].mxu0 }
 0x522   :  { %v6822_v34 = vpop.f32.mrb[50].mxu1  ;;  %v2885_v15 = vpop.f32.mrb[59].mxu0  ;;  %6942 = vmatpush3.msra.mxu1 %v3528_v10 }
 0x523   :  { %v3038_v47 = vpop.f32.mrb[51].mxu1  ;;  %6969 = vmatprep.subr.mxu1 %v3530_v52 }
 0x524   :  { %6919 = vmatmul.mubr.msk.f32.gmra.mrb[68].mxu1 %vm388_vm1, %v9848_v23  ;;  %6936 = vmatmul.mubr.msk.f32.gmra.mrb[82].mxu0 %vm388_vm1, %v9909_v27 }
 0x525   :  { %6921 = vmatprep.mubr.msk.f32.mxu1 %vm388_vm1, %v9856_v17  ;;  %6938 = vmatprep.mubr.msk.f32.mxu0 %vm388_vm1, %v2599_v54  ;;  %v3532_v17 = vld [vmem:[%s10882_s3 + $0x30] sm:$0xff] }
 0x528   :  { %6922 = vmatmul.mubr.msk.f32.gmra.mrb[70].mxu1 %vm388_vm1, %v9854_v58  ;;  %6939 = vmatmul.mubr.msk.f32.gmra.mrb[84].mxu0 %vm388_vm1, %v9921_v13  ;;  %v3533_v58 = vld [vmem:[%s10882_s3 + $0x38] sm:$0xff] }
 0x529   :  { %6924 = vmatprep.mubr.msk.f32.mxu1 %vm388_vm1, %v9860_v60  ;;  %6957 = vmatprep.mubr.msk.f32.mxu0 %vm388_vm1, %v2875_v56  ;;  %v6797_v0 = vpop.f32.mrb[60].mxu0 }
 0x52a   :  { %v6825_v23 = vpop.f32.mrb[52].mxu1  ;;  %v2895_v40 = vpop.f32.mrb[61].mxu0 }
 0x52b   :  { %v3048_v45 = vpop.f32.mrb[53].mxu1 }
 0x52c   :  { %6925 = vmatmul.mubr.msk.f32.gmra.mrb[72].mxu1 %vm388_vm1, %v9858_v29  ;;  %6958 = vmatmul.mubr.msk.f32.vlgmr.msra.gmra.mrb[86].mxu0 %vm388_vm1, %v6791_v37 }
 0x52d   :  { %6943 = vmatprep.mubr.msk.f32.mxu1 %vm388_vm1, %v9874_v7  ;;  %6960 = vmatprep.mubr.msk.f32.mxu0 %vm388_vm1, %v2885_v15 }
 0x52e   :  { %6984 = vmatpush3.msra.mxu0 %v3531_v21 }
 0x52f   :  { %7011 = vmatprep.subr.mxu0 %v3533_v58 }
 0x530   :  { %6944 = vmatmul.mubr.msk.f32.vlgmr.msra.gmra.mrb[74].mxu1 %vm388_vm1, %v9872_v30  ;;  %6961 = vmatmul.mubr.msk.f32.gmra.mrb[88].mxu0 %vm388_vm1, %v6794_v63 }
 0x531   :  { %6946 = vmatprep.mubr.msk.f32.mxu1 %vm388_vm1, %v9880_v57  ;;  %6963 = vmatprep.mubr.msk.f32.mxu0 %vm388_vm1, %v2895_v40  ;;  %v10069_v40 = vshrl.u32 %v4678_v61, 7 }
 0x532   :  { %v6800_v29 = vpop.f32.mrb[62].mxu0  ;;  %6970 = vmatpush3.msra.mxu1 %v3530_v52 }
 0x533   :  { %v2905_v60 = vpop.f32.mrb[63].mxu0  ;;  %6997 = vmatprep.subr.mxu1 %v3532_v17 }
 0x534   :  { %6947 = vmatmul.mubr.msk.f32.gmra.mrb[76].mxu1 %vm388_vm1, %v9877_v16  ;;  %6964 = vmatmul.mubr.msk.f32.gmra.mrb[90].mxu0 %vm388_vm1, %v6797_v0 }
 0x535   :  { %6949 = vmatprep.mubr.msk.f32.mxu1 %vm388_vm1, %v9898_v6  ;;  %6966 = vmatprep.mubr.msk.f32.mxu0 %vm388_vm1, %v2905_v60 }
 0x536   :  { %v6828_v30 = vpop.f32.mrb[54].mxu1 }
 0x537   :  { %v3058_v7 = vpop.f32.mrb[55].mxu1 }
 0x538   :  { %6950 = vmatmul.mubr.msk.f32.gmra.mrb[78].mxu1 %vm388_vm1, %v9895_v36  ;;  %6967 = vmatmul.mubr.msk.f32.gmra.mrb[92].mxu0 %vm388_vm1, %v6800_v29 }
 0x539   :  { %6952 = vmatprep.mubr.msk.f32.mxu1 %vm388_vm1, %v9931_v8 }
 0x53c   :  { %6953 = vmatmul.mubr.msk.f32.gmra.mrb[80].mxu1 %vm388_vm1, %v9927_v5 }
 0x53d   :  { %6971 = vmatprep.mubr.msk.f32.mxu1 %vm388_vm1, %v3028_v42 }
 0x540   :  { %6972 = vmatmul.mubr.msk.f32.vlgmr.msra.gmra.mrb[82].mxu1 %vm388_vm1, %v9952_v11 }
 0x541   :  { %6974 = vmatprep.mubr.msk.f32.mxu1 %vm388_vm1, %v3038_v47  ;;  %6998 = vmatpush3.msra.mxu1 %v3532_v17 }
 0x544   :  { %6975 = vmatmul.mubr.msk.f32.gmra.mrb[84].mxu1 %vm388_vm1, %v6822_v34 }
 0x545   :  { %6977 = vmatprep.mubr.msk.f32.mxu1 %vm388_vm1, %v3048_v45 }
 0x548   :  { %6978 = vmatmul.mubr.msk.f32.gmra.mrb[86].mxu1 %vm388_vm1, %v6825_v23 }
 0x549   :  { %6980 = vmatprep.mubr.msk.f32.mxu1 %vm388_vm1, %v3058_v7 }
 0x54c   :  { %6981 = vmatmul.mubr.msk.f32.gmra.mrb[88].mxu1 %vm388_vm1, %v6828_v30 }
 0x567   :  { %v6847_v16 = vpop.f32.mrb[64].mxu0 }
 0x568   :  { %v3181_v57 = vpop.f32.mrb[65].mxu0 }
 0x569   :  { %6985 = vmatprep.mubr.msk.f32.mxu0 %vm388_vm1, %v3181_v57 }
 0x56a   :  { %6986 = vmatmul.mubr.msk.f32.vlgmr.msra.gmra.mrb[94].mxu0 %vm388_vm1, %v6847_v16 }
 0x56b   :  { %v6850_v36 = vpop.f32.mrb[66].mxu0  ;;  %7012 = vmatpush3.msra.mxu0 %v3533_v58 }
 0x56c   :  { %v3191_v6 = vpop.f32.mrb[67].mxu0 }
 0x56d   :  { %6988 = vmatprep.mubr.msk.f32.mxu0 %vm388_vm1, %v3191_v6  ;;  %v4680_v6 = vsub.s32 0, %v10069_v40 }
 0x56e   :  { %6989 = vmatmul.mubr.msk.f32.gmra.mrb[96].mxu0 %vm388_vm1, %v6850_v36 }
 0x56f   :  { %v6853_v2 = vpop.f32.mrb[68].mxu0 }
 0x570   :  { %v3201_v44 = vpop.f32.mrb[69].mxu0 }
 0x571   :  { %6991 = vmatprep.mubr.msk.f32.mxu0 %vm388_vm1, %v3201_v44  ;;  %v10081_v44 = vld [vmem:[%s10883_s7] sm:$0xff] }
 0x572   :  { %6992 = vmatmul.mubr.msk.f32.gmra.mrb[98].mxu0 %vm388_vm1, %v6853_v2 }
 0x573   :  { %v6856_v38 = vpop.f32.mrb[70].mxu0 }
 0x574   :  { %v3211_v50 = vpop.f32.mrb[71].mxu0 }
 0x575   :  { %6994 = vmatprep.mubr.msk.f32.mxu0 %vm388_vm1, %v3211_v50 }
 0x576   :  { %6995 = vmatmul.mubr.msk.f32.gmra.mrb[100].mxu0 %vm388_vm1, %v6856_v38 }
 0x5de   :  { %v6875_v33 = vpop.f32.mrb[56].mxu1 }
 0x5df   :  { %v3334_v27 = vpop.f32.mrb[57].mxu1 }
 0x5e0   :  { %6999 = vmatprep.mubr.msk.f32.mxu1 %vm388_vm1, %v3334_v27 }
 0x5e1   :  { %7000 = vmatmul.mubr.msk.f32.vlgmr.msra.gmra.mrb[90].mxu1 %vm388_vm1, %v6875_v33 }
 0x5e2   :  { %v6878_v24 = vpop.f32.mrb[58].mxu1 }
 0x5e3   :  { %v6903_v59 = vpop.f32.mrb[72].mxu0  ;;  %v3344_v18 = vpop.f32.mrb[59].mxu1 }
 0x5e4   :  { %v3487_v19 = vpop.f32.mrb[73].mxu0  ;;  %7002 = vmatprep.mubr.msk.f32.mxu1 %vm388_vm1, %v3344_v18  ;;  %v10085_v18 = vrot.slane %v10081_v44, %v4680_v6 }
 0x5e5   :  { %7013 = vmatprep.mubr.msk.f32.mxu0 %vm388_vm1, %v3487_v19  ;;  %7003 = vmatmul.mubr.msk.f32.gmra.mrb[92].mxu1 %vm388_vm1, %v6878_v24 }
 0x5e6   :  { %7014 = vmatmul.mubr.msk.f32.vlgmr.msra.gmra.mrb[102].mxu0 %vm388_vm1, %v6903_v59  ;;  %v6881_v48 = vpop.f32.mrb[60].mxu1 }
 0x5e7   :  { %v6906_v39 = vpop.f32.mrb[74].mxu0  ;;  %v3354_v49 = vpop.f32.mrb[61].mxu1 }
 0x5e8   :  { %v3497_v31 = vpop.f32.mrb[75].mxu0  ;;  %7005 = vmatprep.mubr.msk.f32.mxu1 %vm388_vm1, %v3354_v49 }
 0x5e9   :  { %7016 = vmatprep.mubr.msk.f32.mxu0 %vm388_vm1, %v3497_v31  ;;  %7006 = vmatmul.mubr.msk.f32.gmra.mrb[94].mxu1 %vm388_vm1, %v6881_v48 }
 0x5ea   :  { %7017 = vmatmul.mubr.msk.f32.gmra.mrb[104].mxu0 %vm388_vm1, %v6906_v39  ;;  %v6884_v32 = vpop.f32.mrb[62].mxu1 }
 0x5eb   :  { %v6909_v62 = vpop.f32.mrb[76].mxu0  ;;  %v3364_v9 = vpop.f32.mrb[63].mxu1 }
 0x5ec   :  { %v3507_v41 = vpop.f32.mrb[77].mxu0  ;;  %7008 = vmatprep.mubr.msk.f32.mxu1 %vm388_vm1, %v3364_v9 }
 0x5ed   :  { %7019 = vmatprep.mubr.msk.f32.mxu0 %vm388_vm1, %v3507_v41  ;;  %7009 = vmatmul.mubr.msk.f32.gmra.mrb[96].mxu1 %vm388_vm1, %v6884_v32 }
 0x5ee   :  { %7020 = vmatmul.mubr.msk.f32.gmra.mrb[106].mxu0 %vm388_vm1, %v6909_v62 }
 0x5ef   :  { %v6912_v43 = vpop.f32.mrb[64].mxu1  ;;  %v6931_v13 = vpop.f32.mrb[78].mxu0 }
 0x5f0   :  { %v3517_v14 = vpop.f32.mrb[65].mxu1  ;;  %v3753_v28 = vpop.f32.mrb[79].mxu0  ;;  %v4574_v12 = vsel %vm66_vm0, %v6931_v13, 0.0 }
 0x5f1   :  { %7022 = vmatprep.mubr.msk.f32.mxu0 %vm388_vm1, %v3517_v14  ;;  %v4567_v3 = vsel %vm66_vm0, %v3753_v28, 0.0 }
 0x5f2   :  { %7023 = vmatmul.mubr.msk.f32.gmra.mrb[108].mxu0 %vm388_vm1, %v6912_v43 }
 0x5f3   :  { %v6917_v5 = vpop.f32.mrb[66].mxu1  ;;  %v6934_v54 = vpop.f32.mrb[80].mxu0 }
 0x5f4   :  { %v4573_v53 = vsel %vm66_vm0, %v6917_v5, 0.0  ;;  %v3624_v22 = vpop.f32.mrb[67].mxu1  ;;  %v3763_v8 = vpop.f32.mrb[81].mxu0  ;;  %v4588_v4 = vsel %vm66_vm0, %v6934_v54, 0.0 }
 0x5f5   :  { %v4575_v35 = vadd.f32 %v4574_v12, %v4573_v53  ;;  %v4566_v1 = vsel %vm66_vm0, %v3624_v22, 0.0  ;;  %v4581_v46 = vsel %vm66_vm0, %v3763_v8, 0.0 }
 0x5f6   :  { %v4568_v26 = vadd.f32 %v4567_v3, %v4566_v1  ;;  %v8134_v1 = vld [vmem:[%s10880_s0 + $0x8] sm:$0xff] }
 0x5f7   :  { %v6920_v25 = vpop.f32.mrb[68].mxu1  ;;  %v6937_v37 = vpop.f32.mrb[82].mxu0 }
 0x5f8   :  { %v4587_v56 = vsel %vm66_vm0, %v6920_v25, 0.0  ;;  %v3634_v55 = vpop.f32.mrb[69].mxu1  ;;  %v3773_v20 = vpop.f32.mrb[83].mxu0  ;;  %v4602_v52 = vsel %vm66_vm0, %v6937_v37, 0.0 }
 0x5f9   :  { %v4589_v51 = vadd.f32 %v4588_v4, %v4587_v56  ;;  %v4580_v11 = vsel %vm66_vm0, %v3634_v55, 0.0  ;;  %v4595_v47 = vsel %vm66_vm0, %v3773_v20, 0.0  ;;  %v8135_v55 = vld [vmem:[%s10880_s0] sm:$0xff] }
 0x5fa   :  { %v4582_v42 = vadd.f32 %v4581_v46, %v4580_v11 }
 0x5fb   :  { %v6923_v10 = vpop.f32.mrb[70].mxu1  ;;  %v6940_v21 = vpop.f32.mrb[84].mxu0 }
 0x5fc   :  { %v4601_v63 = vsel %vm66_vm0, %v6923_v10, 0.0  ;;  %v3644_v34 = vpop.f32.mrb[71].mxu1  ;;  %v3783_v15 = vpop.f32.mrb[85].mxu0  ;;  %v4616_v29 = vsel %vm66_vm0, %v6940_v21, 0.0 }
 0x5fd   :  { %v4603_v0 = vadd.f32 %v4602_v52, %v4601_v63  ;;  %v4594_v23 = vsel %vm66_vm0, %v3644_v34, 0.0  ;;  %v4609_v16 = vsel %vm66_vm0, %v3783_v15, 0.0 }
 0x5fe   :  { %v4596_v45 = vadd.f32 %v4595_v47, %v4594_v23 }
 0x5ff   :  { %v6926_v58 = vpop.f32.mrb[72].mxu1  ;;  %v6959_v17 = vpop.f32.mrb[86].mxu0 }
 0x600   :  { %v4615_v60 = vsel %vm66_vm0, %v6926_v58, 0.0  ;;  %v3654_v30 = vpop.f32.mrb[73].mxu1  ;;  %v4011_v7 = vpop.f32.mrb[87].mxu0  ;;  %v4578_v48 = vsel %vm66_vm0, %v6959_v17, 0.0 }
 0x601   :  { %v4617_v57 = vadd.f32 %v4616_v29, %v4615_v60  ;;  %v4608_v36 = vsel %vm66_vm0, %v3654_v30, 0.0  ;;  %v4571_v49 = vsel %vm66_vm0, %v4011_v7, 0.0  ;;  %v8137_v30 = vld [vmem:[%s10880_s0 + $0x18] sm:$0xff] }
 0x602   :  { %v10076_v2 = vadd.f32 %v4609_v16, %v4608_v36 }
 0x603   :  { %v6945_v38 = vpop.f32.mrb[74].mxu1  ;;  %v6962_v50 = vpop.f32.mrb[88].mxu0 }
 0x604   :  { %v4576_v33 = vsel %vm66_vm0, %v6945_v38, 0.0  ;;  %v3882_v27 = vpop.f32.mrb[75].mxu1  ;;  %v4021_v24 = vpop.f32.mrb[89].mxu0  ;;  %v4592_v54 = vsel %vm66_vm0, %v6962_v50, 0.0 }
 0x605   :  { %v4577_v59 = vadd.f32 %v4576_v33, %v4575_v35  ;;  %v4569_v19 = vsel %vm66_vm0, %v3882_v27, 0.0  ;;  %v4585_v22 = vsel %vm66_vm0, %v4021_v24, 0.0 }
 0x606   :  { %v4570_v39 = vadd.f32 %v4569_v19, %v4568_v26 }
 0x607   :  { %v4579_v31 = vadd.f32 %v4578_v48, %v4577_v59  ;;  %v6948_v32 = vpop.f32.mrb[76].mxu1  ;;  %v6965_v62 = vpop.f32.mrb[90].mxu0  ;;  %v8138_v59 = vld [vmem:[%s10880_s0 + $0x20] sm:$0xff] }
 0x608   :  { %v4572_v9 = vadd.f32 %v4571_v49, %v4570_v39  ;;  %v4590_v41 = vsel %vm66_vm0, %v6948_v32, 0.0  ;;  %v3892_v43 = vpop.f32.mrb[77].mxu1  ;;  %v4031_v13 = vpop.f32.mrb[91].mxu0 }
 0x609   :  { %v4683_v14 = vadd.f32 %v10085_v18, %v4579_v31  ;;  %v4591_v28 = vadd.f32 %v4590_v41, %v4589_v51  ;;  %v4583_v5 = vsel %vm66_vm0, %v3892_v43, 0.0  ;;  %v4606_v51 = vsel %vm66_vm0, %v6965_v62, 0.0  ;;  %v8139_v31 = vld [vmem:[%s10880_s0 + $0x28] sm:$0xff]  ;;  %v8140_v41 = vld [vmem:[%s10880_s0 + $0x30] sm:$0xff] }
 0x60a   :  { %v4682_v12 = vadd.f32 %v10085_v18, %v4572_v9  ;;  %v4584_v53 = vadd.f32 %v4583_v5, %v4582_v42  ;;  %v4599_v63 = vsel %vm66_vm0, %v4031_v13, 0.0 }
 0x60b   :  { %v4593_v8 = vadd.f32 %v4592_v54, %v4591_v28  ;;  %v6951_v3 = vpop.f32.mrb[78].mxu1  ;;  %v6968_v35 = vpop.f32.mrb[92].mxu0  ;;  %v10099_v26 = vadd.f32 %v8134_v1, %v4683_v14  ;;  %v8141_v28 = vld [vmem:[%s10880_s0 + $0x38] sm:$0xff] }
 0x60c   :  { %v4586_v25 = vadd.f32 %v4585_v22, %v4584_v53  ;;  %v4604_v37 = vsel %vm66_vm0, %v6951_v3, 0.0  ;;  %v3902_v4 = vpop.f32.mrb[79].mxu1  ;;  %v4041_v56 = vpop.f32.mrb[93].mxu0  ;;  %v10105_v20 = vadd.f32 %v8135_v55, %v4682_v12  ;;  %v4620_v17 = vsel %vm66_vm0, %v6968_v35, 0.0 }
 0x60d   :  { %v4685_v46 = vadd.f32 %v10085_v18, %v4593_v8  ;;  %v4605_v11 = vadd.f32 %v4604_v37, %v4603_v0  ;;  %v4597_v61 = vsel %vm66_vm0, %v3902_v4, 0.0  ;;  %v4717_v21 = vsel %vm66_vm0, %v10099_v26, 0.0 }
 0x60e   :  { %v4684_v42 = vadd.f32 %v10085_v18, %v4586_v25  ;;  %v4598_v10 = vadd.f32 %v4597_v61, %v4596_v45  ;;  %v4714_v52 = vsel %vm66_vm0, %v10105_v20, 0.0  ;;  %4718 = vadd.xlane.f32.xlu1 %v4717_v21  ;;  %v8136_v45 = vld [vmem:[%s10880_s0 + $0x10] sm:$0xff]  ;;  %v4613_v50 = vsel %vm66_vm0, %v4041_v56, 0.0 }
 0x60f   :  { %v4607_v34 = vadd.f32 %v4606_v51, %v4605_v11  ;;  %4715 = vadd.xlane.f32.xlu0 %v4714_v52  ;;  %v6954_v15 = vpop.f32.mrb[80].mxu1  ;;  %v10127_v7 = vadd.f32 %v8137_v30, %v4685_v46 }
 0x610   :  { %v4600_v47 = vadd.f32 %v4599_v63, %v4598_v10  ;;  %v4618_v0 = vsel %vm66_vm0, %v6954_v15, 0.0  ;;  %v3912_v23 = vpop.f32.mrb[81].mxu1  ;;  %v10120_v58 = vadd.f32 %v8136_v45, %v4684_v42 }
 0x611   :  { %v4619_v29 = vadd.f32 %v4618_v0, %v4617_v57  ;;  %v4611_v60 = vsel %vm66_vm0, %v3912_v23, 0.0  ;;  %v4687_v16 = vadd.f32 %v10085_v18, %v4607_v34  ;;  %v4723_v48 = vsel %vm66_vm0, %v10127_v7, 0.0 }
 0x612   :  { %v4686_v36 = vadd.f32 %v10085_v18, %v4600_v47  ;;  %v4612_v6 = vadd.f32 %v4611_v60, %v10076_v2  ;;  %v4720_v38 = vsel %vm66_vm0, %v10120_v58, 0.0 }
 0x613   :  { %v4621_v57 = vadd.f32 %v4620_v17, %v4619_v29  ;;  %4721 = vadd.xlane.f32.xlu0 %v4720_v38  ;;  %v6973_v33 = vpop.f32.mrb[82].mxu1  ;;  %v10149_v32 = vadd.f32 %v8139_v31, %v4687_v16 }
 0x614   :  { %v4614_v27 = vadd.f32 %v4613_v50, %v4612_v6  ;;  %v4140_v24 = vpop.f32.mrb[83].mxu1  ;;  %v10138_v19 = vadd.f32 %v8138_v59, %v4686_v36  ;;  %v4629_v35 = vsel %vm66_vm0, %v6973_v33, 0.0 }
 0x615   :  { %v4689_v2 = vadd.f32 %v10085_v18, %v4621_v57  ;;  %v4729_v13 = vsel %vm66_vm0, %v10149_v32, 0.0  ;;  %v4622_v37 = vsel %vm66_vm0, %v4140_v24, 0.0 }
 0x616   :  { %v4688_v39 = vadd.f32 %v10085_v18, %v4614_v27  ;;  %v4726_v49 = vsel %vm66_vm0, %v10138_v19, 0.0 }
 0x617   :  { %4724 = vadd.xlane.f32.xlu0 %v4723_v48  ;;  %4727 = vadd.xlane.f32.xlu1 %v4726_v49  ;;  %v6976_v62 = vpop.f32.mrb[84].mxu1  ;;  %v10163_v5 = vadd.f32 %v8141_v28, %v4689_v2 }
 0x618   :  { %v4150_v9 = vpop.f32.mrb[85].mxu1  ;;  %v10154_v43 = vadd.f32 %v8140_v41, %v4688_v39  ;;  %v4643_v51 = vsel %vm66_vm0, %v6976_v62, 0.0 }
 0x619   :  { %v4735_v53 = vsel %vm66_vm0, %v10163_v5, 0.0  ;;  %v4636_v42 = vsel %vm66_vm0, %v4150_v9, 0.0 }
 0x61a   :  { %v4732_v14 = vsel %vm66_vm0, %v10154_v43, 0.0 }
 0x61b   :  { %4730 = vadd.xlane.f32.xlu0 %v4729_v13  ;;  %4733 = vadd.xlane.f32.xlu1 %v4732_v14  ;;  %v6979_v54 = vpop.f32.mrb[86].mxu1 }
 0x61c   :  { %v4160_v12 = vpop.f32.mrb[87].mxu1  ;;  %v4657_v34 = vsel %vm66_vm0, %v6979_v54, 0.0 }
 0x61d   :  { %v4650_v0 = vsel %vm66_vm0, %v4160_v12, 0.0 }
 0x61f   :  { %4736 = vadd.xlane.f32.xlu0 %v4735_v53  ;;  %v6982_v22 = vpop.f32.mrb[88].mxu1 }
 0x620   :  { %v4170_v8 = vpop.f32.mrb[89].mxu1  ;;  %v4671_v60 = vsel %vm66_vm0, %v6982_v22, 0.0 }
 0x621   :  { %v4664_v36 = vsel %vm66_vm0, %v4170_v8, 0.0 }
 0x63d   :  { %v6987_v3 = vpop.f32.mrb[94].mxu0 }
 0x63e   :  { %v4630_v1 = vsel %vm66_vm0, %v6987_v3, 0.0  ;;  %v4269_v25 = vpop.f32.mrb[95].mxu0 }
 0x63f   :  { %v4631_v4 = vadd.f32 %v4630_v1, %v4629_v35  ;;  %v4623_v56 = vsel %vm66_vm0, %v4269_v25, 0.0 }
 0x640   :  { %v4624_v55 = vadd.f32 %v4623_v56, %v4622_v37 }
 0x641   :  { %v6990_v46 = vpop.f32.mrb[96].mxu0 }
 0x642   :  { %v4644_v11 = vsel %vm66_vm0, %v6990_v46, 0.0  ;;  %v4279_v61 = vpop.f32.mrb[97].mxu0 }
 0x643   :  { %v4645_v10 = vadd.f32 %v4644_v11, %v4643_v51  ;;  %v4637_v21 = vsel %vm66_vm0, %v4279_v61, 0.0 }
 0x644   :  { %v4638_v52 = vadd.f32 %v4637_v21, %v4636_v42  ;;  %v8142_v42 = vld [vmem:[%s10880_s0 + $0x48] sm:$0xff] }
 0x645   :  { %v6993_v63 = vpop.f32.mrb[98].mxu0 }
 0x646   :  { %v4658_v15 = vsel %vm66_vm0, %v6993_v63, 0.0  ;;  %v4289_v47 = vpop.f32.mrb[99].mxu0  ;;  %v8143_v63 = vld [vmem:[%s10880_s0 + $0x40] sm:$0xff] }
 0x647   :  { %v4659_v23 = vadd.f32 %v4658_v15, %v4657_v34  ;;  %v4651_v45 = vsel %vm66_vm0, %v4289_v47, 0.0 }
 0x648   :  { %v4652_v17 = vadd.f32 %v4651_v45, %v4650_v0 }
 0x649   :  { %v6996_v29 = vpop.f32.mrb[100].mxu0 }
 0x64a   :  { %v4672_v30 = vsel %vm66_vm0, %v6996_v29, 0.0  ;;  %v4299_v16 = vpop.f32.mrb[101].mxu0 }
 0x64b   :  { %v4673_v6 = vadd.f32 %v4672_v30, %v4671_v60  ;;  %v4665_v38 = vsel %vm66_vm0, %v4299_v16, 0.0 }
 0x64c   :  { %v4666_v50 = vadd.f32 %v4665_v38, %v4664_v36 }
 0x69c   :  { %v10184_v24 = vpop.xlane.xlu0 %4715 }
 0x6a0   :  { %v10191_v53 = vpop.xlane.xlu0 %4721 }
 0x6a4   :  { %v4725_v38 = vpop.xlane.xlu0 %4724 }
 0x6b4   :  { %v7001_v57 = vpop.f32.mrb[90].mxu1 }
 0x6b5   :  { %v4632_v33 = vsel %vm66_vm0, %v7001_v57, 0.0  ;;  %v4398_v27 = vpop.f32.mrb[91].mxu1 }
 0x6b6   :  { %v4633_v59 = vadd.f32 %v4632_v33, %v4631_v4  ;;  %v4625_v48 = vsel %vm66_vm0, %v4398_v27, 0.0 }
 0x6b7   :  { %v4626_v2 = vadd.f32 %v4625_v48, %v4624_v55 }
 0x6b8   :  { %v7004_v39 = vpop.f32.mrb[92].mxu1 }
 0x6b9   :  { %v4646_v49 = vsel %vm66_vm0, %v7004_v39, 0.0  ;;  %v7015_v31 = vpop.f32.mrb[102].mxu0  ;;  %v4408_v62 = vpop.f32.mrb[93].mxu1  ;;  %v8145_v39 = vld [vmem:[%s10880_s0 + $0x50] sm:$0xff] }
 0x6ba   :  { %v4647_v9 = vadd.f32 %v4646_v49, %v4645_v10  ;;  %v4634_v41 = vsel %vm66_vm0, %v7015_v31, 0.0  ;;  %v4639_v13 = vsel %vm66_vm0, %v4408_v62, 0.0  ;;  %v4527_v14 = vpop.f32.mrb[103].mxu0 }
 0x6bb   :  { %v4635_v28 = vadd.f32 %v4634_v41, %v4633_v59  ;;  %v4640_v54 = vadd.f32 %v4639_v13, %v4638_v52  ;;  %v4627_v12 = vsel %vm66_vm0, %v4527_v14, 0.0 }
 0x6bc   :  { %v4628_v22 = vadd.f32 %v4627_v12, %v4626_v2  ;;  %v7007_v8 = vpop.f32.mrb[94].mxu1 }
 0x6bd   :  { %v4691_v3 = vadd.f32 %v10085_v18, %v4635_v28  ;;  %v4660_v35 = vsel %vm66_vm0, %v7007_v8, 0.0  ;;  %v7018_v1 = vpop.f32.mrb[104].mxu0  ;;  %v4418_v25 = vpop.f32.mrb[95].mxu1  ;;  %v8146_v8 = vld [vmem:[%s10880_s0 + $0x68] sm:$0xff] }
 0x6be   :  { %v4690_v37 = vadd.f32 %v10085_v18, %v4628_v22  ;;  %v4661_v4 = vadd.f32 %v4660_v35, %v4659_v23  ;;  %v4648_v56 = vsel %vm66_vm0, %v7018_v1, 0.0  ;;  %v4653_v55 = vsel %vm66_vm0, %v4418_v25, 0.0  ;;  %v4537_v46 = vpop.f32.mrb[105].mxu0  ;;  %v8147_v1 = vld [vmem:[%s10880_s0 + $0x60] sm:$0xff] }
 0x6bf   :  { %v4649_v51 = vadd.f32 %v4648_v56, %v4647_v9  ;;  %v4654_v11 = vadd.f32 %v4653_v55, %v4652_v17  ;;  %v4641_v61 = vsel %vm66_vm0, %v4537_v46, 0.0  ;;  %v10202_v10 = vadd.f32 %v8142_v42, %v4691_v3  ;;  %v4719_v17 = vpop.xlane.xlu1 %4718 }
 0x6c0   :  { %v4642_v21 = vadd.f32 %v4641_v61, %v4640_v54  ;;  %v7010_v52 = vpop.f32.mrb[96].mxu1  ;;  %v10207_v34 = vadd.f32 %v8143_v63, %v4690_v37  ;;  %v4764_v31 = vmul.f32 0.03125, %v4719_v17  ;;  %v4763_v54 = vmul.f32 0.03125, %v10184_v24  ;;  %v4731_v37 = vpop.xlane.xlu0 %4730 }
 0x6c1   :  { %v4693_v15 = vadd.f32 %v10085_v18, %v4649_v51  ;;  %v4674_v47 = vsel %vm66_vm0, %v7010_v52, 0.0  ;;  %v7021_v0 = vpop.f32.mrb[106].mxu0  ;;  %v4741_v23 = vsel %vm66_vm0, %v10202_v10, 0.0  ;;  %v4428_v45 = vpop.f32.mrb[97].mxu1  ;;  %v4766_v55 = vmul.f32 0.03125, %v4725_v38 }
 0x6c2   :  { %v4692_v29 = vadd.f32 %v10085_v18, %v4642_v21  ;;  %v4675_v60 = vadd.f32 %v4674_v47, %v4673_v6  ;;  %v4662_v30 = vsel %vm66_vm0, %v7021_v0, 0.0  ;;  %v4547_v16 = vpop.f32.mrb[107].mxu0  ;;  %4742 = vadd.xlane.f32.xlu0 %v4741_v23  ;;  %v4667_v36 = vsel %vm66_vm0, %v4428_v45, 0.0  ;;  %v8144_v6 = vld [vmem:[%s10880_s0 + $0x58] sm:$0xff] }
 0x6c3   :  { %v4663_v57 = vadd.f32 %v4662_v30, %v4661_v4  ;;  %v4655_v33 = vsel %vm66_vm0, %v4547_v16, 0.0  ;;  %v4668_v27 = vadd.f32 %v4667_v36, %v4666_v50  ;;  %v4738_v59 = vsel %vm66_vm0, %v10207_v34, 0.0  ;;  %v4728_v46 = vpop.xlane.xlu1 %4727  ;;  %v8148_v21 = vld [vmem:[%s10880_s0 + $0x78] sm:$0xff] }
 0x6c4   :  { %v4656_v48 = vadd.f32 %v4655_v33, %v4654_v11  ;;  %4739 = vadd.xlane.f32.xlu1 %v4738_v59  ;;  %v10222_v2 = vadd.f32 %v8144_v6, %v4693_v15  ;;  %v10227_v49 = vadd.f32 %v8145_v39, %v4692_v29  ;;  %v10252_v56 = vsub.f32 %v10099_v26, %v4764_v31  ;;  %v4737_v45 = vpop.xlane.xlu0 %4736 }
 0x6c5   :  { %v4695_v50 = vadd.f32 %v10085_v18, %v4663_v57  ;;  %v7024_v62 = vpop.f32.mrb[108].mxu0  ;;  %v10258_v61 = vsub.f32 %v10105_v20, %v4763_v54  ;;  %v4765_v42 = vmul.f32 0.03125, %v10191_v53  ;;  %v10274_v63 = vsub.f32 %v10127_v7, %v4766_v55 }
 0x6c6   :  { %v4694_v9 = vadd.f32 %v10085_v18, %v4656_v48  ;;  %v4676_v41 = vsel %vm66_vm0, %v7024_v62, 0.0  ;;  %v4557_v13 = vpop.f32.mrb[109].mxu0  ;;  %v4747_v14 = vsel %vm66_vm0, %v10222_v2, 0.0  ;;  %v4744_v28 = vsel %vm66_vm0, %v10227_v49, 0.0  ;;  %v4963_v62 = vld [vmem:[%s10884_s4] sm:$0xff] }
 0x6c7   :  { %v4677_v12 = vadd.f32 %v4676_v41, %v4675_v60  ;;  %v4669_v22 = vsel %vm66_vm0, %v4557_v13, 0.0  ;;  %4748 = vadd.xlane.f32.xlu0 %v4747_v14  ;;  %v10241_v3 = vadd.f32 %v8146_v8, %v4695_v50  ;;  %v4768_v53 = vmul.f32 0.03125, %v4731_v37  ;;  %v4734_v29 = vpop.xlane.xlu1 %4733  ;;  %v4965_v13 = vld [vmem:[%s10884_s4 + $0x10] sm:$0xff]  ;;  %v4966_v14 = vld [vmem:[%s10884_s4 + $0x18] sm:$0xff] }
 0x6c8   :  { %v4670_v35 = vadd.f32 %v4669_v22, %v4668_v27  ;;  %4745 = vadd.xlane.f32.xlu1 %v4744_v28  ;;  %v10246_v25 = vadd.f32 %v8147_v1, %v4694_v9  ;;  %v4796_v47 = vmul.f32 %v10252_v56, %v10252_v56  ;;  %v10281_v0 = vsub.f32 %v10120_v58, %v4765_v42  ;;  %v4964_v9 = vld [vmem:[%s10884_s4 + $0x8] sm:$0xff] }
 0x6c9   :  { %v4697_v24 = vadd.f32 %v10085_v18, %v4677_v12  ;;  %v4753_v4 = vsel %vm66_vm0, %v10241_v3, 0.0  ;;  %v4767_v23 = vmul.f32 0.03125, %v4728_v46  ;;  %v4795_v17 = vmul.f32 %v10258_v61, %v10258_v61 }
 0x6ca   :  { %v4696_v51 = vadd.f32 %v10085_v18, %v4670_v35  ;;  %v4750_v11 = vsel %vm66_vm0, %v10246_v25, 0.0  ;;  %v8149_v18 = vld [vmem:[%s10880_s0 + $0x70] sm:$0xff]  ;;  %v10286_v7 = vsub.f32 %v10149_v32, %v4768_v53  ;;  %v4770_v60 = vmul.f32 0.03125, %v4737_v45 }
 0x6cb   :  { %4754 = vadd.xlane.f32.xlu0 %v4753_v4  ;;  %v10264_v52 = vadd.f32 %v8148_v21, %v4697_v24  ;;  %v4814_v30 = vsel %vm66_vm0, %v4796_v47, 0.0  ;;  %v4798_v16 = vmul.f32 %v10274_v63, %v10274_v63  ;;  %v10292_v58 = vsub.f32 %v10138_v19, %v4767_v23 }
 0x6cc   :  { %4751 = vadd.xlane.f32.xlu1 %v4750_v11  ;;  %v10269_v26 = vadd.f32 %v8149_v18, %v4696_v51  ;;  %v4769_v36 = vmul.f32 0.03125, %v4734_v29  ;;  %v4811_v38 = vsel %vm66_vm0, %v4795_v17, 0.0  ;;  %v4797_v57 = vmul.f32 %v10281_v0, %v10281_v0 }
 0x6cd   :  { %v4759_v20 = vsel %vm66_vm0, %v10264_v52, 0.0  ;;  %v10298_v32 = vsub.f32 %v10163_v5, %v4770_v60  ;;  %v4820_v33 = vsel %vm66_vm0, %v4798_v16, 0.0  ;;  %v4800_v27 = vmul.f32 %v10286_v7, %v10286_v7 }
 0x6ce   :  { %v4756_v15 = vsel %vm66_vm0, %v10269_v26, 0.0  ;;  %v10304_v59 = vsub.f32 %v10154_v43, %v4769_v36  ;;  %v4817_v19 = vsel %vm66_vm0, %v4797_v57, 0.0  ;;  %v4799_v48 = vmul.f32 %v10292_v58, %v10292_v58 }
 0x6cf   :  { %4760 = vadd.xlane.f32.xlu0 %v4759_v20  ;;  %v4826_v6 = vsel %vm66_vm0, %v4800_v27, 0.0  ;;  %v4802_v5 = vmul.f32 %v10298_v32, %v10298_v32  ;;  %v7425_v41 = vpack.c.bf16 %v4964_v9, %v4963_v62  ;;  %v7429_v28 = vpack.c.bf16 %v4966_v14, %v4965_v13 }
 0x6d0   :  { %4757 = vadd.xlane.f32.xlu1 %v4756_v15  ;;  %v4823_v39 = vsel %vm66_vm0, %v4799_v48, 0.0  ;;  %v4801_v31 = vmul.f32 %v10304_v59, %v10304_v59 }
 0x6d1   :  { %v4832_v43 = vsel %vm66_vm0, %v4802_v5, 0.0  ;;  %7426 = vmatprep.subr.bf16.mxu1 %v7425_v41 }
 0x6d2   :  { %v4829_v50 = vsel %vm66_vm0, %v4801_v31, 0.0  ;;  %7428 = vmatpush3.bf16.msra.mxu1 %v7425_v41 }
 0x6d3   :  { %4815 = vadd.xlane.f32.xlu0 %v4814_v30  ;;  %7430 = vmatprep.subr.bf16.mxu1 %v7429_v28 }
 0x6d4   :  { %4812 = vadd.xlane.f32.xlu1 %v4811_v38 }
 0x6d6   :  { %7432 = vmatpush3.bf16.msra.mxu1 %v7429_v28 }
 0x6d7   :  { %4821 = vadd.xlane.f32.xlu0 %v4820_v33 }
 0x6d8   :  { %4818 = vadd.xlane.f32.xlu1 %v4817_v19 }
 0x6db   :  { %4827 = vadd.xlane.f32.xlu0 %v4826_v6 }
 0x6dc   :  { %4824 = vadd.xlane.f32.xlu1 %v4823_v39 }
 0x6df   :  { %4833 = vadd.xlane.f32.xlu0 %v4832_v43 }
 0x6e0   :  { %4830 = vadd.xlane.f32.xlu1 %v4829_v50 }
 0x74f   :  { %v4743_v54 = vpop.xlane.xlu0 %4742 }
 0x750   :  { %v4772_v12 = vmul.f32 0.03125, %v4743_v54 }
 0x751   :  { %v4740_v22 = vpop.xlane.xlu1 %4739 }
 0x752   :  { %v10330_v8 = vsub.f32 %v10202_v10, %v4772_v12  ;;  %v4771_v35 = vmul.f32 0.03125, %v4740_v22  ;;  %v4925_v12 = vsub.s32 2, %v10069_v40 }
 0x754   :  { %v10333_v1 = vsub.f32 %v10207_v34, %v4771_v35  ;;  %v4749_v37 = vpop.xlane.xlu0 %4748  ;;  %v4804_v24 = vmul.f32 %v10330_v8, %v10330_v8 }
 0x755   :  { %v4774_v4 = vmul.f32 0.03125, %v4749_v37  ;;  %v4746_v55 = vpop.xlane.xlu1 %4745 }
 0x756   :  { %v4773_v46 = vmul.f32 0.03125, %v4746_v55  ;;  %v4838_v51 = vsel %vm66_vm0, %v4804_v24, 0.0  ;;  %v4803_v11 = vmul.f32 %v10333_v1, %v10333_v1 }
 0x757   :  { %v10341_v42 = vsub.f32 %v10222_v2, %v4774_v4  ;;  %4839 = vadd.xlane.f32.xlu0 %v4838_v51  ;;  %v4945_v4 = vsub.s32 3, %v10069_v40  ;;  %v10380_v51 = vrot.slane %v10081_v44, %v4925_v12  ;;  %v5254_v12 = vld [vmem:[%s10885_s6 + $0x38] sm:$0xff] }
 0x758   :  { %v10344_v10 = vsub.f32 %v10227_v49, %v4773_v46  ;;  %v4755_v34 = vpop.xlane.xlu0 %4754  ;;  %v4835_v21 = vsel %vm66_vm0, %v4803_v11, 0.0 }
 0x759   :  { %v4776_v18 = vmul.f32 0.03125, %v4755_v34  ;;  %v4752_v20 = vpop.xlane.xlu1 %4751  ;;  %4836 = vadd.xlane.f32.xlu1 %v4835_v21  ;;  %v4806_v53 = vmul.f32 %v10341_v42, %v10341_v42 }
 0x75a   :  { %v4775_v15 = vmul.f32 0.03125, %v4752_v20  ;;  %v4805_v47 = vmul.f32 %v10344_v10, %v10344_v10 }
 0x75b   :  { %v10352_v2 = vsub.f32 %v10241_v3, %v4776_v18  ;;  %v4844_v23 = vsel %vm66_vm0, %v4806_v53, 0.0 }
 0x75c   :  { %v10356_v49 = vsub.f32 %v10246_v25, %v4775_v15  ;;  %4845 = vadd.xlane.f32.xlu0 %v4844_v23  ;;  %v4761_v45 = vpop.xlane.xlu0 %4760  ;;  %v4841_v17 = vsel %vm66_vm0, %v4805_v47, 0.0  ;;  %v10384_v15 = vrot.slane %v10081_v44, %v4945_v4 }
 0x75d   :  { %v4778_v29 = vmul.f32 0.03125, %v4761_v45  ;;  %4842 = vadd.xlane.f32.xlu1 %v4841_v17  ;;  %v4758_v60 = vpop.xlane.xlu1 %4757  ;;  %v4808_v30 = vmul.f32 %v10352_v2, %v10352_v2 }
 0x75e   :  { %v4777_v16 = vmul.f32 0.03125, %v4758_v60  ;;  %v4807_v3 = vmul.f32 %v10356_v49, %v10356_v49 }
 0x75f   :  { %v10364_v36 = vsub.f32 %v10264_v52, %v4778_v29  ;;  %v4850_v25 = vsel %vm66_vm0, %v4808_v30, 0.0 }
 0x760   :  { %v10368_v38 = vsub.f32 %v10269_v26, %v4777_v16  ;;  %4851 = vadd.xlane.f32.xlu0 %v4850_v25  ;;  %v4816_v57 = vpop.xlane.xlu0 %4815  ;;  %v4847_v33 = vsel %vm66_vm0, %v4807_v3, 0.0 }
 0x761   :  { %v4860_v27 = vmul.f32 0.03125, %v4816_v57  ;;  %4848 = vadd.xlane.f32.xlu1 %v4847_v33  ;;  %v4813_v19 = vpop.xlane.xlu1 %4812  ;;  %v4810_v48 = vmul.f32 %v10364_v36, %v10364_v36 }
 0x762   :  { %v4859_v6 = vmul.f32 0.03125, %v4813_v19  ;;  %v4809_v52 = vmul.f32 %v10368_v38, %v10368_v38 }
 0x763   :  { %v4876_v5 = vadd.f32 1e-05, %v4860_v27  ;;  %v4856_v39 = vsel %vm66_vm0, %v4810_v48, 0.0 }
 0x764   :  { %v4875_v31 = vadd.f32 1e-05, %v4859_v6  ;;  %4857 = vadd.xlane.f32.xlu0 %v4856_v39  ;;  %v4822_v26 = vpop.xlane.xlu0 %4821  ;;  %v4853_v43 = vsel %vm66_vm0, %v4809_v52, 0.0 }
 0x765   :  { %8038 = vrsqrt.f32 %v4876_v5  ;;  %v4862_v50 = vmul.f32 0.03125, %v4822_v26  ;;  %4854 = vadd.xlane.f32.xlu1 %v4853_v43  ;;  %v4819_v62 = vpop.xlane.xlu1 %4818  ;;  %v5248_v43 = vld [vmem:[%s10885_s6 + $0x8] sm:$0xff] }
 0x766   :  { %8040 = vrsqrt.f32 %v4875_v31  ;;  %v4861_v9 = vmul.f32 0.03125, %v4819_v62  ;;  %v5249_v62 = vld [vmem:[%s10885_s6 + $0x10] sm:$0xff] }
 0x767   :  { %v4878_v41 = vadd.f32 1e-05, %v4862_v50 }
 0x768   :  { %v4877_v13 = vadd.f32 1e-05, %v4861_v9  ;;  %v4828_v14 = vpop.xlane.xlu0 %4827  ;;  %v5250_v9 = vld [vmem:[%s10885_s6 + $0x18] sm:$0xff] }
 0x769   :  { %8042 = vrsqrt.f32 %v4878_v41  ;;  %v4864_v28 = vmul.f32 0.03125, %v4828_v14  ;;  %v4825_v54 = vpop.xlane.xlu1 %4824  ;;  %v7437_v41 = vpack.c.bf16 %v5250_v9, %v5249_v62  ;;  %v5252_v14 = vld [vmem:[%s10885_s6 + $0x28] sm:$0xff] }
 0x76a   :  { %8044 = vrsqrt.f32 %v4877_v13  ;;  %v4863_v22 = vmul.f32 0.03125, %v4825_v54  ;;  %v5251_v13 = vld [vmem:[%s10885_s6 + $0x20] sm:$0xff]  ;;  %v5253_v54 = vld [vmem:[%s10885_s6 + $0x30] sm:$0xff] }
 0x76b   :  { %v4880_v35 = vadd.f32 1e-05, %v4864_v28  ;;  %v7441_v28 = vpack.c.bf16 %v5252_v14, %v5251_v13 }
 0x76c   :  { %v4879_v37 = vadd.f32 1e-05, %v4863_v22  ;;  %v4834_v24 = vpop.xlane.xlu0 %4833  ;;  %v7445_v22 = vpack.c.bf16 %v5254_v12, %v5253_v54 }
 0x76d   :  { %8046 = vrsqrt.f32 %v4880_v35  ;;  %v4866_v55 = vmul.f32 0.03125, %v4834_v24  ;;  %v4831_v46 = vpop.xlane.xlu1 %4830 }
 0x76e   :  { %8048 = vrsqrt.f32 %v4879_v37  ;;  %v4865_v11 = vmul.f32 0.03125, %v4831_v46 }
 0x76f   :  { %v8039_v34 = vpop.eup %8038  ;;  %v4882_v21 = vadd.f32 1e-05, %v4866_v55 }
 0x770   :  { %v8041_v18 = vpop.eup %8040  ;;  %v4908_v20 = vmul.f32 %v8039_v34, %v10252_v56  ;;  %v4881_v53 = vadd.f32 1e-05, %v4865_v11 }
 0x771   :  { %8050 = vrsqrt.f32 %v4882_v21  ;;  %v4907_v47 = vmul.f32 %v8041_v18, %v10258_v61 }
 0x772   :  { %v4928_v23 = vmul.f32 %v10380_v51, %v4908_v20  ;;  %8052 = vrsqrt.f32 %v4881_v53 }
 0x773   :  { %v8043_v45 = vpop.eup %8042  ;;  %v4927_v17 = vmul.f32 %v10380_v51, %v4907_v47 }
 0x774   :  { %v8045_v29 = vpop.eup %8044  ;;  %v4910_v60 = vmul.f32 %v8043_v45, %v10274_v63  ;;  %v10395_v44 = vadd.f32 %v10384_v15, %v4928_v23 }
 0x775   :  { %v10391_v30 = vadd.f32 %v10384_v15, %v4927_v17  ;;  %v4909_v56 = vmul.f32 %v8045_v29, %v10281_v0 }
 0x776   :  { %v4930_v16 = vmul.f32 %v10380_v51, %v4910_v60 }
 0x777   :  { %v8047_v61 = vpop.eup %8046  ;;  %7033 = vmatprep.mubr.msk.f32.mxu1 %vm66_vm0, %v10391_v30  ;;  %v4929_v3 = vmul.f32 %v10380_v51, %v4909_v56 }
 0x778   :  { %v8049_v25 = vpop.eup %8048  ;;  %7034 = vmatmul.mubr.msk.f32.vlgmr.msra.gmra.mrb[98].mxu1 %vm66_vm0, %v10395_v44  ;;  %v4912_v63 = vmul.f32 %v8047_v61, %v10286_v7  ;;  %v10409_v33 = vadd.f32 %v10384_v15, %v4930_v16 }
 0x779   :  { %v10405_v57 = vadd.f32 %v10384_v15, %v4929_v3  ;;  %v4911_v0 = vmul.f32 %v8049_v25, %v10292_v58 }
 0x77a   :  { %v4932_v27 = vmul.f32 %v10380_v51, %v4912_v63 }
 0x77b   :  { %v8051_v19 = vpop.eup %8050  ;;  %7036 = vmatprep.mubr.msk.f32.mxu1 %vm66_vm0, %v10405_v57  ;;  %v4931_v48 = vmul.f32 %v10380_v51, %v4911_v0 }
 0x77c   :  { %v8053_v6 = vpop.eup %8052  ;;  %7037 = vmatmul.mubr.msk.f32.gmra.mrb[100].mxu1 %vm66_vm0, %v10409_v33  ;;  %v4914_v7 = vmul.f32 %v8051_v19, %v10298_v32  ;;  %v10423_v5 = vadd.f32 %v10384_v15, %v4932_v27 }
 0x77d   :  { %v10419_v52 = vadd.f32 %v10384_v15, %v4931_v48  ;;  %v4913_v58 = vmul.f32 %v8053_v6, %v10304_v59  ;;  %v5247_v59 = vld [vmem:[%s10885_s6] sm:$0xff] }
 0x77e   :  { %v4934_v39 = vmul.f32 %v10380_v51, %v4914_v7  ;;  %v7433_v50 = vpack.c.bf16 %v5248_v43, %v5247_v59 }
 0x77f   :  { %7039 = vmatprep.mubr.msk.f32.mxu1 %vm66_vm0, %v10419_v52  ;;  %v4933_v31 = vmul.f32 %v10380_v51, %v4913_v58 }
 0x780   :  { %7040 = vmatmul.mubr.msk.f32.gmra.mrb[102].mxu1 %vm66_vm0, %v10423_v5  ;;  %v10435_v26 = vadd.f32 %v10384_v15, %v4934_v39  ;;  %7434 = vmatprep.subr.bf16.mxu0 %v7433_v50 }
 0x781   :  { %v10432_v32 = vadd.f32 %v10384_v15, %v4933_v31  ;;  %7436 = vmatpush3.bf16.msra.mxu0 %v7433_v50 }
 0x782   :  { %7438 = vmatprep.subr.bf16.mxu0 %v7437_v41 }
 0x783   :  { %7042 = vmatprep.mubr.msk.f32.mxu1 %vm66_vm0, %v10432_v32 }
 0x784   :  { %7043 = vmatmul.mubr.msk.f32.gmra.mrb[104].mxu1 %vm66_vm0, %v10435_v26 }
 0x785   :  { %7440 = vmatpush3.bf16.msra.mxu0 %v7437_v41 }
 0x786   :  { %7442 = vmatprep.subr.bf16.mxu0 %v7441_v28 }
 0x789   :  { %7444 = vmatpush3.bf16.msra.mxu0 %v7441_v28 }
 0x78a   :  { %7446 = vmatprep.subr.bf16.mxu0 %v7445_v22 }
 0x78d   :  { %7448 = vmatpush3.bf16.msra.mxu0 %v7445_v22 }
 0x7e4   :  { %v4840_v35 = vpop.xlane.xlu0 %4839 }
 0x7e5   :  { %v4868_v37 = vmul.f32 0.03125, %v4840_v35 }
 0x7e6   :  { %v4837_v24 = vpop.xlane.xlu1 %4836 }
 0x7e7   :  { %v4884_v4 = vadd.f32 1e-05, %v4868_v37  ;;  %v4867_v55 = vmul.f32 0.03125, %v4837_v24 }
 0x7e9   :  { %8054 = vrsqrt.f32 %v4884_v4  ;;  %v4883_v46 = vadd.f32 1e-05, %v4867_v55  ;;  %v4846_v11 = vpop.xlane.xlu0 %4845 }
 0x7ea   :  { %v4870_v34 = vmul.f32 0.03125, %v4846_v11  ;;  %v4843_v21 = vpop.xlane.xlu1 %4842 }
 0x7eb   :  { %8056 = vrsqrt.f32 %v4883_v46  ;;  %v4869_v18 = vmul.f32 0.03125, %v4843_v21 }
 0x7ec   :  { %v4886_v20 = vadd.f32 1e-05, %v4870_v34 }
 0x7ed   :  { %v4885_v53 = vadd.f32 1e-05, %v4869_v18  ;;  %v4852_v47 = vpop.xlane.xlu0 %4851 }
 0x7ee   :  { %8058 = vrsqrt.f32 %v4886_v20  ;;  %v4872_v23 = vmul.f32 0.03125, %v4852_v47  ;;  %v4849_v45 = vpop.xlane.xlu1 %4848 }
 0x7ef   :  { %8060 = vrsqrt.f32 %v4885_v53  ;;  %v4871_v17 = vmul.f32 0.03125, %v4849_v45 }
 0x7f0   :  { %v4888_v29 = vadd.f32 1e-05, %v4872_v23 }
 0x7f1   :  { %v4887_v60 = vadd.f32 1e-05, %v4871_v17  ;;  %v4858_v56 = vpop.xlane.xlu0 %4857 }
 0x7f2   :  { %8062 = vrsqrt.f32 %v4888_v29  ;;  %v4874_v16 = vmul.f32 0.03125, %v4858_v56  ;;  %v4855_v61 = vpop.xlane.xlu1 %4854 }
 0x7f3   :  { %v8055_v3 = vpop.eup %8054  ;;  %8064 = vrsqrt.f32 %v4887_v60  ;;  %v4873_v25 = vmul.f32 0.03125, %v4855_v61 }
 0x7f4   :  { %v4890_v63 = vadd.f32 1e-05, %v4874_v16  ;;  %v4916_v0 = vmul.f32 %v8055_v3, %v10330_v8 }
 0x7f5   :  { %v8057_v27 = vpop.eup %8056  ;;  %v4889_v19 = vadd.f32 1e-05, %v4873_v25 }
 0x7f6   :  { %8066 = vrsqrt.f32 %v4890_v63  ;;  %v4915_v48 = vmul.f32 %v8057_v27, %v10333_v1  ;;  %v4936_v6 = vmul.f32 %v10380_v51, %v4916_v0 }
 0x7f7   :  { %8068 = vrsqrt.f32 %v4889_v19 }
 0x7f8   :  { %v8059_v7 = vpop.eup %8058  ;;  %v4935_v58 = vmul.f32 %v10380_v51, %v4915_v48  ;;  %v10475_v8 = vadd.f32 %v10384_v15, %v4936_v6 }
 0x7f9   :  { %v8061_v39 = vpop.eup %8060  ;;  %v4918_v31 = vmul.f32 %v8059_v7, %v10341_v42 }
 0x7fa   :  { %v10471_v59 = vadd.f32 %v10384_v15, %v4935_v58  ;;  %v4917_v43 = vmul.f32 %v8061_v39, %v10344_v10 }
 0x7fb   :  { %v4938_v50 = vmul.f32 %v10380_v51, %v4918_v31 }
 0x7fc   :  { %v8063_v1 = vpop.eup %8062  ;;  %7045 = vmatprep.mubr.msk.f32.mxu1 %vm66_vm0, %v10471_v59  ;;  %v4937_v62 = vmul.f32 %v10380_v51, %v4917_v43 }
 0x7fd   :  { %v8065_v9 = vpop.eup %8064  ;;  %7046 = vmatmul.mubr.msk.f32.gmra.mrb[106].mxu1 %vm66_vm0, %v10475_v8  ;;  %v4920_v42 = vmul.f32 %v8063_v1, %v10352_v2  ;;  %v10489_v13 = vadd.f32 %v10384_v15, %v4938_v50 }
 0x7fe   :  { %v10485_v41 = vadd.f32 %v10384_v15, %v4937_v62  ;;  %v4919_v10 = vmul.f32 %v8065_v9, %v10356_v49 }
 0x7ff   :  { %v4940_v14 = vmul.f32 %v10380_v51, %v4920_v42 }
 0x800   :  { %v8067_v28 = vpop.eup %8066  ;;  %7048 = vmatprep.mubr.msk.f32.mxu1 %vm66_vm0, %v10485_v41  ;;  %v4939_v54 = vmul.f32 %v10380_v51, %v4919_v10 }
 0x801   :  { %v8069_v12 = vpop.eup %8068  ;;  %7049 = vmatmul.mubr.msk.f32.gmra.mrb[108].mxu1 %vm66_vm0, %v10489_v13  ;;  %v4922_v2 = vmul.f32 %v8067_v28, %v10364_v36  ;;  %v10503_v35 = vadd.f32 %v10384_v15, %v4940_v14 }
 0x802   :  { %v10499_v22 = vadd.f32 %v10384_v15, %v4939_v54  ;;  %v4921_v49 = vmul.f32 %v8069_v12, %v10368_v38  ;;  %v10524_v38 = vld [vmem:[%s10886_s5] ss:$0 sm:$0xff] }
 0x803   :  { %v4942_v37 = vmul.f32 %v10380_v51, %v4922_v2 }
 0x804   :  { %7051 = vmatprep.mubr.msk.f32.mxu1 %vm66_vm0, %v10499_v22  ;;  %v4941_v24 = vmul.f32 %v10380_v51, %v4921_v49 }
 0x805   :  { %7052 = vmatmul.mubr.msk.f32.gmra.mrb[110].mxu1 %vm66_vm0, %v10503_v35  ;;  %v10515_v4 = vadd.f32 %v10384_v15, %v4942_v37 }
 0x806   :  { %v10512_v36 = vadd.f32 %v10384_v15, %v4941_v24 }
 0x808   :  { %7054 = vmatprep.mubr.msk.f32.mxu1 %vm66_vm0, %v10512_v36 }
 0x809   :  { %7055 = vmatmul.mubr.msk.f32.gmra.mrb[112].mxu1 %vm66_vm0, %v10515_v4 }
 0x84b   :  { %v7035_v51 = vpop.f32.mrb[98].mxu1 }
 0x84c   :  { %v5094_v55 = vadd.f32 %v7035_v51, %v10524_v38  ;;  %v5088_v46 = vpop.f32.mrb[99].mxu1 }
 0x84d   :  { %v5089_v11 = vadd.f32 %v10524_v38, %v5088_v46 }
 0x84e   :  { %v5184_v34 = vmul.f32 0.70710677, %v5094_v55  ;;  %v5168_v39 = vmul.f32 0.5, %v5094_v55 }
 0x84f   :  { %v5183_v15 = vmul.f32 0.70710677, %v5089_v11  ;;  %v7038_v21 = vpop.f32.mrb[100].mxu1  ;;  %v5167_v7 = vmul.f32 0.5, %v5089_v11 }
 0x850   :  { %8070 = verf.f32 %v5184_v34  ;;  %v5104_v18 = vadd.f32 %v7038_v21, %v10524_v38  ;;  %v5098_v20 = vpop.f32.mrb[101].mxu1 }
 0x851   :  { %8072 = verf.f32 %v5183_v15  ;;  %v5099_v53 = vadd.f32 %v10524_v38, %v5098_v20 }
 0x852   :  { %v5186_v47 = vmul.f32 0.70710677, %v5104_v18  ;;  %v5170_v10 = vmul.f32 0.5, %v5104_v18 }
 0x853   :  { %v5185_v23 = vmul.f32 0.70710677, %v5099_v53  ;;  %v7041_v45 = vpop.f32.mrb[102].mxu1  ;;  %v5169_v9 = vmul.f32 0.5, %v5099_v53 }
 0x854   :  { %8074 = verf.f32 %v5186_v47  ;;  %v5114_v17 = vadd.f32 %v7041_v45, %v10524_v38  ;;  %v5108_v29 = vpop.f32.mrb[103].mxu1 }
 0x855   :  { %8076 = verf.f32 %v5185_v23  ;;  %v5109_v60 = vadd.f32 %v10524_v38, %v5108_v29 }
 0x856   :  { %v5188_v56 = vmul.f32 0.70710677, %v5114_v17  ;;  %v5172_v24 = vmul.f32 0.5, %v5114_v17 }
 0x857   :  { %v5187_v16 = vmul.f32 0.70710677, %v5109_v60  ;;  %v7044_v61 = vpop.f32.mrb[104].mxu1  ;;  %v5171_v49 = vmul.f32 0.5, %v5109_v60 }
 0x858   :  { %8078 = verf.f32 %v5188_v56  ;;  %v5124_v3 = vadd.f32 %v7044_v61, %v10524_v38  ;;  %v5118_v25 = vpop.f32.mrb[105].mxu1 }
 0x859   :  { %8080 = verf.f32 %v5187_v16  ;;  %v5119_v63 = vadd.f32 %v10524_v38, %v5118_v25 }
 0x85a   :  { %v8071_v0 = vpop.eup %8070  ;;  %v5190_v27 = vmul.f32 0.70710677, %v5124_v3  ;;  %v5174_v18 = vmul.f32 0.5, %v5124_v3 }
 0x85b   :  { %v8073_v19 = vpop.eup %8072  ;;  %v5216_v48 = vadd.f32 1.0, %v8071_v0  ;;  %v5189_v6 = vmul.f32 0.70710677, %v5119_v63  ;;  %v5173_v15 = vmul.f32 0.5, %v5119_v63 }
 0x85c   :  { %v5215_v58 = vadd.f32 1.0, %v8073_v19  ;;  %8082 = verf.f32 %v5190_v27 }
 0x85d   :  { %8084 = verf.f32 %v5189_v6  ;;  %v5232_v1 = vmul.f32 %v5216_v48, %v5168_v39 }
 0x85e   :  { %v8075_v31 = vpop.eup %8074  ;;  %v5231_v43 = vmul.f32 %v5215_v58, %v5167_v7 }
 0x85f   :  { %v8077_v50 = vpop.eup %8076  ;;  %v5218_v62 = vadd.f32 1.0, %v8075_v31 }
 0x860   :  { %v5217_v42 = vadd.f32 1.0, %v8077_v50  ;;  %7073 = vmatprep.mubr.msk.f32.mxu0 %vm1597_vm3, %v5231_v43 }
 0x861   :  { %7074 = vmatmul.mubr.msk.f32.vlgmr.msra.gmra.mrb[110].mxu0 %vm1597_vm3, %v5232_v1  ;;  %v5234_v12 = vmul.f32 %v5218_v62, %v5170_v10 }
 0x862   :  { %v8079_v14 = vpop.eup %8078  ;;  %v5233_v28 = vmul.f32 %v5217_v42, %v5169_v9 }
 0x863   :  { %v8081_v54 = vpop.eup %8080  ;;  %v5220_v2 = vadd.f32 1.0, %v8079_v14 }
 0x864   :  { %v5219_v37 = vadd.f32 1.0, %v8081_v54  ;;  %7076 = vmatprep.mubr.msk.f32.mxu0 %vm1597_vm3, %v5233_v28 }
 0x865   :  { %7077 = vmatmul.mubr.msk.f32.gmra.mrb[112].mxu0 %vm1597_vm3, %v5234_v12  ;;  %v5236_v11 = vmul.f32 %v5220_v2, %v5172_v24 }
 0x866   :  { %v8083_v51 = vpop.eup %8082  ;;  %v5235_v55 = vmul.f32 %v5219_v37, %v5171_v49 }
 0x867   :  { %v8085_v46 = vpop.eup %8084  ;;  %v5222_v34 = vadd.f32 1.0, %v8083_v51 }
 0x868   :  { %v5221_v21 = vadd.f32 1.0, %v8085_v46  ;;  %7079 = vmatprep.mubr.msk.f32.mxu0 %vm1597_vm3, %v5235_v55 }
 0x869   :  { %7080 = vmatmul.mubr.msk.f32.gmra.mrb[114].mxu0 %vm1597_vm3, %v5236_v11  ;;  %v5238_v53 = vmul.f32 %v5222_v34, %v5174_v18 }
 0x86a   :  { %v5237_v20 = vmul.f32 %v5221_v21, %v5173_v15 }
 0x86c   :  { %7082 = vmatprep.mubr.msk.f32.mxu0 %vm1597_vm3, %v5237_v20 }
 0x86d   :  { %7083 = vmatmul.mubr.msk.f32.gmra.mrb[116].mxu0 %vm1597_vm3, %v5238_v53 }
 0x8d0   :  { %v7047_v47 = vpop.f32.mrb[106].mxu1 }
 0x8d1   :  { %v5134_v23 = vadd.f32 %v7047_v47, %v10524_v38  ;;  %v5128_v45 = vpop.f32.mrb[107].mxu1 }
 0x8d2   :  { %v5129_v17 = vadd.f32 %v10524_v38, %v5128_v45 }
 0x8d3   :  { %v5192_v29 = vmul.f32 0.70710677, %v5134_v23  ;;  %v5176_v28 = vmul.f32 0.5, %v5134_v23 }
 0x8d4   :  { %v5191_v60 = vmul.f32 0.70710677, %v5129_v17  ;;  %v7050_v56 = vpop.f32.mrb[108].mxu1  ;;  %v5175_v10 = vmul.f32 0.5, %v5129_v17 }
 0x8d5   :  { %8086 = verf.f32 %v5192_v29  ;;  %v5144_v16 = vadd.f32 %v7050_v56, %v10524_v38  ;;  %v5138_v61 = vpop.f32.mrb[109].mxu1 }
 0x8d6   :  { %8088 = verf.f32 %v5191_v60  ;;  %v5139_v3 = vadd.f32 %v10524_v38, %v5138_v61 }
 0x8d7   :  { %v5194_v25 = vmul.f32 0.70710677, %v5144_v16 }
 0x8d8   :  { %v5193_v63 = vmul.f32 0.70710677, %v5139_v3  ;;  %v7053_v0 = vpop.f32.mrb[110].mxu1  ;;  %v5177_v24 = vmul.f32 0.5, %v5139_v3  ;;  %v5257_v3 = vsub.s32 1, %v10069_v40 }
 0x8d9   :  { %8090 = verf.f32 %v5194_v25  ;;  %v5154_v27 = vadd.f32 %v7053_v0, %v10524_v38  ;;  %v5148_v19 = vpop.f32.mrb[111].mxu1  ;;  %v10562_v25 = vld [vmem:[%s10883_s7] sm:$0xff] }
 0x8da   :  { %8092 = verf.f32 %v5193_v63  ;;  %v5149_v48 = vadd.f32 %v10524_v38, %v5148_v19  ;;  %v10565_v63 = vrot.slane %v10562_v25, %v5257_v3 }
 0x8db   :  { %v5196_v6 = vmul.f32 0.70710677, %v5154_v27  ;;  %v5180_v20 = vmul.f32 0.5, %v5154_v27 }
 0x8dc   :  { %v5195_v7 = vmul.f32 0.70710677, %v5149_v48  ;;  %v7056_v58 = vpop.f32.mrb[112].mxu1  ;;  %v5179_v21 = vmul.f32 0.5, %v5149_v48 }
 0x8dd   :  { %8094 = verf.f32 %v5196_v6  ;;  %v5164_v39 = vadd.f32 %v7056_v58, %v10524_v38  ;;  %v5158_v31 = vpop.f32.mrb[113].mxu1 }
 0x8de   :  { %8096 = verf.f32 %v5195_v7  ;;  %v5159_v43 = vadd.f32 %v10524_v38, %v5158_v31  ;;  %v5178_v38 = vmul.f32 0.5, %v5144_v16 }
 0x8df   :  { %v8087_v50 = vpop.eup %8086  ;;  %v5198_v1 = vmul.f32 0.70710677, %v5164_v39  ;;  %v5182_v56 = vmul.f32 0.5, %v5164_v39 }
 0x8e0   :  { %v8089_v62 = vpop.eup %8088  ;;  %v5224_v9 = vadd.f32 1.0, %v8087_v50  ;;  %v5197_v42 = vmul.f32 0.70710677, %v5159_v43  ;;  %v5181_v29 = vmul.f32 0.5, %v5159_v43 }
 0x8e1   :  { %v5223_v14 = vadd.f32 1.0, %v8089_v62  ;;  %8098 = verf.f32 %v5198_v1 }
 0x8e2   :  { %8100 = verf.f32 %v5197_v42  ;;  %v5240_v49 = vmul.f32 %v5224_v9, %v5176_v28 }
 0x8e3   :  { %v8091_v54 = vpop.eup %8090  ;;  %v5239_v12 = vmul.f32 %v5223_v14, %v5175_v10 }
 0x8e4   :  { %v8093_v2 = vpop.eup %8092  ;;  %v5226_v37 = vadd.f32 1.0, %v8091_v54 }
 0x8e5   :  { %v5225_v51 = vadd.f32 1.0, %v8093_v2  ;;  %7085 = vmatprep.mubr.msk.f32.mxu0 %vm1597_vm3, %v5239_v12 }
 0x8e6   :  { %7086 = vmatmul.mubr.msk.f32.gmra.mrb[118].mxu0 %vm1597_vm3, %v5240_v49  ;;  %v5242_v34 = vmul.f32 %v5226_v37, %v5178_v38 }
 0x8e7   :  { %v8095_v55 = vpop.eup %8094  ;;  %v5241_v46 = vmul.f32 %v5225_v51, %v5177_v24 }
 0x8e8   :  { %v8097_v11 = vpop.eup %8096  ;;  %v5228_v15 = vadd.f32 1.0, %v8095_v55 }
 0x8e9   :  { %v5227_v18 = vadd.f32 1.0, %v8097_v11  ;;  %7088 = vmatprep.mubr.msk.f32.mxu0 %vm1597_vm3, %v5241_v46 }
 0x8ea   :  { %7089 = vmatmul.mubr.msk.f32.gmra.mrb[120].mxu0 %vm1597_vm3, %v5242_v34  ;;  %v5244_v45 = vmul.f32 %v5228_v15, %v5180_v20 }
 0x8eb   :  { %v8099_v53 = vpop.eup %8098  ;;  %v5243_v47 = vmul.f32 %v5227_v18, %v5179_v21 }
 0x8ec   :  { %v8101_v23 = vpop.eup %8100  ;;  %v5230_v17 = vadd.f32 1.0, %v8099_v53 }
 0x8ed   :  { %v5229_v60 = vadd.f32 1.0, %v8101_v23  ;;  %7091 = vmatprep.mubr.msk.f32.mxu0 %vm1597_vm3, %v5243_v47 }
 0x8ee   :  { %7092 = vmatmul.mubr.msk.f32.gmra.mrb[122].mxu0 %vm1597_vm3, %v5244_v45  ;;  %v5246_v61 = vmul.f32 %v5230_v17, %v5182_v56 }
 0x8ef   :  { %v5245_v16 = vmul.f32 %v5229_v60, %v5181_v29 }
 0x8f1   :  { %7094 = vmatprep.mubr.msk.f32.mxu0 %vm1597_vm3, %v5245_v16 }
 0x8f2   :  { %7095 = vmatmul.mubr.msk.f32.gmra.mrb[124].mxu0 %vm1597_vm3, %v5246_v61 }
 0x934   :  { %v7075_v0 = vpop.f32.mrb[110].mxu0 }
 0x935   :  { %v5379_v27 = vadd.f32 %v7075_v0, %v10565_v63  ;;  %v5373_v19 = vpop.f32.mrb[111].mxu0 }
 0x936   :  { %v5374_v48 = vadd.f32 %v5373_v19, %v10565_v63 }
 0x937   :  { %v10570_v6 = vadd.f32 %v5379_v27, %v10395_v44 }
 0x938   :  { %v10573_v7 = vadd.f32 %v5374_v48, %v10391_v30  ;;  %v7078_v58 = vpop.f32.mrb[112].mxu0 }
 0x939   :  { %v5389_v39 = vadd.f32 %v7078_v58, %v10565_v63  ;;  %v5383_v31 = vpop.f32.mrb[113].mxu0  ;;  %v5471_v43 = vsel %vm66_vm0, %v10570_v6, 0.0 }
 0x93a   :  { %v5384_v50 = vadd.f32 %v5383_v31, %v10565_v63  ;;  %5472 = vadd.xlane.f32.xlu0 %v5471_v43  ;;  %v5468_v1 = vsel %vm66_vm0, %v10573_v7, 0.0 }
 0x93b   :  { %v10582_v62 = vadd.f32 %v5389_v39, %v10409_v33  ;;  %5469 = vadd.xlane.f32.xlu1 %v5468_v1 }
 0x93c   :  { %v10585_v30 = vadd.f32 %v5384_v50, %v10405_v57  ;;  %v7081_v44 = vpop.f32.mrb[114].mxu0 }
 0x93d   :  { %v5399_v9 = vadd.f32 %v7081_v44, %v10565_v63  ;;  %v5393_v42 = vpop.f32.mrb[115].mxu0  ;;  %v5477_v10 = vsel %vm66_vm0, %v10582_v62, 0.0 }
 0x93e   :  { %v5394_v14 = vadd.f32 %v5393_v42, %v10565_v63  ;;  %5478 = vadd.xlane.f32.xlu0 %v5477_v10  ;;  %v5474_v28 = vsel %vm66_vm0, %v10585_v30, 0.0 }
 0x93f   :  { %v10594_v33 = vadd.f32 %v5399_v9, %v10423_v5  ;;  %5475 = vadd.xlane.f32.xlu1 %v5474_v28 }
 0x940   :  { %v10597_v57 = vadd.f32 %v5394_v14, %v10419_v52  ;;  %v7084_v54 = vpop.f32.mrb[116].mxu0 }
 0x941   :  { %v5409_v12 = vadd.f32 %v7084_v54, %v10565_v63  ;;  %v5403_v2 = vpop.f32.mrb[117].mxu0  ;;  %v5483_v49 = vsel %vm66_vm0, %v10594_v33, 0.0 }
 0x942   :  { %v5404_v37 = vadd.f32 %v5403_v2, %v10565_v63  ;;  %5484 = vadd.xlane.f32.xlu0 %v5483_v49  ;;  %v5480_v24 = vsel %vm66_vm0, %v10597_v57, 0.0 }
 0x943   :  { %v10606_v5 = vadd.f32 %v5409_v12, %v10435_v26  ;;  %5481 = vadd.xlane.f32.xlu1 %v5480_v24 }
 0x944   :  { %v10609_v52 = vadd.f32 %v5404_v37, %v10432_v32 }
 0x945   :  { %v5489_v51 = vsel %vm66_vm0, %v10606_v5, 0.0 }
 0x946   :  { %5490 = vadd.xlane.f32.xlu0 %v5489_v51  ;;  %v5486_v38 = vsel %vm66_vm0, %v10609_v52, 0.0 }
 0x947   :  { %5487 = vadd.xlane.f32.xlu1 %v5486_v38 }
 0x9b9   :  { %v7087_v55 = vpop.f32.mrb[118].mxu0 }
 0x9ba   :  { %v5419_v46 = vadd.f32 %v7087_v55, %v10565_v63  ;;  %v5413_v11 = vpop.f32.mrb[119].mxu0 }
 0x9bb   :  { %v5414_v34 = vadd.f32 %v5413_v11, %v10565_v63 }
 0x9bc   :  { %v10618_v26 = vadd.f32 %v5419_v46, %v10475_v8 }
 0x9bd   :  { %v10621_v32 = vadd.f32 %v5414_v34, %v10471_v59  ;;  %v7090_v15 = vpop.f32.mrb[120].mxu0 }
 0x9be   :  { %v5429_v21 = vadd.f32 %v7090_v15, %v10565_v63  ;;  %v5423_v18 = vpop.f32.mrb[121].mxu0  ;;  %v5495_v20 = vsel %vm66_vm0, %v10618_v26, 0.0 }
 0x9bf   :  { %v5424_v53 = vadd.f32 %v5423_v18, %v10565_v63  ;;  %5496 = vadd.xlane.f32.xlu0 %v5495_v20  ;;  %v5492_v47 = vsel %vm66_vm0, %v10621_v32, 0.0 }
 0x9c0   :  { %v10630_v23 = vadd.f32 %v5429_v21, %v10489_v13  ;;  %5493 = vadd.xlane.f32.xlu1 %v5492_v47 }
 0x9c1   :  { %v10633_v59 = vadd.f32 %v5424_v53, %v10485_v41  ;;  %v7093_v8 = vpop.f32.mrb[122].mxu0 }
 0x9c2   :  { %v5439_v45 = vadd.f32 %v7093_v8, %v10565_v63  ;;  %v5433_v17 = vpop.f32.mrb[123].mxu0  ;;  %v5501_v29 = vsel %vm66_vm0, %v10630_v23, 0.0 }
 0x9c3   :  { %v5434_v60 = vadd.f32 %v5433_v17, %v10565_v63  ;;  %5502 = vadd.xlane.f32.xlu0 %v5501_v29  ;;  %v5498_v56 = vsel %vm66_vm0, %v10633_v59, 0.0 }
 0x9c4   :  { %v10642_v13 = vadd.f32 %v5439_v45, %v10503_v35  ;;  %5499 = vadd.xlane.f32.xlu1 %v5498_v56 }
 0x9c5   :  { %v10645_v41 = vadd.f32 %v5434_v60, %v10499_v22  ;;  %v7096_v16 = vpop.f32.mrb[124].mxu0 }
 0x9c6   :  { %v5449_v61 = vadd.f32 %v7096_v16, %v10565_v63  ;;  %v5443_v3 = vpop.f32.mrb[125].mxu0  ;;  %v5507_v0 = vsel %vm66_vm0, %v10642_v13, 0.0 }
 0x9c7   :  { %v5444_v27 = vadd.f32 %v5443_v3, %v10565_v63  ;;  %v5473_v19 = vpop.xlane.xlu0 %5472  ;;  %5508 = vadd.xlane.f32.xlu0 %v5507_v0  ;;  %v5504_v48 = vsel %vm66_vm0, %v10645_v41, 0.0 }
 0x9c8   :  { %v10654_v35 = vadd.f32 %v5449_v61, %v10515_v4  ;;  %v5517_v58 = vmul.f32 0.03125, %v5473_v19  ;;  %5505 = vadd.xlane.f32.xlu1 %v5504_v48  ;;  %v5470_v22 = vpop.xlane.xlu1 %5469 }
 0x9c9   :  { %v10657_v39 = vadd.f32 %v5444_v27, %v10512_v36  ;;  %v5516_v31 = vmul.f32 0.03125, %v5470_v22 }
 0x9ca   :  { %v10660_v43 = vsub.f32 %v10570_v6, %v5517_v58  ;;  %v5513_v63 = vsel %vm66_vm0, %v10654_v35, 0.0 }
 0x9cb   :  { %v10665_v50 = vsub.f32 %v10573_v7, %v5516_v31  ;;  %v5479_v1 = vpop.xlane.xlu0 %5478  ;;  %5514 = vadd.xlane.f32.xlu0 %v5513_v63  ;;  %v5510_v4 = vsel %vm66_vm0, %v10657_v39, 0.0 }
 0x9cc   :  { %v5519_v44 = vmul.f32 0.03125, %v5479_v1  ;;  %5511 = vadd.xlane.f32.xlu1 %v5510_v4  ;;  %v5476_v9 = vpop.xlane.xlu1 %5475  ;;  %v5549_v36 = vmul.f32 %v10660_v43, %v10660_v43 }
 0x9cd   :  { %v5518_v42 = vmul.f32 0.03125, %v5476_v9  ;;  %v5548_v6 = vmul.f32 %v10665_v50, %v10665_v50 }
 0x9ce   :  { %v10674_v10 = vsub.f32 %v10582_v62, %v5519_v44  ;;  %v5567_v7 = vsel %vm66_vm0, %v5549_v36, 0.0 }
 0x9cf   :  { %v10678_v14 = vsub.f32 %v10585_v30, %v5518_v42  ;;  %v5485_v28 = vpop.xlane.xlu0 %5484  ;;  %5568 = vadd.xlane.f32.xlu0 %v5567_v7  ;;  %v5564_v54 = vsel %vm66_vm0, %v5548_v6, 0.0 }
 0x9d0   :  { %v5521_v12 = vmul.f32 0.03125, %v5485_v28  ;;  %5565 = vadd.xlane.f32.xlu1 %v5564_v54  ;;  %v5482_v2 = vpop.xlane.xlu1 %5481  ;;  %v5551_v49 = vmul.f32 %v10674_v10, %v10674_v10 }
 0x9d1   :  { %v5520_v37 = vmul.f32 0.03125, %v5482_v2  ;;  %v5550_v62 = vmul.f32 %v10678_v14, %v10678_v14 }
 0x9d2   :  { %v10686_v24 = vsub.f32 %v10594_v33, %v5521_v12  ;;  %v5573_v30 = vsel %vm66_vm0, %v5551_v49, 0.0 }
 0x9d3   :  { %v10690_v51 = vsub.f32 %v10597_v57, %v5520_v37  ;;  %v5491_v38 = vpop.xlane.xlu0 %5490  ;;  %5574 = vadd.xlane.f32.xlu0 %v5573_v30  ;;  %v5570_v55 = vsel %vm66_vm0, %v5550_v62, 0.0 }
 0x9d4   :  { %v5523_v46 = vmul.f32 0.03125, %v5491_v38  ;;  %5571 = vadd.xlane.f32.xlu1 %v5570_v55  ;;  %v5488_v11 = vpop.xlane.xlu1 %5487  ;;  %v5553_v34 = vmul.f32 %v10686_v24, %v10686_v24 }
 0x9d5   :  { %v5522_v15 = vmul.f32 0.03125, %v5488_v11  ;;  %v5552_v33 = vmul.f32 %v10690_v51, %v10690_v51 }
 0x9d6   :  { %v10698_v21 = vsub.f32 %v10606_v5, %v5523_v46  ;;  %v5579_v57 = vsel %vm66_vm0, %v5553_v34, 0.0 }
 0x9d7   :  { %v10702_v18 = vsub.f32 %v10609_v52, %v5522_v15  ;;  %5580 = vadd.xlane.f32.xlu0 %v5579_v57  ;;  %v5576_v20 = vsel %vm66_vm0, %v5552_v33, 0.0 }
 0x9d8   :  { %5577 = vadd.xlane.f32.xlu1 %v5576_v20  ;;  %v5555_v53 = vmul.f32 %v10698_v21, %v10698_v21 }
 0x9d9   :  { %v5554_v47 = vmul.f32 %v10702_v18, %v10702_v18 }
 0x9da   :  { %v5585_v8 = vsel %vm66_vm0, %v5555_v53, 0.0 }
 0x9db   :  { %5586 = vadd.xlane.f32.xlu0 %v5585_v8  ;;  %v5582_v5 = vsel %vm66_vm0, %v5554_v47, 0.0 }
 0x9dc   :  { %5583 = vadd.xlane.f32.xlu1 %v5582_v5 }
 0xa4c   :  { %v5497_v45 = vpop.xlane.xlu0 %5496 }
 0xa4d   :  { %v5525_v17 = vmul.f32 0.03125, %v5497_v45  ;;  %v5494_v52 = vpop.xlane.xlu1 %5493 }
 0xa4e   :  { %v5524_v29 = vmul.f32 0.03125, %v5494_v52 }
 0xa4f   :  { %v10712_v60 = vsub.f32 %v10618_v26, %v5525_v17  ;;  %v5678_v17 = vsub.s32 4, %v10069_v40 }
 0xa50   :  { %v10715_v56 = vsub.f32 %v10621_v32, %v5524_v29  ;;  %v5503_v16 = vpop.xlane.xlu0 %5502 }
 0xa51   :  { %v5527_v61 = vmul.f32 0.03125, %v5503_v16  ;;  %v5500_v3 = vpop.xlane.xlu1 %5499  ;;  %v5557_v0 = vmul.f32 %v10712_v60, %v10712_v60  ;;  %v5698_v16 = vsub.s32 5, %v10069_v40 }
 0xa52   :  { %v5526_v27 = vmul.f32 0.03125, %v5500_v3  ;;  %v5556_v19 = vmul.f32 %v10715_v56, %v10715_v56 }
 0xa53   :  { %v10722_v48 = vsub.f32 %v10630_v23, %v5527_v61  ;;  %v5591_v58 = vsel %vm66_vm0, %v5557_v0, 0.0 }
 0xa54   :  { %v10726_v26 = vsub.f32 %v10633_v59, %v5526_v27  ;;  %v5509_v32 = vpop.xlane.xlu0 %5508  ;;  %5592 = vadd.xlane.f32.xlu0 %v5591_v58  ;;  %v5588_v22 = vsel %vm66_vm0, %v5556_v19, 0.0  ;;  %v10762_v19 = vrot.slane %v10562_v25, %v5678_v17 }
 0xa55   :  { %v5529_v31 = vmul.f32 0.03125, %v5509_v32  ;;  %5589 = vadd.xlane.f32.xlu1 %v5588_v22  ;;  %v5506_v63 = vpop.xlane.xlu1 %5505  ;;  %v5559_v1 = vmul.f32 %v10722_v48, %v10722_v48 }
 0xa56   :  { %v5528_v4 = vmul.f32 0.03125, %v5506_v63  ;;  %v5558_v23 = vmul.f32 %v10726_v26, %v10726_v26  ;;  %v10765_v63 = vrot.slane %v10562_v25, %v5698_v16 }
 0xa57   :  { %v10734_v44 = vsub.f32 %v10642_v13, %v5529_v31  ;;  %v5597_v59 = vsel %vm66_vm0, %v5559_v1, 0.0 }
 0xa58   :  { %v10738_v9 = vsub.f32 %v10645_v41, %v5528_v4  ;;  %5598 = vadd.xlane.f32.xlu0 %v5597_v59  ;;  %v5515_v36 = vpop.xlane.xlu0 %5514  ;;  %v5594_v42 = vsel %vm66_vm0, %v5558_v23, 0.0 }
 0xa59   :  { %v5531_v6 = vmul.f32 0.03125, %v5515_v36  ;;  %5595 = vadd.xlane.f32.xlu1 %v5594_v42  ;;  %v5512_v7 = vpop.xlane.xlu1 %5511  ;;  %v5561_v28 = vmul.f32 %v10734_v44, %v10734_v44 }
 0xa5a   :  { %v5530_v54 = vmul.f32 0.03125, %v5512_v7  ;;  %v5560_v13 = vmul.f32 %v10738_v9, %v10738_v9 }
 0xa5b   :  { %v10746_v12 = vsub.f32 %v10654_v35, %v5531_v6  ;;  %v5603_v41 = vsel %vm66_vm0, %v5561_v28, 0.0 }
 0xa5c   :  { %v10750_v2 = vsub.f32 %v10657_v39, %v5530_v54  ;;  %5604 = vadd.xlane.f32.xlu0 %v5603_v41  ;;  %v5569_v49 = vpop.xlane.xlu0 %5568  ;;  %v5600_v37 = vsel %vm66_vm0, %v5560_v13, 0.0 }
 0xa5d   :  { %v5613_v62 = vmul.f32 0.03125, %v5569_v49  ;;  %5601 = vadd.xlane.f32.xlu1 %v5600_v37  ;;  %v5566_v30 = vpop.xlane.xlu1 %5565  ;;  %v5563_v38 = vmul.f32 %v10746_v12, %v10746_v12 }
 0xa5e   :  { %v5612_v55 = vmul.f32 0.03125, %v5566_v30  ;;  %v5562_v35 = vmul.f32 %v10750_v2, %v10750_v2 }
 0xa5f   :  { %v5629_v46 = vadd.f32 1e-05, %v5613_v62  ;;  %v5609_v11 = vsel %vm66_vm0, %v5563_v38, 0.0 }
 0xa60   :  { %v5628_v34 = vadd.f32 1e-05, %v5612_v55  ;;  %5610 = vadd.xlane.f32.xlu0 %v5609_v11  ;;  %v5575_v39 = vpop.xlane.xlu0 %5574  ;;  %v5606_v15 = vsel %vm66_vm0, %v5562_v35, 0.0 }
 0xa61   :  { %8102 = vrsqrt.f32 %v5629_v46  ;;  %v5615_v33 = vmul.f32 0.03125, %v5575_v39  ;;  %5607 = vadd.xlane.f32.xlu1 %v5606_v15  ;;  %v5572_v57 = vpop.xlane.xlu1 %5571 }
 0xa62   :  { %8104 = vrsqrt.f32 %v5628_v34  ;;  %v5614_v20 = vmul.f32 0.03125, %v5572_v57 }
 0xa63   :  { %v5631_v53 = vadd.f32 1e-05, %v5615_v33 }
 0xa64   :  { %v5630_v47 = vadd.f32 1e-05, %v5614_v20  ;;  %v5581_v8 = vpop.xlane.xlu0 %5580 }
 0xa65   :  { %8106 = vrsqrt.f32 %v5631_v53  ;;  %v5617_v5 = vmul.f32 0.03125, %v5581_v8  ;;  %v5578_v45 = vpop.xlane.xlu1 %5577 }
 0xa66   :  { %8108 = vrsqrt.f32 %v5630_v47  ;;  %v5616_v52 = vmul.f32 0.03125, %v5578_v45 }
 0xa67   :  { %v5633_v29 = vadd.f32 1e-05, %v5617_v5 }
 0xa68   :  { %v5632_v61 = vadd.f32 1e-05, %v5616_v52  ;;  %v5587_v3 = vpop.xlane.xlu0 %5586 }
 0xa69   :  { %8110 = vrsqrt.f32 %v5633_v29  ;;  %v5619_v0 = vmul.f32 0.03125, %v5587_v3  ;;  %v5584_v27 = vpop.xlane.xlu1 %5583 }
 0xa6a   :  { %8112 = vrsqrt.f32 %v5632_v61  ;;  %v5618_v58 = vmul.f32 0.03125, %v5584_v27 }
 0xa6b   :  { %v8103_v32 = vpop.eup %8102  ;;  %v5635_v22 = vadd.f32 1e-05, %v5619_v0 }
 0xa6c   :  { %v8105_v31 = vpop.eup %8104  ;;  %v5661_v1 = vmul.f32 %v8103_v32, %v10660_v43  ;;  %v5634_v4 = vadd.f32 1e-05, %v5618_v58 }
 0xa6d   :  { %v5660_v40 = vmul.f32 %v8105_v31, %v10665_v50  ;;  %8114 = vrsqrt.f32 %v5635_v22 }
 0xa6e   :  { %v5681_v23 = vmul.f32 %v10762_v19, %v5661_v1  ;;  %8116 = vrsqrt.f32 %v5634_v4 }
 0xa6f   :  { %v8107_v59 = vpop.eup %8106  ;;  %v5680_v36 = vmul.f32 %v10762_v19, %v5660_v40 }
 0xa70   :  { %v8109_v42 = vpop.eup %8108  ;;  %v5701_v6 = vadd.f32 %v10765_v63, %v5681_v23  ;;  %v5663_v7 = vmul.f32 %v8107_v59, %v10674_v10 }
 0xa71   :  { %v5700_v25 = vadd.f32 %v10765_v63, %v5680_v36  ;;  %v5662_v28 = vmul.f32 %v8109_v42, %v10678_v14 }
 0xa72   :  { %5717 = vst.msk [vmem:[%s10887_s8 + $0x8] sm:$0xff] %vm66_vm0, %v5701_v6  ;;  %v5683_v43 = vmul.f32 %v10762_v19, %v5663_v7 }
 0xa73   :  { %v8111_v50 = vpop.eup %8110  ;;  %5716 = vst.msk [vmem:[%s10887_s8] sm:$0xff] %vm66_vm0, %v5700_v25  ;;  %v5682_v54 = vmul.f32 %v10762_v19, %v5662_v28 }
 0xa74   :  { %v8113_v10 = vpop.eup %8112  ;;  %v5703_v13 = vadd.f32 %v10765_v63, %v5683_v43  ;;  %v5665_v14 = vmul.f32 %v8111_v50, %v10686_v24 }
 0xa75   :  { %v5702_v41 = vadd.f32 %v10765_v63, %v5682_v54  ;;  %v5664_v49 = vmul.f32 %v8113_v10, %v10690_v51 }
 0xa76   :  { %5719 = vst.msk [vmem:[%s10887_s8 + $0x18] sm:$0xff] %vm66_vm0, %v5703_v13  ;;  %v5685_v37 = vmul.f32 %v10762_v19, %v5665_v14 }
 0xa77   :  { %v8115_v62 = vpop.eup %8114  ;;  %5718 = vst.msk [vmem:[%s10887_s8 + $0x10] sm:$0xff] %vm66_vm0, %v5702_v41  ;;  %v5684_v30 = vmul.f32 %v10762_v19, %v5664_v49 }
 0xa78   :  { %v8117_v24 = vpop.eup %8116  ;;  %v5705_v38 = vadd.f32 %v10765_v63, %v5685_v37  ;;  %v5667_v51 = vmul.f32 %v8115_v62, %v10698_v21 }
 0xa79   :  { %v5704_v55 = vadd.f32 %v10765_v63, %v5684_v30  ;;  %v5666_v35 = vmul.f32 %v8117_v24, %v10702_v18 }
 0xa7a   :  { %5721 = vst.msk [vmem:[%s10887_s8 + $0x28] sm:$0xff] %vm66_vm0, %v5705_v38  ;;  %v5687_v46 = vmul.f32 %v10762_v19, %v5667_v51 }
 0xa7b   :  { %5720 = vst.msk [vmem:[%s10887_s8 + $0x20] sm:$0xff] %vm66_vm0, %v5704_v55  ;;  %v5686_v11 = vmul.f32 %v10762_v19, %v5666_v35 }
 0xa7c   :  { %v5707_v21 = vadd.f32 %v10765_v63, %v5687_v46 }
 0xa7d   :  { %v5706_v34 = vadd.f32 %v10765_v63, %v5686_v11 }
 0xa7e   :  { %5723 = vst.msk [vmem:[%s10887_s8 + $0x38] sm:$0xff] %vm66_vm0, %v5707_v21 }
 0xa7f   :  { %5722 = vst.msk [vmem:[%s10887_s8 + $0x30] sm:$0xff] %vm66_vm0, %v5706_v34 }
 0xae1   :  { %v5593_v18 = vpop.xlane.xlu0 %5592 }
 0xae2   :  { %v5621_v39 = vmul.f32 0.03125, %v5593_v18  ;;  %v5590_v15 = vpop.xlane.xlu1 %5589 }
 0xae3   :  { %v5620_v33 = vmul.f32 0.03125, %v5590_v15 }
 0xae4   :  { %v5637_v57 = vadd.f32 1e-05, %v5621_v39 }
 0xae5   :  { %v5636_v20 = vadd.f32 1e-05, %v5620_v33  ;;  %v5599_v53 = vpop.xlane.xlu0 %5598 }
 0xae6   :  { %8118 = vrsqrt.f32 %v5637_v57  ;;  %v5623_v47 = vmul.f32 0.03125, %v5599_v53  ;;  %v5596_v8 = vpop.xlane.xlu1 %5595 }
 0xae7   :  { %8120 = vrsqrt.f32 %v5636_v20  ;;  %v5622_v5 = vmul.f32 0.03125, %v5596_v8 }
 0xae8   :  { %v5639_v45 = vadd.f32 1e-05, %v5623_v47 }
 0xae9   :  { %v5638_v17 = vadd.f32 1e-05, %v5622_v5  ;;  %v5605_v52 = vpop.xlane.xlu0 %5604 }
 0xaea   :  { %8122 = vrsqrt.f32 %v5639_v45  ;;  %v5625_v29 = vmul.f32 0.03125, %v5605_v52  ;;  %v5602_v16 = vpop.xlane.xlu1 %5601 }
 0xaeb   :  { %8124 = vrsqrt.f32 %v5638_v17  ;;  %v5624_v61 = vmul.f32 0.03125, %v5602_v16 }
 0xaec   :  { %v5641_v3 = vadd.f32 1e-05, %v5625_v29 }
 0xaed   :  { %v5640_v0 = vadd.f32 1e-05, %v5624_v61  ;;  %v5611_v27 = vpop.xlane.xlu0 %5610 }
 0xaee   :  { %8126 = vrsqrt.f32 %v5641_v3  ;;  %v5627_v58 = vmul.f32 0.03125, %v5611_v27  ;;  %v5608_v32 = vpop.xlane.xlu1 %5607 }
 0xaef   :  { %8128 = vrsqrt.f32 %v5640_v0  ;;  %v5626_v22 = vmul.f32 0.03125, %v5608_v32 }
 0xaf0   :  { %v8119_v31 = vpop.eup %8118  ;;  %v5643_v1 = vadd.f32 1e-05, %v5627_v58 }
 0xaf1   :  { %v8121_v4 = vpop.eup %8120  ;;  %v5669_v40 = vmul.f32 %v8119_v31, %v10712_v60  ;;  %v5642_v23 = vadd.f32 1e-05, %v5626_v22 }
 0xaf2   :  { %v5668_v59 = vmul.f32 %v8121_v4, %v10715_v56  ;;  %8130 = vrsqrt.f32 %v5643_v1 }
 0xaf3   :  { %v5689_v36 = vmul.f32 %v10762_v19, %v5669_v40  ;;  %8132 = vrsqrt.f32 %v5642_v23 }
 0xaf4   :  { %v8123_v42 = vpop.eup %8122  ;;  %v5688_v6 = vmul.f32 %v10762_v19, %v5668_v59 }
 0xaf5   :  { %v8125_v7 = vpop.eup %8124  ;;  %v5709_v25 = vadd.f32 %v10765_v63, %v5689_v36  ;;  %v5671_v28 = vmul.f32 %v8123_v42, %v10722_v48 }
 0xaf6   :  { %v5708_v43 = vadd.f32 %v10765_v63, %v5688_v6  ;;  %v5670_v50 = vmul.f32 %v8125_v7, %v10726_v26 }
 0xaf7   :  { %5725 = vst.msk [vmem:[%s10887_s8 + $0x48] sm:$0xff] %vm66_vm0, %v5709_v25  ;;  %v5691_v60 = vmul.f32 %v10762_v19, %v5671_v28 }
 0xaf8   :  { %v8127_v56 = vpop.eup %8126  ;;  %5724 = vst.msk [vmem:[%s10887_s8 + $0x40] sm:$0xff] %vm66_vm0, %v5708_v43  ;;  %v5690_v54 = vmul.f32 %v10762_v19, %v5670_v50 }
 0xaf9   :  { %v8129_v48 = vpop.eup %8128  ;;  %v5711_v10 = vadd.f32 %v10765_v63, %v5691_v60  ;;  %v5673_v26 = vmul.f32 %v8127_v56, %v10734_v44 }
 0xafa   :  { %v5710_v13 = vadd.f32 %v10765_v63, %v5690_v54  ;;  %v5672_v14 = vmul.f32 %v8129_v48, %v10738_v9 }
 0xafb   :  { %5727 = vst.msk [vmem:[%s10887_s8 + $0x58] sm:$0xff] %vm66_vm0, %v5711_v10  ;;  %v5693_v41 = vmul.f32 %v10762_v19, %v5673_v26 }
 0xafc   :  { %v8131_v49 = vpop.eup %8130  ;;  %5726 = vst.msk [vmem:[%s10887_s8 + $0x50] sm:$0xff] %vm66_vm0, %v5710_v13  ;;  %v5692_v37 = vmul.f32 %v10762_v19, %v5672_v14 }
 0xafd   :  { %v8133_v44 = vpop.eup %8132  ;;  %v5713_v62 = vadd.f32 %v10765_v63, %v5693_v41  ;;  %v5675_v9 = vmul.f32 %v8131_v49, %v10746_v12 }
 0xafe   :  { %v5712_v30 = vadd.f32 %v10765_v63, %v5692_v37  ;;  %v5674_v24 = vmul.f32 %v8133_v44, %v10750_v2 }
 0xaff   :  { %5729 = vst.msk [vmem:[%s10887_s8 + $0x68] sm:$0xff] %vm66_vm0, %v5713_v62  ;;  %v5695_v38 = vmul.f32 %v10762_v19, %v5675_v9 }
 0xb00   :  { %5728 = vst.msk [vmem:[%s10887_s8 + $0x60] sm:$0xff] %vm66_vm0, %v5712_v30  ;;  %v5694_v51 = vmul.f32 %v10762_v19, %v5674_v24 }
 0xb01   :  { %v5715_v12 = vadd.f32 %v10765_v63, %v5695_v38 }
 0xb02   :  { %v5714_v55 = vadd.f32 %v10765_v63, %v5694_v51 }
 0xb03   :  { %5731 = vst.msk [vmem:[%s10887_s8 + $0x78] sm:$0xff] %vm66_vm0, %v5715_v12 }
 0xb04   :  { %5730 = vst.msk [vmem:[%s10887_s8 + $0x70] sm:$0xff] %vm66_vm0, %v5714_v55 }

</bundles_post_ra>
